<compile_context>
chip_gen: v7x
topology: tpu7x:2x2x1
jax: 0.10.0
libtpu: 0.0.40
codegen_flags: <defaults>
</compile_context>

<pallas_src>
import functools

import jax
import jax.numpy as jnp
from jax.experimental import pallas as pl
from jax.experimental.pallas import tpu as pltpu


def _encoder_layer_kernel(x_ref,                       # (1, S, E) f32
                          wq_ref, bq_ref,              # (E, E) bf16, (1, E) f32
                          wk_ref, bk_ref,
                          wv_ref, bv_ref,
                          wo_ref, bo_ref,              # out_proj
                          g1_ref, be1_ref,             # LayerNorm 1 (1, E) f32
                          w1_ref, b1_ref,              # linear1 (E, F) bf16, (1, F) f32
                          w2_ref, b2_ref,              # linear2 (F, E) bf16, (1, E) f32
                          g2_ref, be2_ref,             # LayerNorm 2 (1, E) f32
                          o_ref,                       # (1, S, E) f32
                          *, nhead, head_dim, eps=1e-5):
    x = x_ref[0]                                        # (S, E) f32
    S, E = x.shape
    x_bf = x.astype(jnp.bfloat16)

    # --- in-projection: Q, K, V (MXU, bf16 operands, f32 accumulate) ---
    q = jnp.dot(x_bf, wq_ref[...], preferred_element_type=jnp.float32) + bq_ref[...]
    k = jnp.dot(x_bf, wk_ref[...], preferred_element_type=jnp.float32) + bk_ref[...]
    v = jnp.dot(x_bf, wv_ref[...], preferred_element_type=jnp.float32) + bv_ref[...]

    scale = 1.0 / (head_dim ** 0.5)

    # --- per-head scaled dot-product attention (nhead is small, static unroll) ---
    head_outs = []
    for h in range(nhead):
        sl = slice(h * head_dim, (h + 1) * head_dim)
        qh = (q[:, sl] * scale).astype(jnp.bfloat16)    # (S, Dh)
        kh = k[:, sl].astype(jnp.bfloat16)              # (S, Dh)
        vh = v[:, sl].astype(jnp.bfloat16)              # (S, Dh)

        # scores = qh @ kh^T  (contract the head dims; no explicit transpose)
        s = jax.lax.dot_general(qh, kh, (((1,), (1,)), ((), ())),
                                preferred_element_type=jnp.float32)   # (S, S) f32

        # softmax over keys, f32, divide via EUP reciprocal
        s_max = jnp.max(s, axis=-1, keepdims=True)
        e = jnp.exp(s - s_max)
        denom = jnp.sum(e, axis=-1, keepdims=True)
        p = e * pl.reciprocal(denom, approx=True)                      # (S, S) f32

        oh = jnp.dot(p.astype(jnp.bfloat16), vh,
                     preferred_element_type=jnp.float32)               # (S, Dh) f32
        head_outs.append(oh)

    attn = jnp.concatenate(head_outs, axis=-1)                         # (S, E) f32

    # --- output projection ---
    src2 = jnp.dot(attn.astype(jnp.bfloat16), wo_ref[...],
                   preferred_element_type=jnp.float32) + bo_ref[...]   # (S, E)

    # --- residual + LayerNorm 1 (dropout1 = identity in eval) ---
    y = x + src2
    mu = jnp.sum(y, axis=-1, keepdims=True) * (1.0 / E)
    d = y - mu
    var = jnp.sum(d * d, axis=-1, keepdims=True) * (1.0 / E)
    y = d * jax.lax.rsqrt(var + eps) * g1_ref[...] + be1_ref[...]      # (S, E) f32

    # --- feed-forward: linear2(relu(linear1(y))) (dropout = identity) ---
    hdn = jnp.maximum(
        jnp.dot(y.astype(jnp.bfloat16), w1_ref[...],
                preferred_element_type=jnp.float32) + b1_ref[...], 0.0)  # (S, F)
    src2 = jnp.dot(hdn.astype(jnp.bfloat16), w2_ref[...],
                   preferred_element_type=jnp.float32) + b2_ref[...]     # (S, E)

    # --- residual + LayerNorm 2 ---
    z = y + src2
    mu = jnp.sum(z, axis=-1, keepdims=True) * (1.0 / E)
    d = z - mu
    var = jnp.sum(d * d, axis=-1, keepdims=True) * (1.0 / E)
    o_ref[0] = d * jax.lax.rsqrt(var + eps) * g2_ref[...] + be2_ref[...]


def encoder_layer_forward(src, params, *, nhead):
    """src: (S, B, E) f32 — same (seq, batch, embed) layout as the PyTorch module."""
    S, B, E = src.shape
    assert E % nhead == 0, "d_model must be divisible by nhead"
    head_dim = E // nhead
    F = params["w1"].shape[1]

    # batch-major slab so each grid step gets one lane-dense (S, E) tile
    x = jnp.transpose(src, (1, 0, 2))                    # (B, S, E)

    # matmul weights go to bf16 (halves HBM traffic + resident VMEM);
    # biases and LayerNorm affine params stay f32.
    bf = lambda w: w.astype(jnp.bfloat16)

    full2 = lambda b: (0, 0)     # weights: same block every grid step (resident)

    kernel = functools.partial(_encoder_layer_kernel, nhead=nhead, head_dim=head_dim)

    out = pl.pallas_call(
        kernel,
        out_shape=jax.ShapeDtypeStruct((B, S, E), jnp.float32),
        grid_spec=pltpu.PrefetchScalarGridSpec(
            num_scalar_prefetch=0,
            grid=(B,),
            in_specs=[
                pl.BlockSpec((1, S, E), lambda b: (b, 0, 0)),            # src tile
                pl.BlockSpec((E, E), full2), pl.BlockSpec((1, E), full2),  # Wq, bq
                pl.BlockSpec((E, E), full2), pl.BlockSpec((1, E), full2),  # Wk, bk
                pl.BlockSpec((E, E), full2), pl.BlockSpec((1, E), full2),  # Wv, bv
                pl.BlockSpec((E, E), full2), pl.BlockSpec((1, E), full2),  # Wo, bo
                pl.BlockSpec((1, E), full2), pl.BlockSpec((1, E), full2),  # ln1 g, b
                pl.BlockSpec((E, F), full2), pl.BlockSpec((1, F), full2),  # W1, b1
                pl.BlockSpec((F, E), full2), pl.BlockSpec((1, E), full2),  # W2, b2
                pl.BlockSpec((1, E), full2), pl.BlockSpec((1, E), full2),  # ln2 g, b
            ],
            out_specs=pl.BlockSpec((1, S, E), lambda b: (b, 0, 0)),
        ),
        compiler_params=pltpu.CompilerParams(
            dimension_semantics=("parallel",)),
    )(x,
      bf(params["wq"]), params["bq"],
      bf(params["wk"]), params["bk"],
      bf(params["wv"]), params["bv"],
      bf(params["wo"]), params["bo"],
      params["ln1_g"], params["ln1_b"],
      bf(params["w1"]), params["b1"],
      bf(params["w2"]), params["b2"],
      params["ln2_g"], params["ln2_b"])

    return jnp.transpose(out, (1, 0, 2))                 # back to (S, B, E)


def init_params(key, d_model, dim_feedforward, scale=0.02):
    """Deterministic synthetic parameters; weights stored (in_features, out_features)."""
    ks = jax.random.split(key, 8)

    def lin(k, fan_in, fan_out):
        kw, kb = jax.random.split(k)
        w = jax.random.normal(kw, (fan_in, fan_out), jnp.float32) * scale
        b = jax.random.normal(kb, (1, fan_out), jnp.float32) * scale
        return w, b

    p = {}
    p["wq"], p["bq"] = lin(ks[0], d_model, d_model)          # in_proj (query slice)
    p["wk"], p["bk"] = lin(ks[1], d_model, d_model)          # in_proj (key slice)
    p["wv"], p["bv"] = lin(ks[2], d_model, d_model)          # in_proj (value slice)
    p["wo"], p["bo"] = lin(ks[3], d_model, d_model)          # self_attn.out_proj
    p["w1"], p["b1"] = lin(ks[4], d_model, dim_feedforward)  # linear1
    p["w2"], p["b2"] = lin(ks[5], dim_feedforward, d_model)  # linear2
    p["ln1_g"] = jnp.ones((1, d_model), jnp.float32)         # norm1
    p["ln1_b"] = jnp.zeros((1, d_model), jnp.float32)
    p["ln2_g"] = jnp.ones((1, d_model), jnp.float32)         # norm2
    p["ln2_b"] = jnp.zeros((1, d_model), jnp.float32)
    return p


if __name__ == "__main__":
    key = jax.random.PRNGKey(0)
    k_x, k_p = jax.random.split(key)

    # small-but-MXU-friendly shapes: 128 rows per grid step, lane-dense d_model
    S, B, D_MODEL, NHEAD, DIM_FF = 128, 4, 128, 4, 256

    src = jax.random.normal(k_x, (S, B, D_MODEL), jnp.float32)   # (seq, batch, embed)
    params = init_params(k_p, D_MODEL, DIM_FF)

    fwd = jax.jit(functools.partial(encoder_layer_forward, nhead=NHEAD))
    out = fwd(src, params)
    jax.block_until_ready(out)

    assert out.shape == (S, B, D_MODEL)
    assert bool(jnp.all(jnp.isfinite(out)))
    print("KERNEL_OK")
</pallas_src>

<mosaic_0001>
module attributes {stable_mosaic.version = 11 : i64} {
  func.func @_encoder_layer_kernel(%arg0: i32, %arg1: memref<1x128x128xf32, #tpu.memory_space<vmem>>, %arg2: memref<128x128xbf16, #tpu.memory_space<vmem>>, %arg3: memref<1x128xf32, #tpu.memory_space<vmem>>, %arg4: memref<128x128xbf16, #tpu.memory_space<vmem>>, %arg5: memref<1x128xf32, #tpu.memory_space<vmem>>, %arg6: memref<128x128xbf16, #tpu.memory_space<vmem>>, %arg7: memref<1x128xf32, #tpu.memory_space<vmem>>, %arg8: memref<128x128xbf16, #tpu.memory_space<vmem>>, %arg9: memref<1x128xf32, #tpu.memory_space<vmem>>, %arg10: memref<1x128xf32, #tpu.memory_space<vmem>>, %arg11: memref<1x128xf32, #tpu.memory_space<vmem>>, %arg12: memref<128x256xbf16, #tpu.memory_space<vmem>>, %arg13: memref<1x256xf32, #tpu.memory_space<vmem>>, %arg14: memref<256x128xbf16, #tpu.memory_space<vmem>>, %arg15: memref<1x128xf32, #tpu.memory_space<vmem>>, %arg16: memref<1x128xf32, #tpu.memory_space<vmem>>, %arg17: memref<1x128xf32, #tpu.memory_space<vmem>>, %arg18: memref<1x128x128xf32, #tpu.memory_space<vmem>>) attributes {dimension_semantics = [#tpu.dimension_semantics<parallel>], iteration_bounds = array<i64: 4>, scalar_prefetch = 0 : i64, scratch_operands = 0 : i64, tpu.core_type = #tpu.core_type<tc>, window_params = [{transform_indices = @transform_0, window_bounds = array<i64: 1, 128, 128>}, {pipeline_mode = #tpu.pipeline_mode<synchronous>, transform_indices = @transform_1, window_bounds = array<i64: 128, 128>}, {pipeline_mode = #tpu.pipeline_mode<synchronous>, transform_indices = @transform_2, window_bounds = array<i64: 1, 128>}, {pipeline_mode = #tpu.pipeline_mode<synchronous>, transform_indices = @transform_3, window_bounds = array<i64: 128, 128>}, {pipeline_mode = #tpu.pipeline_mode<synchronous>, transform_indices = @transform_4, window_bounds = array<i64: 1, 128>}, {pipeline_mode = #tpu.pipeline_mode<synchronous>, transform_indices = @transform_5, window_bounds = array<i64: 128, 128>}, {pipeline_mode = #tpu.pipeline_mode<synchronous>, transform_indices = @transform_6, window_bounds = array<i64: 1, 128>}, {pipeline_mode = #tpu.pipeline_mode<synchronous>, transform_indices = @transform_7, window_bounds = array<i64: 128, 128>}, {pipeline_mode = #tpu.pipeline_mode<synchronous>, transform_indices = @transform_8, window_bounds = array<i64: 1, 128>}, {pipeline_mode = #tpu.pipeline_mode<synchronous>, transform_indices = @transform_9, window_bounds = array<i64: 1, 128>}, {pipeline_mode = #tpu.pipeline_mode<synchronous>, transform_indices = @transform_10, window_bounds = array<i64: 1, 128>}, {pipeline_mode = #tpu.pipeline_mode<synchronous>, transform_indices = @transform_11, window_bounds = array<i64: 128, 256>}, {pipeline_mode = #tpu.pipeline_mode<synchronous>, transform_indices = @transform_12, window_bounds = array<i64: 1, 256>}, {pipeline_mode = #tpu.pipeline_mode<synchronous>, transform_indices = @transform_13, window_bounds = array<i64: 256, 128>}, {pipeline_mode = #tpu.pipeline_mode<synchronous>, transform_indices = @transform_14, window_bounds = array<i64: 1, 128>}, {pipeline_mode = #tpu.pipeline_mode<synchronous>, transform_indices = @transform_15, window_bounds = array<i64: 1, 128>}, {pipeline_mode = #tpu.pipeline_mode<synchronous>, transform_indices = @transform_16, window_bounds = array<i64: 1, 128>}, {transform_indices = @transform_17, window_bounds = array<i64: 1, 128, 128>}]} {
    %c0 = arith.constant 0 : index
    %c0_0 = arith.constant 0 : index
    %c0_1 = arith.constant 0 : index
    %0 = vector.load %arg1[%c0, %c0_0, %c0_1] : memref<1x128x128xf32, #tpu.memory_space<vmem>>, vector<1x128x128xf32>
    %1 = vector.shape_cast %0 : vector<1x128x128xf32> to vector<128x128xf32>
    %2 = arith.truncf %1 : vector<128x128xf32> to vector<128x128xbf16>
    %c0_2 = arith.constant 0 : index
    %c0_3 = arith.constant 0 : index
    %3 = vector.load %arg2[%c0_2, %c0_3] : memref<128x128xbf16, #tpu.memory_space<vmem>>, vector<128x128xbf16>
    %cst = arith.constant dense<0.000000e+00> : vector<128x128xf32>
    %4 = tpu.matmul %2, %3, %cst {dimension_numbers = #tpu.dot_dimension_numbers<[1], [0], [0], [1], [0, 0, 1, 1], [], []>} : vector<128x128xbf16>, vector<128x128xbf16>, vector<128x128xf32> -> vector<128x128xf32>
    %c0_4 = arith.constant 0 : index
    %c0_5 = arith.constant 0 : index
    %5 = vector.load %arg3[%c0_4, %c0_5] : memref<1x128xf32, #tpu.memory_space<vmem>>, vector<1x128xf32>
    %6 = vector.broadcast %5 : vector<1x128xf32> to vector<128x128xf32>
    %7 = arith.addf %4, %6 : vector<128x128xf32>
    %c0_6 = arith.constant 0 : index
    %c0_7 = arith.constant 0 : index
    %8 = vector.load %arg4[%c0_6, %c0_7] : memref<128x128xbf16, #tpu.memory_space<vmem>>, vector<128x128xbf16>
    %cst_8 = arith.constant dense<0.000000e+00> : vector<128x128xf32>
    %9 = tpu.matmul %2, %8, %cst_8 {dimension_numbers = #tpu.dot_dimension_numbers<[1], [0], [0], [1], [0, 0, 1, 1], [], []>} : vector<128x128xbf16>, vector<128x128xbf16>, vector<128x128xf32> -> vector<128x128xf32>
    %c0_9 = arith.constant 0 : index
    %c0_10 = arith.constant 0 : index
    %10 = vector.load %arg5[%c0_9, %c0_10] : memref<1x128xf32, #tpu.memory_space<vmem>>, vector<1x128xf32>
    %11 = vector.broadcast %10 : vector<1x128xf32> to vector<128x128xf32>
    %12 = arith.addf %9, %11 : vector<128x128xf32>
    %c0_11 = arith.constant 0 : index
    %c0_12 = arith.constant 0 : index
    %13 = vector.load %arg6[%c0_11, %c0_12] : memref<128x128xbf16, #tpu.memory_space<vmem>>, vector<128x128xbf16>
    %cst_13 = arith.constant dense<0.000000e+00> : vector<128x128xf32>
    %14 = tpu.matmul %2, %13, %cst_13 {dimension_numbers = #tpu.dot_dimension_numbers<[1], [0], [0], [1], [0, 0, 1, 1], [], []>} : vector<128x128xbf16>, vector<128x128xbf16>, vector<128x128xf32> -> vector<128x128xf32>
    %c0_14 = arith.constant 0 : index
    %c0_15 = arith.constant 0 : index
    %15 = vector.load %arg7[%c0_14, %c0_15] : memref<1x128xf32, #tpu.memory_space<vmem>>, vector<1x128xf32>
    %16 = vector.broadcast %15 : vector<1x128xf32> to vector<128x128xf32>
    %17 = arith.addf %14, %16 : vector<128x128xf32>
    %18 = vector.extract_strided_slice %7 {offsets = [0, 0], sizes = [128, 32], strides = [1, 1]} : vector<128x128xf32> to vector<128x32xf32>
    %cst_16 = arith.constant 0.176776692 : f32
    %19 = vector.broadcast %cst_16 : f32 to vector<128x32xf32>
    %20 = arith.mulf %18, %19 : vector<128x32xf32>
    %21 = arith.truncf %20 : vector<128x32xf32> to vector<128x32xbf16>
    %22 = vector.extract_strided_slice %12 {offsets = [0, 0], sizes = [128, 32], strides = [1, 1]} : vector<128x128xf32> to vector<128x32xf32>
    %23 = arith.truncf %22 : vector<128x32xf32> to vector<128x32xbf16>
    %24 = vector.extract_strided_slice %17 {offsets = [0, 0], sizes = [128, 32], strides = [1, 1]} : vector<128x128xf32> to vector<128x32xf32>
    %25 = arith.truncf %24 : vector<128x32xf32> to vector<128x32xbf16>
    %cst_17 = arith.constant dense<0.000000e+00> : vector<128x128xf32>
    %26 = tpu.matmul %21, %23, %cst_17 {dimension_numbers = #tpu.dot_dimension_numbers<[1], [1], [0], [0], [0, 0, 1, 0], [], []>} : vector<128x32xbf16>, vector<128x32xbf16>, vector<128x128xf32> -> vector<128x128xf32>
    %cst_18 = arith.constant dense<0xFF800000> : vector<128xf32>
    %27 = vector.multi_reduction <maximumf>, %26, %cst_18 [1] : vector<128x128xf32> to vector<128xf32>
    %28 = vector.shape_cast %27 : vector<128xf32> to vector<128x1xf32>
    %29 = vector.broadcast %28 : vector<128x1xf32> to vector<128x128xf32>
    %30 = arith.subf %26, %29 : vector<128x128xf32>
    %31 = math.exp %30 : vector<128x128xf32>
    %cst_19 = arith.constant dense<0.000000e+00> : vector<128xf32>
    %32 = vector.multi_reduction <add>, %31, %cst_19 [1] : vector<128x128xf32> to vector<128xf32>
    %33 = vector.shape_cast %32 : vector<128xf32> to vector<128x1xf32>
    %34 = tpu.reciprocal %33 {approx = true} : vector<128x1xf32> -> vector<128x1xf32>
    %35 = vector.broadcast %34 : vector<128x1xf32> to vector<128x128xf32>
    %36 = arith.mulf %31, %35 : vector<128x128xf32>
    %37 = arith.truncf %36 : vector<128x128xf32> to vector<128x128xbf16>
    %cst_20 = arith.constant dense<0.000000e+00> : vector<128x32xf32>
    %38 = tpu.matmul %37, %25, %cst_20 {dimension_numbers = #tpu.dot_dimension_numbers<[1], [0], [0], [1], [0, 0, 1, 1], [], []>} : vector<128x128xbf16>, vector<128x32xbf16>, vector<128x32xf32> -> vector<128x32xf32>
    %39 = vector.extract_strided_slice %7 {offsets = [0, 32], sizes = [128, 32], strides = [1, 1]} : vector<128x128xf32> to vector<128x32xf32>
    %cst_21 = arith.constant 0.176776692 : f32
    %40 = vector.broadcast %cst_21 : f32 to vector<128x32xf32>
    %41 = arith.mulf %39, %40 : vector<128x32xf32>
    %42 = arith.truncf %41 : vector<128x32xf32> to vector<128x32xbf16>
    %43 = vector.extract_strided_slice %12 {offsets = [0, 32], sizes = [128, 32], strides = [1, 1]} : vector<128x128xf32> to vector<128x32xf32>
    %44 = arith.truncf %43 : vector<128x32xf32> to vector<128x32xbf16>
    %45 = vector.extract_strided_slice %17 {offsets = [0, 32], sizes = [128, 32], strides = [1, 1]} : vector<128x128xf32> to vector<128x32xf32>
    %46 = arith.truncf %45 : vector<128x32xf32> to vector<128x32xbf16>
    %cst_22 = arith.constant dense<0.000000e+00> : vector<128x128xf32>
    %47 = tpu.matmul %42, %44, %cst_22 {dimension_numbers = #tpu.dot_dimension_numbers<[1], [1], [0], [0], [0, 0, 1, 0], [], []>} : vector<128x32xbf16>, vector<128x32xbf16>, vector<128x128xf32> -> vector<128x128xf32>
    %cst_23 = arith.constant dense<0xFF800000> : vector<128xf32>
    %48 = vector.multi_reduction <maximumf>, %47, %cst_23 [1] : vector<128x128xf32> to vector<128xf32>
    %49 = vector.shape_cast %48 : vector<128xf32> to vector<128x1xf32>
    %50 = vector.broadcast %49 : vector<128x1xf32> to vector<128x128xf32>
    %51 = arith.subf %47, %50 : vector<128x128xf32>
    %52 = math.exp %51 : vector<128x128xf32>
    %cst_24 = arith.constant dense<0.000000e+00> : vector<128xf32>
    %53 = vector.multi_reduction <add>, %52, %cst_24 [1] : vector<128x128xf32> to vector<128xf32>
    %54 = vector.shape_cast %53 : vector<128xf32> to vector<128x1xf32>
    %55 = tpu.reciprocal %54 {approx = true} : vector<128x1xf32> -> vector<128x1xf32>
    %56 = vector.broadcast %55 : vector<128x1xf32> to vector<128x128xf32>
    %57 = arith.mulf %52, %56 : vector<128x128xf32>
    %58 = arith.truncf %57 : vector<128x128xf32> to vector<128x128xbf16>
    %cst_25 = arith.constant dense<0.000000e+00> : vector<128x32xf32>
    %59 = tpu.matmul %58, %46, %cst_25 {dimension_numbers = #tpu.dot_dimension_numbers<[1], [0], [0], [1], [0, 0, 1, 1], [], []>} : vector<128x128xbf16>, vector<128x32xbf16>, vector<128x32xf32> -> vector<128x32xf32>
    %60 = vector.extract_strided_slice %7 {offsets = [0, 64], sizes = [128, 32], strides = [1, 1]} : vector<128x128xf32> to vector<128x32xf32>
    %cst_26 = arith.constant 0.176776692 : f32
    %61 = vector.broadcast %cst_26 : f32 to vector<128x32xf32>
    %62 = arith.mulf %60, %61 : vector<128x32xf32>
    %63 = arith.truncf %62 : vector<128x32xf32> to vector<128x32xbf16>
    %64 = vector.extract_strided_slice %12 {offsets = [0, 64], sizes = [128, 32], strides = [1, 1]} : vector<128x128xf32> to vector<128x32xf32>
    %65 = arith.truncf %64 : vector<128x32xf32> to vector<128x32xbf16>
    %66 = vector.extract_strided_slice %17 {offsets = [0, 64], sizes = [128, 32], strides = [1, 1]} : vector<128x128xf32> to vector<128x32xf32>
    %67 = arith.truncf %66 : vector<128x32xf32> to vector<128x32xbf16>
    %cst_27 = arith.constant dense<0.000000e+00> : vector<128x128xf32>
    %68 = tpu.matmul %63, %65, %cst_27 {dimension_numbers = #tpu.dot_dimension_numbers<[1], [1], [0], [0], [0, 0, 1, 0], [], []>} : vector<128x32xbf16>, vector<128x32xbf16>, vector<128x128xf32> -> vector<128x128xf32>
    %cst_28 = arith.constant dense<0xFF800000> : vector<128xf32>
    %69 = vector.multi_reduction <maximumf>, %68, %cst_28 [1] : vector<128x128xf32> to vector<128xf32>
    %70 = vector.shape_cast %69 : vector<128xf32> to vector<128x1xf32>
    %71 = vector.broadcast %70 : vector<128x1xf32> to vector<128x128xf32>
    %72 = arith.subf %68, %71 : vector<128x128xf32>
    %73 = math.exp %72 : vector<128x128xf32>
    %cst_29 = arith.constant dense<0.000000e+00> : vector<128xf32>
    %74 = vector.multi_reduction <add>, %73, %cst_29 [1] : vector<128x128xf32> to vector<128xf32>
    %75 = vector.shape_cast %74 : vector<128xf32> to vector<128x1xf32>
    %76 = tpu.reciprocal %75 {approx = true} : vector<128x1xf32> -> vector<128x1xf32>
    %77 = vector.broadcast %76 : vector<128x1xf32> to vector<128x128xf32>
    %78 = arith.mulf %73, %77 : vector<128x128xf32>
    %79 = arith.truncf %78 : vector<128x128xf32> to vector<128x128xbf16>
    %cst_30 = arith.constant dense<0.000000e+00> : vector<128x32xf32>
    %80 = tpu.matmul %79, %67, %cst_30 {dimension_numbers = #tpu.dot_dimension_numbers<[1], [0], [0], [1], [0, 0, 1, 1], [], []>} : vector<128x128xbf16>, vector<128x32xbf16>, vector<128x32xf32> -> vector<128x32xf32>
    %81 = vector.extract_strided_slice %7 {offsets = [0, 96], sizes = [128, 32], strides = [1, 1]} : vector<128x128xf32> to vector<128x32xf32>
    %cst_31 = arith.constant 0.176776692 : f32
    %82 = vector.broadcast %cst_31 : f32 to vector<128x32xf32>
    %83 = arith.mulf %81, %82 : vector<128x32xf32>
    %84 = arith.truncf %83 : vector<128x32xf32> to vector<128x32xbf16>
    %85 = vector.extract_strided_slice %12 {offsets = [0, 96], sizes = [128, 32], strides = [1, 1]} : vector<128x128xf32> to vector<128x32xf32>
    %86 = arith.truncf %85 : vector<128x32xf32> to vector<128x32xbf16>
    %87 = vector.extract_strided_slice %17 {offsets = [0, 96], sizes = [128, 32], strides = [1, 1]} : vector<128x128xf32> to vector<128x32xf32>
    %88 = arith.truncf %87 : vector<128x32xf32> to vector<128x32xbf16>
    %cst_32 = arith.constant dense<0.000000e+00> : vector<128x128xf32>
    %89 = tpu.matmul %84, %86, %cst_32 {dimension_numbers = #tpu.dot_dimension_numbers<[1], [1], [0], [0], [0, 0, 1, 0], [], []>} : vector<128x32xbf16>, vector<128x32xbf16>, vector<128x128xf32> -> vector<128x128xf32>
    %cst_33 = arith.constant dense<0xFF800000> : vector<128xf32>
    %90 = vector.multi_reduction <maximumf>, %89, %cst_33 [1] : vector<128x128xf32> to vector<128xf32>
    %91 = vector.shape_cast %90 : vector<128xf32> to vector<128x1xf32>
    %92 = vector.broadcast %91 : vector<128x1xf32> to vector<128x128xf32>
    %93 = arith.subf %89, %92 : vector<128x128xf32>
    %94 = math.exp %93 : vector<128x128xf32>
    %cst_34 = arith.constant dense<0.000000e+00> : vector<128xf32>
    %95 = vector.multi_reduction <add>, %94, %cst_34 [1] : vector<128x128xf32> to vector<128xf32>
    %96 = vector.shape_cast %95 : vector<128xf32> to vector<128x1xf32>
    %97 = tpu.reciprocal %96 {approx = true} : vector<128x1xf32> -> vector<128x1xf32>
    %98 = vector.broadcast %97 : vector<128x1xf32> to vector<128x128xf32>
    %99 = arith.mulf %94, %98 : vector<128x128xf32>
    %100 = arith.truncf %99 : vector<128x128xf32> to vector<128x128xbf16>
    %cst_35 = arith.constant dense<0.000000e+00> : vector<128x32xf32>
    %101 = tpu.matmul %100, %88, %cst_35 {dimension_numbers = #tpu.dot_dimension_numbers<[1], [0], [0], [1], [0, 0, 1, 1], [], []>} : vector<128x128xbf16>, vector<128x32xbf16>, vector<128x32xf32> -> vector<128x32xf32>
    %102 = tpu.concatenate %38, %59, %80, %101 in 1 : vector<128x32xf32>, vector<128x32xf32>, vector<128x32xf32>, vector<128x32xf32> -> vector<128x128xf32>
    %103 = arith.truncf %102 : vector<128x128xf32> to vector<128x128xbf16>
    %c0_36 = arith.constant 0 : index
    %c0_37 = arith.constant 0 : index
    %104 = vector.load %arg8[%c0_36, %c0_37] : memref<128x128xbf16, #tpu.memory_space<vmem>>, vector<128x128xbf16>
    %cst_38 = arith.constant dense<0.000000e+00> : vector<128x128xf32>
    %105 = tpu.matmul %103, %104, %cst_38 {dimension_numbers = #tpu.dot_dimension_numbers<[1], [0], [0], [1], [0, 0, 1, 1], [], []>} : vector<128x128xbf16>, vector<128x128xbf16>, vector<128x128xf32> -> vector<128x128xf32>
    %c0_39 = arith.constant 0 : index
    %c0_40 = arith.constant 0 : index
    %106 = vector.load %arg9[%c0_39, %c0_40] : memref<1x128xf32, #tpu.memory_space<vmem>>, vector<1x128xf32>
    %107 = vector.broadcast %106 : vector<1x128xf32> to vector<128x128xf32>
    %108 = arith.addf %105, %107 : vector<128x128xf32>
    %109 = arith.addf %1, %108 : vector<128x128xf32>
    %cst_41 = arith.constant dense<0.000000e+00> : vector<128xf32>
    %110 = vector.multi_reduction <add>, %109, %cst_41 [1] : vector<128x128xf32> to vector<128xf32>
    %111 = vector.shape_cast %110 : vector<128xf32> to vector<128x1xf32>
    %cst_42 = arith.constant 7.812500e-03 : f32
    %112 = vector.broadcast %cst_42 : f32 to vector<128x1xf32>
    %113 = arith.mulf %111, %112 : vector<128x1xf32>
    %114 = vector.broadcast %113 : vector<128x1xf32> to vector<128x128xf32>
    %115 = arith.subf %109, %114 : vector<128x128xf32>
    %116 = arith.mulf %115, %115 : vector<128x128xf32>
    %cst_43 = arith.constant dense<0.000000e+00> : vector<128xf32>
    %117 = vector.multi_reduction <add>, %116, %cst_43 [1] : vector<128x128xf32> to vector<128xf32>
    %118 = vector.shape_cast %117 : vector<128xf32> to vector<128x1xf32>
    %cst_44 = arith.constant 7.812500e-03 : f32
    %119 = vector.broadcast %cst_44 : f32 to vector<128x1xf32>
    %120 = arith.mulf %118, %119 : vector<128x1xf32>
    %cst_45 = arith.constant 9.99999974E-6 : f32
    %121 = vector.broadcast %cst_45 : f32 to vector<128x1xf32>
    %122 = arith.addf %120, %121 : vector<128x1xf32>
    %123 = math.rsqrt %122 : vector<128x1xf32>
    %124 = vector.broadcast %123 : vector<128x1xf32> to vector<128x128xf32>
    %125 = arith.mulf %115, %124 : vector<128x128xf32>
    %c0_46 = arith.constant 0 : index
    %c0_47 = arith.constant 0 : index
    %126 = vector.load %arg10[%c0_46, %c0_47] : memref<1x128xf32, #tpu.memory_space<vmem>>, vector<1x128xf32>
    %127 = vector.broadcast %126 : vector<1x128xf32> to vector<128x128xf32>
    %128 = arith.mulf %125, %127 : vector<128x128xf32>
    %c0_48 = arith.constant 0 : index
    %c0_49 = arith.constant 0 : index
    %129 = vector.load %arg11[%c0_48, %c0_49] : memref<1x128xf32, #tpu.memory_space<vmem>>, vector<1x128xf32>
    %130 = vector.broadcast %129 : vector<1x128xf32> to vector<128x128xf32>
    %131 = arith.addf %128, %130 : vector<128x128xf32>
    %132 = arith.truncf %131 : vector<128x128xf32> to vector<128x128xbf16>
    %c0_50 = arith.constant 0 : index
    %c0_51 = arith.constant 0 : index
    %133 = vector.load %arg12[%c0_50, %c0_51] : memref<128x256xbf16, #tpu.memory_space<vmem>>, vector<128x256xbf16>
    %cst_52 = arith.constant dense<0.000000e+00> : vector<128x256xf32>
    %134 = tpu.matmul %132, %133, %cst_52 {dimension_numbers = #tpu.dot_dimension_numbers<[1], [0], [0], [1], [0, 0, 1, 1], [], []>} : vector<128x128xbf16>, vector<128x256xbf16>, vector<128x256xf32> -> vector<128x256xf32>
    %c0_53 = arith.constant 0 : index
    %c0_54 = arith.constant 0 : index
    %135 = vector.load %arg13[%c0_53, %c0_54] : memref<1x256xf32, #tpu.memory_space<vmem>>, vector<1x256xf32>
    %136 = vector.broadcast %135 : vector<1x256xf32> to vector<128x256xf32>
    %137 = arith.addf %134, %136 : vector<128x256xf32>
    %cst_55 = arith.constant 0.000000e+00 : f32
    %138 = vector.broadcast %cst_55 : f32 to vector<128x256xf32>
    %139 = arith.maximumf %137, %138 : vector<128x256xf32>
    %140 = arith.truncf %139 : vector<128x256xf32> to vector<128x256xbf16>
    %c0_56 = arith.constant 0 : index
    %c0_57 = arith.constant 0 : index
    %141 = vector.load %arg14[%c0_56, %c0_57] : memref<256x128xbf16, #tpu.memory_space<vmem>>, vector<256x128xbf16>
    %cst_58 = arith.constant dense<0.000000e+00> : vector<128x128xf32>
    %142 = tpu.matmul %140, %141, %cst_58 {dimension_numbers = #tpu.dot_dimension_numbers<[1], [0], [0], [1], [0, 0, 1, 1], [], []>} : vector<128x256xbf16>, vector<256x128xbf16>, vector<128x128xf32> -> vector<128x128xf32>
    %c0_59 = arith.constant 0 : index
    %c0_60 = arith.constant 0 : index
    %143 = vector.load %arg15[%c0_59, %c0_60] : memref<1x128xf32, #tpu.memory_space<vmem>>, vector<1x128xf32>
    %144 = vector.broadcast %143 : vector<1x128xf32> to vector<128x128xf32>
    %145 = arith.addf %142, %144 : vector<128x128xf32>
    %146 = arith.addf %131, %145 : vector<128x128xf32>
    %cst_61 = arith.constant dense<0.000000e+00> : vector<128xf32>
    %147 = vector.multi_reduction <add>, %146, %cst_61 [1] : vector<128x128xf32> to vector<128xf32>
    %148 = vector.shape_cast %147 : vector<128xf32> to vector<128x1xf32>
    %cst_62 = arith.constant 7.812500e-03 : f32
    %149 = vector.broadcast %cst_62 : f32 to vector<128x1xf32>
    %150 = arith.mulf %148, %149 : vector<128x1xf32>
    %151 = vector.broadcast %150 : vector<128x1xf32> to vector<128x128xf32>
    %152 = arith.subf %146, %151 : vector<128x128xf32>
    %153 = arith.mulf %152, %152 : vector<128x128xf32>
    %cst_63 = arith.constant dense<0.000000e+00> : vector<128xf32>
    %154 = vector.multi_reduction <add>, %153, %cst_63 [1] : vector<128x128xf32> to vector<128xf32>
    %155 = vector.shape_cast %154 : vector<128xf32> to vector<128x1xf32>
    %cst_64 = arith.constant 7.812500e-03 : f32
    %156 = vector.broadcast %cst_64 : f32 to vector<128x1xf32>
    %157 = arith.mulf %155, %156 : vector<128x1xf32>
    %cst_65 = arith.constant 9.99999974E-6 : f32
    %158 = vector.broadcast %cst_65 : f32 to vector<128x1xf32>
    %159 = arith.addf %157, %158 : vector<128x1xf32>
    %160 = math.rsqrt %159 : vector<128x1xf32>
    %161 = vector.broadcast %160 : vector<128x1xf32> to vector<128x128xf32>
    %162 = arith.mulf %152, %161 : vector<128x128xf32>
    %c0_66 = arith.constant 0 : index
    %c0_67 = arith.constant 0 : index
    %163 = vector.load %arg16[%c0_66, %c0_67] : memref<1x128xf32, #tpu.memory_space<vmem>>, vector<1x128xf32>
    %164 = vector.broadcast %163 : vector<1x128xf32> to vector<128x128xf32>
    %165 = arith.mulf %162, %164 : vector<128x128xf32>
    %c0_68 = arith.constant 0 : index
    %c0_69 = arith.constant 0 : index
    %166 = vector.load %arg17[%c0_68, %c0_69] : memref<1x128xf32, #tpu.memory_space<vmem>>, vector<1x128xf32>
    %167 = vector.broadcast %166 : vector<1x128xf32> to vector<128x128xf32>
    %168 = arith.addf %165, %167 : vector<128x128xf32>
    %c0_70 = arith.constant 0 : index
    %c0_71 = arith.constant 0 : index
    %c0_72 = arith.constant 0 : index
    %169 = vector.load %arg18[%c0_70, %c0_71, %c0_72] : memref<1x128x128xf32, #tpu.memory_space<vmem>>, vector<1x128x128xf32>
    %170 = vector.shape_cast %169 : vector<1x128x128xf32> to vector<128x128xf32>
    %171 = vector.shape_cast %168 : vector<128x128xf32> to vector<1x128x128xf32>
    tpu.vector_store %arg18[%c0_70, %c0_71, %c0_72], %171 {strides = array<i32>} : memref<1x128x128xf32, #tpu.memory_space<vmem>>, vector<1x128x128xf32>,
    return
  }
  func.func @transform_0(%arg0: i32) -> (i32, i32, i32) {
    %c0_i32 = arith.constant 0 : i32
    %c0_i32_0 = arith.constant 0 : i32
    %c0_i32_1 = arith.constant 0 : i32
    return %arg0, %c0_i32, %c0_i32_0 : i32, i32, i32
  }
  func.func @transform_1(%arg0: i32) -> (i32, i32) {
    %c0_i32 = arith.constant 0 : i32
    %c0_i32_0 = arith.constant 0 : i32
    %c0_i32_1 = arith.constant 0 : i32
    return %c0_i32, %c0_i32_0 : i32, i32
  }
  func.func @transform_2(%arg0: i32) -> (i32, i32) {
    %c0_i32 = arith.constant 0 : i32
    %c0_i32_0 = arith.constant 0 : i32
    %c0_i32_1 = arith.constant 0 : i32
    return %c0_i32, %c0_i32_0 : i32, i32
  }
  func.func @transform_3(%arg0: i32) -> (i32, i32) {
    %c0_i32 = arith.constant 0 : i32
    %c0_i32_0 = arith.constant 0 : i32
    %c0_i32_1 = arith.constant 0 : i32
    return %c0_i32, %c0_i32_0 : i32, i32
  }
  func.func @transform_4(%arg0: i32) -> (i32, i32) {
    %c0_i32 = arith.constant 0 : i32
    %c0_i32_0 = arith.constant 0 : i32
    %c0_i32_1 = arith.constant 0 : i32
    return %c0_i32, %c0_i32_0 : i32, i32
  }
  func.func @transform_5(%arg0: i32) -> (i32, i32) {
    %c0_i32 = arith.constant 0 : i32
    %c0_i32_0 = arith.constant 0 : i32
    %c0_i32_1 = arith.constant 0 : i32
    return %c0_i32, %c0_i32_0 : i32, i32
  }
  func.func @transform_6(%arg0: i32) -> (i32, i32) {
    %c0_i32 = arith.constant 0 : i32
    %c0_i32_0 = arith.constant 0 : i32
    %c0_i32_1 = arith.constant 0 : i32
    return %c0_i32, %c0_i32_0 : i32, i32
  }
  func.func @transform_7(%arg0: i32) -> (i32, i32) {
    %c0_i32 = arith.constant 0 : i32
    %c0_i32_0 = arith.constant 0 : i32
    %c0_i32_1 = arith.constant 0 : i32
    return %c0_i32, %c0_i32_0 : i32, i32
  }
  func.func @transform_8(%arg0: i32) -> (i32, i32) {
    %c0_i32 = arith.constant 0 : i32
    %c0_i32_0 = arith.constant 0 : i32
    %c0_i32_1 = arith.constant 0 : i32
    return %c0_i32, %c0_i32_0 : i32, i32
  }
  func.func @transform_9(%arg0: i32) -> (i32, i32) {
    %c0_i32 = arith.constant 0 : i32
    %c0_i32_0 = arith.constant 0 : i32
    %c0_i32_1 = arith.constant 0 : i32
    return %c0_i32, %c0_i32_0 : i32, i32
  }
  func.func @transform_10(%arg0: i32) -> (i32, i32) {
    %c0_i32 = arith.constant 0 : i32
    %c0_i32_0 = arith.constant 0 : i32
    %c0_i32_1 = arith.constant 0 : i32
    return %c0_i32, %c0_i32_0 : i32, i32
  }
  func.func @transform_11(%arg0: i32) -> (i32, i32) {
    %c0_i32 = arith.constant 0 : i32
    %c0_i32_0 = arith.constant 0 : i32
    %c0_i32_1 = arith.constant 0 : i32
    return %c0_i32, %c0_i32_0 : i32, i32
  }
  func.func @transform_12(%arg0: i32) -> (i32, i32) {
    %c0_i32 = arith.constant 0 : i32
    %c0_i32_0 = arith.constant 0 : i32
    %c0_i32_1 = arith.constant 0 : i32
    return %c0_i32, %c0_i32_0 : i32, i32
  }
  func.func @transform_13(%arg0: i32) -> (i32, i32) {
    %c0_i32 = arith.constant 0 : i32
    %c0_i32_0 = arith.constant 0 : i32
    %c0_i32_1 = arith.constant 0 : i32
    return %c0_i32, %c0_i32_0 : i32, i32
  }
  func.func @transform_14(%arg0: i32) -> (i32, i32) {
    %c0_i32 = arith.constant 0 : i32
    %c0_i32_0 = arith.constant 0 : i32
    %c0_i32_1 = arith.constant 0 : i32
    return %c0_i32, %c0_i32_0 : i32, i32
  }
  func.func @transform_15(%arg0: i32) -> (i32, i32) {
    %c0_i32 = arith.constant 0 : i32
    %c0_i32_0 = arith.constant 0 : i32
    %c0_i32_1 = arith.constant 0 : i32
    return %c0_i32, %c0_i32_0 : i32, i32
  }
  func.func @transform_16(%arg0: i32) -> (i32, i32) {
    %c0_i32 = arith.constant 0 : i32
    %c0_i32_0 = arith.constant 0 : i32
    %c0_i32_1 = arith.constant 0 : i32
    return %c0_i32, %c0_i32_0 : i32, i32
  }
  func.func @transform_17(%arg0: i32) -> (i32, i32, i32) {
    %c0_i32 = arith.constant 0 : i32
    %c0_i32_0 = arith.constant 0 : i32
    %c0_i32_1 = arith.constant 0 : i32
    return %arg0, %c0_i32, %c0_i32_0 : i32, i32, i32
  }
}

</mosaic_0001>

<bundles_post_ra>
// kernel: encoder_layer_forward.1
= control target key start
LH: loop header
LB: loop body
LE: loop exit
PB: predicated region body
PF: predicated region fallthrough
CT: control target
= control target key end

     0   :  { %s5793_s24 = smov 0   ;;  %s7685_s0 = inlined_call_operand.vmem [shape: f32[4,128,128], index: 0, kind: input, shape index: {}]   ;;  %s7686_s1 = inlined_call_operand.vmem [shape: bf16[128,128], index: 1, kind: input, shape index: {}]   ;;  %s7687_s2 = inlined_call_operand.vmem [shape: f32[1,128], index: 2, kind: input, shape index: {}]   ;;  %s7688_s3 = inlined_call_operand.vmem [shape: bf16[128,128], index: 3, kind: input, shape index: {}]   ;;  %s7689_s4 = inlined_call_operand.vmem [shape: f32[1,128], index: 4, kind: input, shape index: {}]   ;;  %s7690_s5 = inlined_call_operand.vmem [shape: bf16[128,128], index: 5, kind: input, shape index: {}]   ;;  %s7691_s6 = inlined_call_operand.vmem [shape: f32[1,128], index: 6, kind: input, shape index: {}]   ;;  %s7692_s7 = inlined_call_operand.vmem [shape: bf16[128,128], index: 7, kind: input, shape index: {}]   ;;  %s7693_s8 = inlined_call_operand.vmem [shape: f32[1,128], index: 8, kind: input, shape index: {}]   ;;  %s7694_s9 = inlined_call_operand.vmem [shape: f32[1,128], index: 9, kind: input, shape index: {}]   ;;  %s7695_s10 = inlined_call_operand.vmem [shape: f32[1,128], index: 10, kind: input, shape index: {}]   ;;  %s7696_s11 = inlined_call_operand.vmem [shape: bf16[128,256], index: 11, kind: input, shape index: {}]   ;;  %s7697_s12 = inlined_call_operand.vmem [shape: f32[1,256], index: 12, kind: input, shape index: {}]   ;;  %s7698_s13 = inlined_call_operand.vmem [shape: bf16[256,128], index: 13, kind: input, shape index: {}]   ;;  %s7699_s14 = inlined_call_operand.vmem [shape: f32[1,128], index: 14, kind: input, shape index: {}]   ;;  %s7700_s15 = inlined_call_operand.vmem [shape: f32[1,128], index: 15, kind: input, shape index: {}]   ;;  %s7701_s16 = inlined_call_operand.vmem [shape: f32[1,128], index: 16, kind: input, shape index: {}]   ;;  %s7702_s17 = inlined_call_operand.vmem [shape: f32[4,128,128], index: 17, kind: output, shape index: {}]  }
   0x1   :  { %7711 = sst [smem:[#allocation24_spill]] %s7685_s0 }
   0x2   :  { %7712 = sst [smem:[#allocation25_spill]] %s7686_s1 }
   0x3 LB: > { %s4361_s25 = sadd.s32 4294967295, %s5697_s24   ;;  %p4365_p0 = scmp.ge.s32.totalorder %s5697_s24, 1  ;;  %s5697_s24 = sphi %s5793_s24, %s27_s24  }
   0x4   : > { %p487_p1 = scmp.lt.s32.totalorder %s5697_s24, 5 }
   0x6   : > { %p488_p2 = pnand %p4365_p0, %p487_p1 }
   0x8   : > { %491 = sbr.rel (%p488_p2) target bundleno = 4447 (0x115f), region = 88 }
   0xf   : > { %v5283_v0 = vld [vmem:[%s7688_s3] sm:$0xff]   ;;  %p539_p3 = scmp.lt.s32.totalorder %s4361_s25, 3  ;;  %v5284_v1 = vld [vmem:[%s7688_s3 + $0x8] sm:$0xff]   ;;  %v5285_v2 = vld [vmem:[%s7688_s3 + $0x10] sm:$0xff]   ;;  %s7713_s20 = sld [smem:[#allocation24_spill]]  ;;  %vm1118_vm0 = vcmask 261120  }
  0x10   : > { %4767 = vmatprep.subr.bf16.mxu1 %v5283_v0  ;;  %v5286_v3 = vld [vmem:[%s7688_s3 + $0x18] sm:$0xff]   ;;  %s7714_s28 = sld [smem:[#allocation25_spill]]  ;;  %v5287_v8 = vld [vmem:[%s7688_s3 + $0x20] sm:$0xff]   ;;  %v5288_v11 = vld [vmem:[%s7688_s3 + $0x28] sm:$0xff]   ;;  %s5699_s29 = smov 96   ;;  %vm3095_vm1 = vcmask 523264  }
  0x11   : > { %s7775_s25 = smov (!%p539_p3, %s4361_s25), 3  ;;  %4768 = vmatpush3.bf16.msra.mxu1 %v5283_v0  ;;  %v5289_v13 = vld [vmem:[%s7688_s3 + $0x30] sm:$0xff]   ;;  %v5290_v15 = vld [vmem:[%s7688_s3 + $0x38] sm:$0xff]   ;;  %v5299_v29 = vld [vmem:[%s7690_s5] sm:$0xff]   ;;  %s5701_s22 = smov 32   ;;  %vm3112_vm2 = vcmask 785408  }
  0x12   : > { %4769 = vmatprep.subr.bf16.mxu1 %v5284_v1  ;;  %s7710_s18 = sshll.u32 %s7775_s25, 7  ;;  %v5300_v34 = vld [vmem:[%s7690_s5 + $0x8] sm:$0xff]   ;;  %v5301_v37 = vld [vmem:[%s7690_s5 + $0x10] sm:$0xff]   ;;  %v5302_v42 = vld [vmem:[%s7690_s5 + $0x18] sm:$0xff]   ;;  %s7773_s0 = sshll.u32 %s7775_s25, 7 }
  0x13   : > { %v5303_v44 = vld [vmem:[%s7690_s5 + $0x20] sm:$0xff]   ;;  %v5304_v45 = vld [vmem:[%s7690_s5 + $0x28] sm:$0xff]   ;;  %v5305_v46 = vld [vmem:[%s7690_s5 + $0x30] sm:$0xff]   ;;  %s7619_s19 = scalar_lea.vmem %s7702_s17, %s7773_s0 }
  0x14   : > { %v5306_v47 = vld [vmem:[%s7690_s5 + $0x38] sm:$0xff]   ;;  %v5912_v49 = vld [vmem:[%s7689_s4] ss:$0 sm:$0xff] }
  0x15   : > { %s5818_s21 = scalar_lea.vmem %s7713_s20, %s7710_s18  ;;  %4770 = vmatpush3.bf16.msra.mxu1 %v5284_v1  ;;  %v5934_v63 = vld [vmem:[%s7687_s2] ss:$0 sm:$0xff]  ;;  %s5700_s20 = smov 64  }
  0x16   : > { %4771 = vmatprep.subr.bf16.mxu1 %v5285_v2  ;;  %v550_v4 = vld [vmem:[%s5818_s21] sm:$0xff]  ;;  %v551_v5 = vld [vmem:[%s5818_s21 + $0x8] sm:$0xff]  ;;  %v5293_v10 = vld [vmem:[%s7714_s28 + $0x10] sm:$0xff]  }
  0x17   : > { %v5825_v6 = vpack.c.bf16 %v551_v5, %v550_v4  ;;  %v5291_v7 = vld [vmem:[%s7714_s28] sm:$0xff]   ;;  %v5292_v9 = vld [vmem:[%s7714_s28 + $0x8] sm:$0xff]   ;;  %v5294_v12 = vld [vmem:[%s7714_s28 + $0x18] sm:$0xff]  }
  0x18   : > { %4735 = vmatprep.subr.bf16.mxu0 %v5291_v7  ;;  %v5295_v14 = vld [vmem:[%s7714_s28 + $0x20] sm:$0xff]   ;;  %v552_v16 = vld [vmem:[%s5818_s21 + $0x10] sm:$0xff]  ;;  %v553_v17 = vld [vmem:[%s5818_s21 + $0x18] sm:$0xff] }
  0x19   : > { %4772 = vmatpush3.bf16.msra.mxu1 %v5285_v2  ;;  %4783 = vmatprep.mubr.bf16.mxu1 %v5825_v6  ;;  %v554_v18 = vld [vmem:[%s5818_s21 + $0x20] sm:$0xff]  ;;  %v5296_v19 = vld [vmem:[%s7714_s28 + $0x28] sm:$0xff]   ;;  %v5297_v21 = vld [vmem:[%s7714_s28 + $0x30] sm:$0xff]   ;;  %v5866_v22 = vpack.c.bf16 %v553_v17, %v552_v16 }
  0x1a   : > { %4773 = vmatprep.subr.bf16.mxu1 %v5286_v3  ;;  %4751 = vmatprep.mubr.bf16.mxu0 %v5825_v6  ;;  %v555_v20 = vld [vmem:[%s5818_s21 + $0x28] sm:$0xff]  ;;  %v556_v24 = vld [vmem:[%s5818_s21 + $0x30] sm:$0xff]  ;;  %v557_v25 = vld [vmem:[%s5818_s21 + $0x38] sm:$0xff] }
  0x1b   : > { %4736 = vmatpush3.bf16.msra.mxu0 %v5291_v7  ;;  %v568_v23 = vpack.c.bf16 %v555_v20, %v554_v18  ;;  %v5298_v26 = vld [vmem:[%s7714_s28 + $0x38] sm:$0xff]   ;;  %v558_v27 = vld [vmem:[%s5818_s21 + $0x40] sm:$0xff]  ;;  %v559_v28 = vld [vmem:[%s5818_s21 + $0x48] sm:$0xff]  ;;  %v569_v30 = vpack.c.bf16 %v557_v25, %v556_v24 }
  0x1c   : > { %4737 = vmatprep.subr.bf16.mxu0 %v5292_v9  ;;  %v570_v31 = vpack.c.bf16 %v559_v28, %v558_v27  ;;  %v560_v32 = vld [vmem:[%s5818_s21 + $0x50] sm:$0xff]  ;;  %v561_v33 = vld [vmem:[%s5818_s21 + $0x58] sm:$0xff]  ;;  %v562_v35 = vld [vmem:[%s5818_s21 + $0x60] sm:$0xff] }
  0x1d   : > { %4774 = vmatpush3.bf16.msra.mxu1 %v5286_v3  ;;  %v563_v36 = vld [vmem:[%s5818_s21 + $0x68] sm:$0xff]  ;;  %v571_v38 = vpack.c.bf16 %v561_v33, %v560_v32  ;;  %v564_v40 = vld [vmem:[%s5818_s21 + $0x70] sm:$0xff]  ;;  %v565_v41 = vld [vmem:[%s5818_s21 + $0x78] sm:$0xff] }
  0x1e   : > { %4775 = vmatprep.subr.bf16.mxu1 %v5287_v8  ;;  %v572_v39 = vpack.c.bf16 %v563_v36, %v562_v35  ;;  %v573_v43 = vpack.c.bf16 %v565_v41, %v564_v40 }
  0x1f   : > { %4738 = vmatpush3.bf16.msra.mxu0 %v5292_v9 }
  0x20   : > { %4739 = vmatprep.subr.bf16.mxu0 %v5293_v10 }
  0x21   : > { %4776 = vmatpush3.bf16.msra.mxu1 %v5287_v8 }
  0x22   : > { %4777 = vmatprep.subr.bf16.mxu1 %v5288_v11 }
  0x23   : > { %4740 = vmatpush3.bf16.msra.mxu0 %v5293_v10 }
  0x24   : > { %4741 = vmatprep.subr.bf16.mxu0 %v5294_v12 }
  0x25   : > { %4778 = vmatpush3.bf16.msra.mxu1 %v5288_v11 }
  0x26   : > { %4779 = vmatprep.subr.bf16.mxu1 %v5289_v13 }
  0x27   : > { %4742 = vmatpush3.bf16.msra.mxu0 %v5294_v12 }
  0x28   : > { %4743 = vmatprep.subr.bf16.mxu0 %v5295_v14 }
  0x29   : > { %4780 = vmatpush3.bf16.msra.mxu1 %v5289_v13 }
  0x2a   : > { %4781 = vmatprep.subr.bf16.mxu1 %v5290_v15 }
  0x2b   : > { %4744 = vmatpush3.bf16.msra.mxu0 %v5295_v14 }
  0x2c   : > { %4745 = vmatprep.subr.bf16.mxu0 %v5296_v19 }
  0x2d   : > { %4782 = vmatpush3.bf16.msra.mxu1 %v5290_v15 }
  0x2f   : > { %4746 = vmatpush3.bf16.msra.mxu0 %v5296_v19 }
  0x30   : > { %4784 = vmatmul.mubr.bf16.vlgmr.msra.gmra.mrb[0].mxu1 %v5866_v22  ;;  %4747 = vmatprep.subr.bf16.mxu0 %v5297_v21 }
  0x31   : > { %4787 = vmatprep.mubr.bf16.mxu1 %v568_v23 }
  0x33   : > { %4748 = vmatpush3.bf16.msra.mxu0 %v5297_v21 }
  0x34   : > { %4749 = vmatprep.subr.bf16.mxu0 %v5298_v26 }
  0x37   : > { %4750 = vmatpush3.bf16.msra.mxu0 %v5298_v26 }
  0x38   : > { %4788 = vmatmul.mubr.bf16.gmra.mrb[4].mxu1 %v569_v30  ;;  %4799 = vmatprep.subr.bf16.mxu0 %v5299_v29 }
  0x39   : > { %4791 = vmatprep.mubr.bf16.mxu1 %v570_v31 }
  0x3a   : > { %4752 = vmatmul.mubr.bf16.vlgmr.msra.gmra.mrb[0].mxu0 %v5866_v22 }
  0x3b   : > { %4800 = vmatpush3.bf16.msra.mxu0 %v5299_v29  ;;  %4755 = vmatprep.mubr.bf16.mxu0 %v568_v23 }
  0x3c   : > { %4801 = vmatprep.subr.bf16.mxu0 %v5300_v34 }
  0x3f   : > { %4802 = vmatpush3.bf16.msra.mxu0 %v5300_v34 }
  0x40   : > { %4792 = vmatmul.mubr.bf16.gmra.mrb[8].mxu1 %v571_v38  ;;  %4803 = vmatprep.subr.bf16.mxu0 %v5301_v37 }
  0x41   : > { %4795 = vmatprep.mubr.bf16.mxu1 %v572_v39 }
  0x42   : > { %4756 = vmatmul.mubr.bf16.gmra.mrb[4].mxu0 %v569_v30 }
  0x43   : > { %4804 = vmatpush3.bf16.msra.mxu0 %v5301_v37  ;;  %4759 = vmatprep.mubr.bf16.mxu0 %v570_v31 }
  0x44   : > { %4805 = vmatprep.subr.bf16.mxu0 %v5302_v42 }
  0x47   : > { %4806 = vmatpush3.bf16.msra.mxu0 %v5302_v42 }
  0x48   : > { %4796 = vmatmul.mubr.bf16.gmra.mrb[12].mxu1 %v573_v43  ;;  %4807 = vmatprep.subr.bf16.mxu0 %v5303_v44 }
  0x4a   : > { %4760 = vmatmul.mubr.bf16.gmra.mrb[8].mxu0 %v571_v38 }
  0x4b   : > { %4808 = vmatpush3.bf16.msra.mxu0 %v5303_v44  ;;  %4763 = vmatprep.mubr.bf16.mxu0 %v572_v39 }
  0x4c   : > { %4809 = vmatprep.subr.bf16.mxu0 %v5304_v45 }
  0x4f   : > { %4810 = vmatpush3.bf16.msra.mxu0 %v5304_v45 }
  0x50   : > { %4811 = vmatprep.subr.bf16.mxu0 %v5305_v46 }
  0x52   : > { %4764 = vmatmul.mubr.bf16.gmra.mrb[12].mxu0 %v573_v43 }
  0x53   : > { %4812 = vmatpush3.bf16.msra.mxu0 %v5305_v46  ;;  %4815 = vmatprep.mubr.bf16.mxu0 %v5825_v6 }
  0x54   : > { %4813 = vmatprep.subr.bf16.mxu0 %v5306_v47 }
  0x57   : > { %4814 = vmatpush3.bf16.msra.mxu0 %v5306_v47 }
  0x5a   : > { %4816 = vmatmul.mubr.bf16.vlgmr.msra.gmra.mrb[16].mxu0 %v5866_v22 }
  0x5b   : > { %4819 = vmatprep.mubr.bf16.mxu0 %v568_v23 }
  0x62   : > { %4820 = vmatmul.mubr.bf16.gmra.mrb[20].mxu0 %v569_v30 }
  0x63   : > { %4823 = vmatprep.mubr.bf16.mxu0 %v570_v31 }
  0x6a   : > { %4824 = vmatmul.mubr.bf16.gmra.mrb[24].mxu0 %v571_v38 }
  0x6b   : > { %4827 = vmatprep.mubr.bf16.mxu0 %v572_v39 }
  0x72   : > { %4828 = vmatmul.mubr.bf16.gmra.mrb[28].mxu0 %v573_v43 }
 0x103   : > { %v4785_v48 = vpop.f32.mrb[0].mxu1 }
 0x104   : > { %v847_v50 = vpop.f32.mrb[1].mxu1  ;;  %v856_v52 = vadd.f32 %v4785_v48, %v5912_v49 }
 0x105   : > { %v4786_v51 = vpop.f32.mrb[2].mxu1  ;;  %v848_v55 = vadd.f32 %v5912_v49, %v847_v50 }
 0x106   : > { %v859_v53 = vadd.f32 %v4786_v51, %v5912_v49  ;;  %v850_v54 = vpop.f32.mrb[3].mxu1 }
 0x107   : > { %v851_v56 = vadd.f32 %v5912_v49, %v850_v54 }
 0x108   : > { %v5918_v57 = vpack.c.bf16 %v859_v53, %v856_v52 }
 0x109   : > { %v5920_v58 = vpack.c.bf16 %v851_v56, %v848_v55 }
 0x10a   : > { %1547 = vrot.lane.b32.xlu1 %v5918_v57, %s5699_s29  ;;  %v1147_v17 = vsel %vm1118_vm0, %v5918_v57, 0 }
 0x10b   : > { %1545 = vrot.lane.b32.xlu0 %v5920_v58, %s5699_s29  ;;  %5119 = vmatprep.subr.msk.bf16.mxu1 %vm1118_vm0, %v5920_v58  ;;  %v1144_v59 = vsel %vm1118_vm0, %v5920_v58, 0  ;;  %v4789_v60 = vpop.f32.mrb[4].mxu1 }
 0x10c   : > { %4832 = vmatpush3.bf16.xpose.msra.mxu1 %v1144_v59  ;;  %v872_v61 = vadd.f32 %v4789_v60, %v5912_v49  ;;  %v863_v62 = vpop.f32.mrb[5].mxu1 }
 0x10d   : > { %5120 = vmatprep.subr.msk.bf16.mxu1 %vm1118_vm0, %v5918_v57  ;;  %v864_v0 = vadd.f32 %v5912_v49, %v863_v62  ;;  %v4790_v1 = vpop.f32.mrb[6].mxu1  ;;  %v4753_v4 = vpop.f32.mrb[0].mxu0 }
 0x10e   : > { %v875_v2 = vadd.f32 %v4790_v1, %v5912_v49  ;;  %v866_v3 = vpop.f32.mrb[7].mxu1  ;;  %v688_v6 = vadd.f32 %v4753_v4, %v5934_v63  ;;  %v679_v7 = vpop.f32.mrb[1].mxu0 }
 0x10f   : > { %v867_v5 = vadd.f32 %v5912_v49, %v866_v3  ;;  %v680_v9 = vadd.f32 %v5934_v63, %v679_v7  ;;  %v4754_v10 = vpop.f32.mrb[2].mxu0 }
 0x110   : > { %v5942_v8 = vpack.c.bf16 %v875_v2, %v872_v61  ;;  %v1080_v12 = vmul.f32 0.17677669, %v688_v6  ;;  %v691_v13 = vadd.f32 %v4754_v10, %v5934_v63  ;;  %v682_v14 = vpop.f32.mrb[3].mxu0 }
 0x111   : > { %v5945_v11 = vpack.c.bf16 %v867_v5, %v864_v0  ;;  %v1078_v15 = vmul.f32 0.17677669, %v680_v9  ;;  %v683_v16 = vadd.f32 %v5934_v63, %v682_v14 }
 0x112   : > { %v1081_v19 = vmul.f32 0.17677669, %v691_v13 }
 0x113   : > { %v4793_v18 = vpop.f32.mrb[8].mxu1  ;;  %v1079_v22 = vmul.f32 0.17677669, %v683_v16  ;;  %v1150_v42 = vsel %vm1118_vm0, %v5945_v11, 0 }
 0x114   : > { %4834 = vmatpush3.bf16.xpose.msra.mxu1 %v1147_v17  ;;  %v888_v20 = vadd.f32 %v4793_v18, %v5912_v49  ;;  %v879_v21 = vpop.f32.mrb[9].mxu1  ;;  %v5955_v25 = vpack.c.bf16 %v1081_v19, %v1080_v12 }
 0x115   : > { %5121 = vmatprep.subr.msk.bf16.mxu1 %vm1118_vm0, %v5945_v11  ;;  %v880_v23 = vadd.f32 %v5912_v49, %v879_v21  ;;  %v4794_v24 = vpop.f32.mrb[10].mxu1  ;;  %v5958_v28 = vpack.c.bf16 %v1079_v22, %v1078_v15  ;;  %v4757_v29 = vpop.f32.mrb[4].mxu0 }
 0x116   : > { %v891_v26 = vadd.f32 %v4794_v24, %v5912_v49  ;;  %v882_v27 = vpop.f32.mrb[11].mxu1  ;;  %v704_v31 = vadd.f32 %v4757_v29, %v5934_v63  ;;  %v695_v32 = vpop.f32.mrb[5].mxu0  ;;  %v4388_v29 = vld [vmem:[%s7691_s6] ss:$0 sm:$0xff] }
 0x117   : > { %v883_v30 = vadd.f32 %v5912_v49, %v882_v27  ;;  %4847 = vmatprep.mubr.msk.bf16.mxu1 %vm1118_vm0, %v5958_v28  ;;  %v696_v34 = vadd.f32 %v5934_v63, %v695_v32  ;;  %v4758_v35 = vpop.f32.mrb[6].mxu0 }
 0x118   : > { %v5962_v33 = vpack.c.bf16 %v891_v26, %v888_v20  ;;  %v1084_v37 = vmul.f32 0.17677669, %v704_v31  ;;  %v707_v38 = vadd.f32 %v4758_v35, %v5934_v63  ;;  %v698_v39 = vpop.f32.mrb[7].mxu0 }
 0x119   : > { %v5967_v36 = vpack.c.bf16 %v883_v30, %v880_v23  ;;  %v1082_v40 = vmul.f32 0.17677669, %v696_v34  ;;  %v699_v41 = vadd.f32 %v5934_v63, %v698_v39 }
 0x11a   : > { %v1085_v44 = vmul.f32 0.17677669, %v707_v38 }
 0x11b   : > { %v4797_v43 = vpop.f32.mrb[12].mxu1  ;;  %v1083_v47 = vmul.f32 0.17677669, %v699_v41  ;;  %v1156_v23 = vsel %vm1118_vm0, %v5967_v36, 0 }
 0x11c   : > { %4836 = vmatpush3.bf16.xpose.msra.mxu1 %v1150_v42  ;;  %v904_v45 = vadd.f32 %v4797_v43, %v5912_v49  ;;  %v895_v46 = vpop.f32.mrb[13].mxu1  ;;  %v5977_v51 = vpack.c.bf16 %v1085_v44, %v1084_v37 }
 0x11d   : > { %5122 = vmatprep.subr.msk.bf16.mxu1 %vm1118_vm0, %v5942_v8  ;;  %v896_v48 = vadd.f32 %v5912_v49, %v895_v46  ;;  %v4798_v50 = vpop.f32.mrb[14].mxu1  ;;  %v5980_v54 = vpack.c.bf16 %v1083_v47, %v1082_v40  ;;  %v4761_v55 = vpop.f32.mrb[8].mxu0  ;;  %v1159_v40 = vsel %vm1118_vm0, %v5962_v33, 0 }
 0x11e   : > { %v907_v52 = vadd.f32 %v4798_v50, %v5912_v49  ;;  %v898_v53 = vpop.f32.mrb[15].mxu1  ;;  %v720_v59 = vadd.f32 %v4761_v55, %v5934_v63  ;;  %v711_v60 = vpop.f32.mrb[9].mxu0 }
 0x11f   : > { %v899_v56 = vadd.f32 %v5912_v49, %v898_v53  ;;  %v712_v62 = vadd.f32 %v5934_v63, %v711_v60  ;;  %v4762_v0 = vpop.f32.mrb[10].mxu0  ;;  %v1153_v49 = vsel %vm1118_vm0, %v5942_v8, 0 }
 0x120   : > { %v5984_v61 = vpack.c.bf16 %v907_v52, %v904_v45  ;;  %v1088_v2 = vmul.f32 0.17677669, %v720_v59  ;;  %v723_v3 = vadd.f32 %v4762_v0, %v5934_v63  ;;  %v714_v4 = vpop.f32.mrb[11].mxu0 }
 0x121   : > { %v5987_v1 = vpack.c.bf16 %v899_v56, %v896_v48  ;;  %v1086_v5 = vmul.f32 0.17677669, %v712_v62  ;;  %v715_v6 = vadd.f32 %v5934_v63, %v714_v4 }
 0x122   : > { %v1089_v7 = vmul.f32 0.17677669, %v723_v3 }
 0x123   : > { %v1087_v9 = vmul.f32 0.17677669, %v715_v6  ;;  %v1162_v53 = vsel %vm1118_vm0, %v5987_v1, 0  ;;  %v1165_v6 = vsel %vm1118_vm0, %v5984_v61, 0 }
 0x124   : > { %4838 = vmatpush3.bf16.xpose.msra.mxu1 %v1153_v49  ;;  %v5995_v10 = vpack.c.bf16 %v1089_v7, %v1088_v2 }
 0x125   : > { %5123 = vmatprep.subr.msk.bf16.mxu1 %vm1118_vm0, %v5967_v36  ;;  %v5997_v12 = vpack.c.bf16 %v1087_v9, %v1086_v5  ;;  %v4765_v13 = vpop.f32.mrb[12].mxu0 }
 0x126   : > { %v736_v14 = vadd.f32 %v4765_v13, %v5934_v63  ;;  %v727_v15 = vpop.f32.mrb[13].mxu0 }
 0x127   : > { %v728_v16 = vadd.f32 %v5934_v63, %v727_v15  ;;  %v4766_v17 = vpop.f32.mrb[14].mxu0 }
 0x128   : > { %v1092_v18 = vmul.f32 0.17677669, %v736_v14  ;;  %v739_v19 = vadd.f32 %v4766_v17, %v5934_v63  ;;  %v730_v20 = vpop.f32.mrb[15].mxu0 }
 0x129   : > { %v1090_v21 = vmul.f32 0.17677669, %v728_v16  ;;  %v731_v22 = vadd.f32 %v5934_v63, %v730_v20 }
 0x12a   : > { %v1093_v24 = vmul.f32 0.17677669, %v739_v19 }
 0x12b   : > { %v1091_v26 = vmul.f32 0.17677669, %v731_v22 }
 0x12c   : > { %4840 = vmatpush3.bf16.xpose.msra.mxu1 %v1156_v23  ;;  %v6007_v27 = vpack.c.bf16 %v1093_v24, %v1092_v18 }
 0x12d   : > { %5124 = vmatprep.subr.msk.bf16.mxu1 %vm1118_vm0, %v5962_v33  ;;  %v6012_v30 = vpack.c.bf16 %v1091_v26, %v1090_v21  ;;  %v4817_v31 = vpop.f32.mrb[16].mxu0 }
 0x12e   : > { %v1024_v32 = vadd.f32 %v4817_v31, %v4388_v29  ;;  %v1015_v63 = vpop.f32.mrb[17].mxu0 }
 0x12f   : > { %v1016_v34 = vadd.f32 %v4388_v29, %v1015_v63  ;;  %v4818_v35 = vpop.f32.mrb[18].mxu0 }
 0x130   : > { %v1027_v37 = vadd.f32 %v4818_v35, %v4388_v29  ;;  %v1018_v38 = vpop.f32.mrb[19].mxu0 }
 0x131   : > { %v1019_v39 = vadd.f32 %v4388_v29, %v1018_v38 }
 0x132   : > { %v6016_v41 = vpack.c.bf16 %v1027_v37, %v1024_v32 }
 0x133   : > { %v6018_v42 = vpack.c.bf16 %v1019_v39, %v1016_v34 }
 0x134   : > { %4842 = vmatpush3.bf16.xpose.msra.mxu1 %v1159_v40 }
 0x135   : > { %5125 = vmatprep.subr.msk.bf16.mxu1 %vm1118_vm0, %v5987_v1  ;;  %v4821_v43 = vpop.f32.mrb[20].mxu0  ;;  %4863 = vmatprep.subr.bf16.mxu0 %v6018_v42 }
 0x136   : > { %v1040_v44 = vadd.f32 %v4821_v43, %v4388_v29  ;;  %v1031_v45 = vpop.f32.mrb[21].mxu0  ;;  %4864 = vmatpush3.bf16.msra.mxu0 %v6018_v42 }
 0x137   : > { %v1032_v46 = vadd.f32 %v4388_v29, %v1031_v45  ;;  %v4822_v47 = vpop.f32.mrb[22].mxu0  ;;  %4865 = vmatprep.subr.bf16.mxu0 %v6016_v41 }
 0x138   : > { %v1043_v48 = vadd.f32 %v4822_v47, %v4388_v29  ;;  %v1034_v50 = vpop.f32.mrb[23].mxu0 }
 0x139   : > { %v1035_v52 = vadd.f32 %v4388_v29, %v1034_v50 }
 0x13a   : > { %v6027_v55 = vpack.c.bf16 %v1043_v48, %v1040_v44  ;;  %4866 = vmatpush3.bf16.msra.mxu0 %v6016_v41 }
 0x13b   : > { %v6030_v56 = vpack.c.bf16 %v1035_v52, %v1032_v46 }
 0x13c   : > { %4844 = vmatpush3.bf16.xpose.msra.mxu1 %v1162_v53 }
 0x13d   : > { %5126 = vmatprep.subr.msk.bf16.mxu1 %vm1118_vm0, %v5984_v61  ;;  %v4825_v59 = vpop.f32.mrb[24].mxu0  ;;  %4867 = vmatprep.subr.bf16.mxu0 %v6030_v56 }
 0x13e   : > { %v1056_v60 = vadd.f32 %v4825_v59, %v4388_v29  ;;  %v1047_v62 = vpop.f32.mrb[25].mxu0  ;;  %4868 = vmatpush3.bf16.msra.mxu0 %v6030_v56 }
 0x13f   : > { %v1048_v0 = vadd.f32 %v4388_v29, %v1047_v62  ;;  %v4826_v2 = vpop.f32.mrb[26].mxu0  ;;  %4869 = vmatprep.subr.bf16.mxu0 %v6027_v55 }
 0x140   : > { %v1059_v3 = vadd.f32 %v4826_v2, %v4388_v29  ;;  %v1050_v4 = vpop.f32.mrb[27].mxu0 }
 0x141   : > { %v1051_v5 = vadd.f32 %v4388_v29, %v1050_v4 }
 0x142   : > { %v6039_v49 = vpack.c.bf16 %v1059_v3, %v1056_v60  ;;  %4870 = vmatpush3.bf16.msra.mxu0 %v6027_v55 }
 0x143   : > { %v6042_v7 = vpack.c.bf16 %v1051_v5, %v1048_v0 }
 0x144   : > { %4846 = vmatpush3.bf16.xpose.msra.mxu1 %v1165_v6 }
 0x145   : > { %v4829_v9 = vpop.f32.mrb[28].mxu0  ;;  %4871 = vmatprep.subr.bf16.mxu0 %v6042_v7 }
 0x146   : > { %v1072_v13 = vadd.f32 %v4829_v9, %v4388_v29  ;;  %v1063_v14 = vpop.f32.mrb[29].mxu0  ;;  %4872 = vmatpush3.bf16.msra.mxu0 %v6042_v7 }
 0x147   : > { %v1064_v15 = vadd.f32 %v4388_v29, %v1063_v14  ;;  %v4830_v16 = vpop.f32.mrb[30].mxu0  ;;  %4873 = vmatprep.subr.bf16.mxu0 %v6039_v49 }
 0x148   : > { %v1075_v17 = vadd.f32 %v4830_v16, %v4388_v29  ;;  %v1066_v18 = vpop.f32.mrb[31].mxu0 }
 0x149   : > { %v1067_v19 = vadd.f32 %v4388_v29, %v1066_v18 }
 0x14a   : > { %v6049_v20 = vpack.c.bf16 %v1075_v17, %v1072_v13  ;;  %4874 = vmatpush3.bf16.msra.mxu0 %v6039_v49 }
 0x14b   : > { %4848 = vmatmul.mubr.msk.bf16.vlgmr.msra.gmra.mrb[16].mxu1 %vm1118_vm0, %v5955_v25  ;;  %v6054_v21 = vpack.c.bf16 %v1067_v19, %v1064_v15 }
 0x14c   : > { %4851 = vmatprep.mubr.msk.bf16.mxu1 %vm1118_vm0, %v5980_v54 }
 0x14d   : > { %4875 = vmatprep.subr.bf16.mxu0 %v6054_v21 }
 0x14e   : > { %4876 = vmatpush3.bf16.msra.mxu0 %v6054_v21 }
 0x14f   : > { %4877 = vmatprep.subr.bf16.mxu0 %v6049_v20 }
 0x152   : > { %4878 = vmatpush3.bf16.msra.mxu0 %v6049_v20 }
 0x153   : > { %4852 = vmatmul.mubr.msk.bf16.gmra.mrb[20].mxu1 %vm1118_vm0, %v5977_v51 }
 0x154   : > { %4855 = vmatprep.mubr.msk.bf16.mxu1 %vm1118_vm0, %v5997_v12 }
 0x15b   : > { %4856 = vmatmul.mubr.msk.bf16.gmra.mrb[24].mxu1 %vm1118_vm0, %v5995_v10 }
 0x15c   : > { %4859 = vmatprep.mubr.msk.bf16.mxu1 %vm1118_vm0, %v6012_v30 }
 0x163   : > { %4860 = vmatmul.mubr.msk.bf16.gmra.mrb[28].mxu1 %vm1118_vm0, %v6007_v27 }
 0x17c   : > { %v6108_v46 = vpop.permute.xlu1 %1547 }
 0x17d   : > { %v6070_v22 = vpop.permute.xlu0 %1545 }
 0x17e   : > { %5127 = vmatprep.subr.msk.bf16.mxu0 %vm1118_vm0, %v6070_v22 }
 0x21e   : > { %v4849_v23 = vpop.f32.mrb[16].mxu1 }
 0x21f   : > { %1268 = vmax.xlane.f32.xlu1 %v4849_v23  ;;  %v1201_v24 = vpop.f32.mrb[17].mxu1 }
 0x220   : > { %1264 = vmax.xlane.f32.xlu0 %v1201_v24  ;;  %v4850_v26 = vpop.f32.mrb[18].mxu1 }
 0x221   : > { %v1204_v29 = vpop.f32.mrb[19].mxu1 }
 0x223   : > { %1270 = vmax.xlane.f32.xlu1 %v4850_v26 }
 0x224   : > { %1266 = vmax.xlane.f32.xlu0 %v1204_v29 }
 0x226   : > { %v4853_v31 = vpop.f32.mrb[20].mxu1 }
 0x227   : > { %v6074_v32 = vpop.f32.mrb[21].mxu1 }
 0x228   : > { %1276 = vmax.xlane.f32.xlu0 %v4853_v31  ;;  %v6076_v63 = vpop.f32.mrb[22].mxu1 }
 0x229   : > { %1278 = vmax.xlane.f32.xlu1 %v6076_v63  ;;  %v6079_v34 = vpop.f32.mrb[23].mxu1 }
 0x22c   : > { %1272 = vmax.xlane.f32.xlu0 %v6074_v32 }
 0x22d   : > { %1274 = vmax.xlane.f32.xlu1 %v6079_v34 }
 0x22e   : > { %v6083_v35 = vpop.f32.mrb[24].mxu1 }
 0x22f   : > { %v6085_v37 = vpop.f32.mrb[25].mxu1 }
 0x230   : > { %1284 = vmax.xlane.f32.xlu0 %v6083_v35  ;;  %v6088_v38 = vpop.f32.mrb[26].mxu1 }
 0x231   : > { %1286 = vmax.xlane.f32.xlu1 %v6088_v38  ;;  %v6091_v39 = vpop.f32.mrb[27].mxu1 }
 0x234   : > { %1280 = vmax.xlane.f32.xlu0 %v6085_v37 }
 0x235   : > { %1282 = vmax.xlane.f32.xlu1 %v6091_v39 }
 0x236   : > { %v4861_v40 = vpop.f32.mrb[28].mxu1 }
 0x237   : > { %v6095_v43 = vpop.f32.mrb[29].mxu1 }
 0x238   : > { %1292 = vmax.xlane.f32.xlu0 %v4861_v40  ;;  %v6097_v44 = vpop.f32.mrb[30].mxu1 }
 0x239   : > { %v6099_v45 = vpop.f32.mrb[31].mxu1 }
 0x23c   : > { %1288 = vmax.xlane.f32.xlu0 %v6095_v43 }
 0x246   : > { %1551 = vrot.lane.b32.xlu1 %v5942_v8, %s5699_s29 }
 0x252   : > { %1549 = vrot.lane.b32.xlu0 %v5945_v11, %s5699_s29 }
 0x26a   : > { %1294 = vmax.xlane.f32.xlu1 %v6097_v44 }
 0x26e   : > { %1290 = vmax.xlane.f32.xlu1 %v6099_v45 }
 0x2ac   : > { %v1269_v47 = vpop.xlane.xlu1 %1268 }
 0x2ad   : > { %v1298_v48 = vsub.f32 %v4849_v23, %v1269_v47  ;;  %v1265_v50 = vpop.xlane.xlu0 %1264 }
 0x2ae   : > { %v1296_v52 = vsub.f32 %v1201_v24, %v1265_v50 }
 0x2af   : > { %v1316_v53 = vmul.f32 1.442695, %v1298_v48 }
 0x2b0   : > { %v1312_v59 = vmul.f32 1.442695, %v1296_v52  ;;  %v1271_v60 = vpop.xlane.xlu1 %1270 }
 0x2b1   : > { %5355 = vpow2.f32 %v1316_v53  ;;  %v1299_v62 = vsub.f32 %v4850_v26, %v1271_v60  ;;  %v1267_v0 = vpop.xlane.xlu0 %1266 }
 0x2b2   : > { %v1297_v2 = vsub.f32 %v1204_v29, %v1267_v0  ;;  %5357 = vpow2.f32 %v1312_v59 }
 0x2b3   : > { %v1318_v3 = vmul.f32 1.442695, %v1299_v62 }
 0x2b4   : > { %v1314_v4 = vmul.f32 1.442695, %v1297_v2 }
 0x2b5   : > { %5359 = vpow2.f32 %v1318_v3  ;;  %v1277_v14 = vpop.xlane.xlu0 %1276 }
 0x2b6   : > { %5361 = vpow2.f32 %v1314_v4  ;;  %v1279_v17 = vpop.xlane.xlu1 %1278  ;;  %v1302_v23 = vsub.f32 %v4853_v31, %v1277_v14 }
 0x2b7   : > { %v1303_v50 = vsub.f32 %v6076_v63, %v1279_v17 }
 0x2b8   : > { %v1324_v29 = vmul.f32 1.442695, %v1302_v23 }
 0x2b9   : > { %v1273_v15 = vpop.xlane.xlu0 %1272  ;;  %v1326_v62 = vmul.f32 1.442695, %v1303_v50 }
 0x2ba   : > { %v1275_v19 = vpop.xlane.xlu1 %1274  ;;  %v1300_v24 = vsub.f32 %v6074_v32, %v1273_v15  ;;  %5363 = vpow2.f32 %v1324_v29 }
 0x2bb   : > { %v6110_v5 = vpop.eup %5355  ;;  %v1301_v47 = vsub.f32 %v6079_v34, %v1275_v19 }
 0x2bc   : > { %1348 = vadd.xlane.f32.xlu0 %v6110_v5  ;;  %v6113_v6 = vpop.eup %5357  ;;  %v1320_v52 = vmul.f32 1.442695, %v1300_v24 }
 0x2bd   : > { %v1285_v16 = vpop.xlane.xlu0 %1284  ;;  %v1322_v53 = vmul.f32 1.442695, %v1301_v47 }
 0x2be   : > { %v1287_v48 = vpop.xlane.xlu1 %1286  ;;  %5365 = vpow2.f32 %v1320_v52  ;;  %v1306_v0 = vsub.f32 %v6083_v35, %v1285_v16 }
 0x2bf   : > { %v6115_v9 = vpop.eup %5359  ;;  %5367 = vpow2.f32 %v1322_v53  ;;  %v1307_v35 = vsub.f32 %v6088_v38, %v1287_v48 }
 0x2c0   : > { %1344 = vadd.xlane.f32.xlu0 %v6113_v6  ;;  %1350 = vadd.xlane.f32.xlu1 %v6115_v9  ;;  %v6119_v13 = vpop.eup %5361  ;;  %5369 = vpow2.f32 %v1326_v62  ;;  %v1332_v3 = vmul.f32 1.442695, %v1306_v0 }
 0x2c1   : > { %v1281_v18 = vpop.xlane.xlu0 %1280  ;;  %v1334_v17 = vmul.f32 1.442695, %v1307_v35 }
 0x2c2   : > { %v1283_v2 = vpop.xlane.xlu1 %1282  ;;  %v1304_v34 = vsub.f32 %v6085_v37, %v1281_v18 }
 0x2c3   : > { %v1305_v18 = vsub.f32 %v6091_v39, %v1283_v2 }
 0x2c4   : > { %1346 = vadd.xlane.f32.xlu1 %v6119_v13  ;;  %v6134_v14 = vpop.eup %5363 }
 0x2c5   : > { %v1293_v26 = vpop.xlane.xlu0 %1292 }
 0x2c6   : > { %v1310_v59 = vsub.f32 %v4861_v40, %v1293_v26  ;;  %v6132_v4 = vpop.permute.xlu1 %1551  ;;  %v1328_v40 = vmul.f32 1.442695, %v1304_v34 }
 0x2c8   : > { %v1340_v31 = vmul.f32 1.442695, %v1310_v59  ;;  %v6138_v15 = vpop.eup %5365 }
 0x2c9   : > { %v1289_v60 = vpop.xlane.xlu0 %1288  ;;  %v6140_v16 = vpop.eup %5367 }
 0x2ca   : > { %v1308_v32 = vsub.f32 %v6095_v43, %v1289_v60  ;;  %5371 = vpow2.f32 %v1340_v31  ;;  %v6146_v23 = vpop.eup %5369 }
 0x2cb   : > { %5373 = vpow2.f32 %v1332_v3 }
 0x2cc   : > { %v1336_v63 = vmul.f32 1.442695, %v1308_v32 }
 0x2cd   : > { %v1550_v59 = vpop.permute.xlu0 %1549 }
 0x2ce   : > { %5375 = vpow2.f32 %v1336_v63 }
 0x2cf   : > { %5377 = vpow2.f32 %v1328_v40 }
 0x2d4   : > { %v6148_v24 = vpop.eup %5371 }
 0x2d5   : > { %1555 = vrot.lane.b32.xlu1 %v5962_v33, %s5699_s29  ;;  %v6153_v29 = vpop.eup %5373 }
 0x2d6   : > { %1553 = vrot.lane.b32.xlu0 %v5967_v36, %s5699_s29 }
 0x2d8   : > { %v6155_v47 = vpop.eup %5375 }
 0x2d9   : > { %v6159_v48 = vpop.eup %5377 }
 0x2f5   : > { %1356 = vadd.xlane.f32.xlu0 %v6134_v14 }
 0x2f7   : > { %v1295_v43 = vpop.xlane.xlu1 %1294 }
 0x2f8   : > { %v1311_v37 = vsub.f32 %v6097_v44, %v1295_v43  ;;  %v1330_v44 = vmul.f32 1.442695, %v1305_v18  ;;  %v1586_v18 = vsel %vm1118_vm0, %v6070_v22, 0 }
 0x2f9   : > { %1354 = vadd.xlane.f32.xlu0 %v6140_v16  ;;  %1352 = vadd.xlane.f32.xlu1 %v6138_v15 }
 0x2fa   : > { %v1342_v19 = vmul.f32 1.442695, %v1311_v37 }
 0x2fb   : > { %v1291_v38 = vpop.xlane.xlu1 %1290 }
 0x2fc   : > { %5379 = vpow2.f32 %v1342_v19  ;;  %v1309_v26 = vsub.f32 %v6099_v45, %v1291_v38 }
 0x2fd   : > { %1372 = vadd.xlane.f32.xlu0 %v6148_v24  ;;  %1358 = vadd.xlane.f32.xlu1 %v6146_v23  ;;  %5381 = vpow2.f32 %v1334_v17 }
 0x2fe   : > { %5383 = vpow2.f32 %v1330_v44  ;;  %v1338_v39 = vmul.f32 1.442695, %v1309_v26 }
 0x300   : > { %5385 = vpow2.f32 %v1338_v39 }
 0x301   : > { %1368 = vadd.xlane.f32.xlu0 %v6155_v47  ;;  %1364 = vadd.xlane.f32.xlu1 %v6153_v29 }
 0x305   : > { %1360 = vadd.xlane.f32.xlu1 %v6159_v48 }
 0x306   : > { %v6162_v50 = vpop.eup %5379 }
 0x307   : > { %1374 = vadd.xlane.f32.xlu0 %v6162_v50  ;;  %v6165_v45 = vpop.eup %5381 }
 0x308   : > { %v6168_v52 = vpop.eup %5383 }
 0x309   : > { %1366 = vadd.xlane.f32.xlu1 %v6165_v45 }
 0x30a   : > { %v6171_v53 = vpop.eup %5385 }
 0x30d   : > { %1362 = vadd.xlane.f32.xlu1 %v6168_v52 }
 0x311   : > { %1370 = vadd.xlane.f32.xlu1 %v6171_v53 }
 0x31d   : > { %1557 = vrot.lane.b32.xlu0 %v5987_v1, %s5699_s29 }
 0x321   : > { %1521 = vrot.lane.b32.xlu0 %v5958_v28, %s5699_s29 }
 0x322   : > { %1559 = vrot.lane.b32.xlu1 %v5984_v61, %s5699_s29 }
 0x325   : > { %1525 = vrot.lane.b32.xlu0 %v5980_v54, %s5699_s29 }
 0x326   : > { %1523 = vrot.lane.b32.xlu1 %v5955_v25, %s5699_s29 }
 0x329   : > { %1529 = vrot.lane.b32.xlu0 %v5997_v12, %s5699_s29 }
 0x32a   : > { %1527 = vrot.lane.b32.xlu1 %v5977_v51, %s5699_s29 }
 0x32d   : > { %1533 = vrot.lane.b32.xlu0 %v6012_v30, %s5699_s29 }
 0x32e   : > { %1531 = vrot.lane.b32.xlu1 %v5995_v10, %s5699_s29 }
 0x331   : > { %1866 = vrot.lane.b32.xlu0 %v6018_v42, %s5699_s29 }
 0x332   : > { %1535 = vrot.lane.b32.xlu1 %v6007_v27, %s5699_s29 }
 0x335   : > { %1870 = vrot.lane.b32.xlu0 %v6030_v56, %s5699_s29 }
 0x336   : > { %1868 = vrot.lane.b32.xlu1 %v6016_v41, %s5699_s29 }
 0x339   : > { %1874 = vrot.lane.b32.xlu0 %v6042_v7, %s5699_s29 }
 0x33a   : > { %1872 = vrot.lane.b32.xlu1 %v6027_v55, %s5699_s29 }
 0x33d   : > { %1878 = vrot.lane.b32.xlu0 %v6054_v21, %s5699_s29 }
 0x33e   : > { %1876 = vrot.lane.b32.xlu1 %v6039_v49, %s5699_s29 }
 0x341   : > { %2003 = vrot.lane.b32.xlu0 %v5920_v58, %s5700_s20 }
 0x342   : > { %1880 = vrot.lane.b32.xlu1 %v6049_v20, %s5699_s29 }
 0x346   : > { %2005 = vrot.lane.b32.xlu1 %v5918_v57, %s5700_s20 }
 0x349   : > { %v1349_v60 = vpop.xlane.xlu0 %1348 }
 0x34d   : > { %v1345_v62 = vpop.xlane.xlu0 %1344  ;;  %v1351_v0 = vpop.xlane.xlu1 %1350 }
 0x34e   : > { %5387 = vrcp.f32 %v1351_v0 }
 0x34f   : > { %5389 = vrcp.f32 %v1345_v62 }
 0x350   : > { %5391 = vrcp.f32 %v1349_v60 }
 0x351   : > { %v1347_v2 = vpop.xlane.xlu1 %1346  ;;  %v1554_v22 = vpop.permute.xlu0 %1553 }
 0x352   : > { %5393 = vrcp.f32 %v1347_v2 }
 0x358   : > { %v5388_v31 = vpop.eup %5387 }
 0x359   : > { %v5390_v32 = vpop.eup %5389  ;;  %v1395_v63 = vmul.f32 %v5388_v31, %v6115_v9  ;;  %v1589_v9 = vsel %vm1118_vm0, %v6108_v46, 0 }
 0x35a   : > { %v5392_v3 = vpop.eup %5391  ;;  %v1392_v35 = vmul.f32 %v5390_v32, %v6113_v6  ;;  %v1592_v6 = vsel %vm1118_vm0, %v1550_v59, 0 }
 0x35b   : > { %v1394_v43 = vmul.f32 %v5392_v3, %v6110_v5  ;;  %v1595_v5 = vsel %vm1118_vm0, %v6132_v4, 0 }
 0x35c   : > { %v5394_v34 = vpop.eup %5393 }
 0x35d   : > { %v1393_v40 = vmul.f32 %v5394_v34, %v6119_v13  ;;  %v1409_v17 = vpack.c.bf16 %v1395_v63, %v1394_v43  ;;  %v1556_v13 = vpop.permute.xlu1 %1555 }
 0x35e   : > { %v1601_v39 = vsel %vm1118_vm0, %v1556_v13, 0 }
 0x35f   : > { %v1408_v37 = vpack.c.bf16 %v1393_v40, %v1392_v35 }
 0x361   : > { %4879 = vmatprep.mubr.bf16.mxu0 %v1408_v37 }
 0x362   : > { %4880 = vmatmul.mubr.bf16.vlgmr.msra.gmra.mrb[32].mxu0 %v1409_v17 }
 0x363   : > { %4896 = vmatpush3.bf16.xpose.msra.mxu0 %v1586_v18 }
 0x364   : > { %5128 = vmatprep.subr.msk.bf16.mxu0 %vm1118_vm0, %v6108_v46  ;;  %v1598_v46 = vsel %vm1118_vm0, %v1554_v22, 0 }
 0x36b   : > { %4898 = vmatpush3.bf16.xpose.msra.mxu0 %v1589_v9 }
 0x36c   : > { %5129 = vmatprep.subr.msk.bf16.mxu0 %vm1118_vm0, %v1550_v59 }
 0x373   : > { %4900 = vmatpush3.bf16.xpose.msra.mxu0 %v1592_v6 }
 0x374   : > { %5130 = vmatprep.subr.msk.bf16.mxu0 %vm1118_vm0, %v6132_v4 }
 0x37b   : > { %4902 = vmatpush3.bf16.xpose.msra.mxu0 %v1595_v5 }
 0x37c   : > { %5131 = vmatprep.subr.msk.bf16.mxu0 %vm1118_vm0, %v1554_v22 }
 0x382   : > { %v1357_v19 = vpop.xlane.xlu0 %1356 }
 0x383   : > { %4904 = vmatpush3.bf16.xpose.msra.mxu0 %v1598_v46 }
 0x384   : > { %5132 = vmatprep.subr.msk.bf16.mxu0 %vm1118_vm0, %v1556_v13 }
 0x386   : > { %v1355_v38 = vpop.xlane.xlu0 %1354  ;;  %v1353_v44 = vpop.xlane.xlu1 %1352 }
 0x387   : > { %5395 = vrcp.f32 %v1355_v38 }
 0x388   : > { %5397 = vrcp.f32 %v1353_v44 }
 0x389   : > { %5399 = vrcp.f32 %v1357_v19 }
 0x38a   : > { %v1373_v26 = vpop.xlane.xlu0 %1372  ;;  %v1359_v4 = vpop.xlane.xlu1 %1358 }
 0x38b   : > { %4906 = vmatpush3.bf16.xpose.msra.mxu0 %v1601_v39  ;;  %5401 = vrcp.f32 %v1359_v4 }
 0x38e   : > { %v1365_v59 = vpop.xlane.xlu1 %1364  ;;  %v1369_v60 = vpop.xlane.xlu0 %1368 }
 0x391   : > { %v5396_v62 = vpop.eup %5395 }
 0x392   : > { %v5398_v0 = vpop.eup %5397  ;;  %v1361_v2 = vpop.xlane.xlu1 %1360  ;;  %v1397_v31 = vmul.f32 %v5396_v62, %v6140_v16 }
 0x393   : > { %v1396_v32 = vmul.f32 %v5398_v0, %v6138_v15  ;;  %v5400_v3 = vpop.eup %5399 }
 0x394   : > { %v1375_v34 = vpop.xlane.xlu0 %1374  ;;  %v1398_v43 = vmul.f32 %v5400_v3, %v6134_v14 }
 0x395   : > { %v1410_v63 = vpack.c.bf16 %v1397_v31, %v1396_v32  ;;  %v5402_v35 = vpop.eup %5401 }
 0x396   : > { %v1367_v40 = vpop.xlane.xlu1 %1366  ;;  %v1399_v37 = vmul.f32 %v5402_v35, %v6146_v23 }
 0x397   : > { %4883 = vmatprep.mubr.bf16.mxu0 %v1410_v63  ;;  %5403 = vrcp.f32 %v1367_v40 }
 0x398   : > { %v1558_v17 = vpop.permute.xlu0 %1557  ;;  %5405 = vrcp.f32 %v1361_v2  ;;  %v1411_v18 = vpack.c.bf16 %v1399_v37, %v1398_v43 }
 0x399   : > { %5133 = vmatprep.subr.msk.bf16.mxu0 %vm1118_vm0, %v1558_v17  ;;  %v1604_v16 = vsel %vm1118_vm0, %v1558_v17, 0  ;;  %5407 = vrcp.f32 %v1365_v59 }
 0x39a   : > { %4908 = vmatpush3.bf16.xpose.msra.mxu0 %v1604_v16  ;;  %v1363_v15 = vpop.xlane.xlu1 %1362 }
 0x39b   : > { %4884 = vmatmul.mubr.bf16.gmra.mrb[36].mxu0 %v1411_v18  ;;  %5409 = vrcp.f32 %v1363_v15 }
 0x39c   : > { %v1522_v9 = vpop.permute.xlu0 %1521  ;;  %5411 = vrcp.f32 %v1369_v60 }
 0x39e   : > { %v1371_v6 = vpop.xlane.xlu1 %1370 }
 0x39f   : > { %5413 = vrcp.f32 %v1371_v6 }
 0x3a0   : > { %5415 = vrcp.f32 %v1375_v34  ;;  %v1526_v14 = vpop.permute.xlu0 %1525 }
 0x3a1   : > { %v5404_v23 = vpop.eup %5403  ;;  %5417 = vrcp.f32 %v1373_v26 }
 0x3a2   : > { %v1560_v5 = vpop.permute.xlu1 %1559  ;;  %v5406_v22 = vpop.eup %5405  ;;  %v1403_v44 = vmul.f32 %v5404_v23, %v6165_v45 }
 0x3a3   : > { %5134 = vmatprep.subr.msk.bf16.mxu0 %vm1118_vm0, %v1560_v5  ;;  %v1607_v13 = vsel %vm1118_vm0, %v1560_v5, 0  ;;  %v5408_v19 = vpop.eup %5407  ;;  %v1400_v4 = vmul.f32 %v5406_v22, %v6159_v48 }
 0x3a4   : > { %v1530_v46 = vpop.permute.xlu0 %1529  ;;  %4910 = vmatpush3.bf16.xpose.msra.mxu0 %v1607_v13  ;;  %v1402_v26 = vmul.f32 %v5408_v19, %v6153_v29 }
 0x3a5   : > { %v5410_v38 = vpop.eup %5409 }
 0x3a6   : > { %v1524_v39 = vpop.permute.xlu1 %1523  ;;  %v1401_v59 = vmul.f32 %v5410_v38, %v6168_v52  ;;  %v5412_v60 = vpop.eup %5411  ;;  %v1413_v31 = vpack.c.bf16 %v1403_v44, %v1402_v26 }
 0x3a7   : > { %v1404_v34 = vmul.f32 %v5412_v60, %v6155_v47 }
 0x3a8   : > { %v1534_v62 = vpop.permute.xlu0 %1533  ;;  %v1412_v0 = vpack.c.bf16 %v1401_v59, %v1400_v4 }
 0x3a9   : > { %v5414_v2 = vpop.eup %5413 }
 0x3aa   : > { %v5416_v32 = vpop.eup %5415  ;;  %4887 = vmatprep.mubr.bf16.mxu0 %v1412_v0  ;;  %v1528_v3 = vpop.permute.xlu1 %1527  ;;  %v1405_v63 = vmul.f32 %v5414_v2, %v6171_v53 }
 0x3ab   : > { %4888 = vmatmul.mubr.bf16.gmra.mrb[40].mxu0 %v1413_v31  ;;  %v5418_v45 = vpop.eup %5417  ;;  %v1407_v52 = vmul.f32 %v5416_v32, %v6162_v50 }
 0x3ac   : > { %v1867_v35 = vpop.permute.xlu0 %1866  ;;  %v1414_v48 = vpack.c.bf16 %v1405_v63, %v1404_v34  ;;  %v1406_v40 = vmul.f32 %v5418_v45, %v6148_v24 }
 0x3ad   : > { %4927 = vmatprep.subr.bf16.mxu1 %v1867_v35 }
 0x3ae   : > { %4891 = vmatprep.mubr.bf16.mxu0 %v1414_v48  ;;  %v1532_v29 = vpop.permute.xlu1 %1531  ;;  %4928 = vmatpush3.bf16.msra.mxu1 %v1867_v35  ;;  %v1415_v43 = vpack.c.bf16 %v1407_v52, %v1406_v40 }
 0x3b0   : > { %v1871_v53 = vpop.permute.xlu0 %1870 }
 0x3b2   : > { %v1536_v37 = vpop.permute.xlu1 %1535 }
 0x3b3   : > { %4892 = vmatmul.mubr.bf16.gmra.mrb[44].mxu0 %v1415_v43 }
 0x3b4   : > { %4911 = vmatprep.mubr.msk.bf16.mxu0 %vm1118_vm0, %v1522_v9  ;;  %v1875_v50 = vpop.permute.xlu0 %1874 }
 0x3b6   : > { %v1869_v47 = vpop.permute.xlu1 %1868 }
 0x3b7   : > { %4929 = vmatprep.subr.bf16.mxu1 %v1869_v47 }
 0x3b8   : > { %4930 = vmatpush3.bf16.msra.mxu1 %v1869_v47  ;;  %v1879_v18 = vpop.permute.xlu0 %1878 }
 0x3b9   : > { %4931 = vmatprep.subr.bf16.mxu1 %v1871_v53 }
 0x3ba   : > { %v1873_v17 = vpop.permute.xlu1 %1872 }
 0x3bb   : > { %4912 = vmatmul.mubr.msk.bf16.vlgmr.msra.gmra.mrb[48].mxu0 %vm1118_vm0, %v1524_v39 }
 0x3bc   : > { %4915 = vmatprep.mubr.msk.bf16.mxu0 %vm1118_vm0, %v1526_v14  ;;  %4932 = vmatpush3.bf16.msra.mxu1 %v1871_v53  ;;  %v6257_v15 = vpop.permute.xlu0 %2003 }
 0x3bd   : > { %4933 = vmatprep.subr.bf16.mxu1 %v1873_v17 }
 0x3be   : > { %v1877_v24 = vpop.permute.xlu1 %1876 }
 0x3c0   : > { %4934 = vmatpush3.bf16.msra.mxu1 %v1873_v17 }
 0x3c1   : > { %4935 = vmatprep.subr.bf16.mxu1 %v1875_v50 }
 0x3c2   : > { %v1881_v16 = vpop.permute.xlu1 %1880 }
 0x3c3   : > { %4916 = vmatmul.mubr.msk.bf16.gmra.mrb[52].mxu0 %vm1118_vm0, %v1528_v3 }
 0x3c4   : > { %4919 = vmatprep.mubr.msk.bf16.mxu0 %vm1118_vm0, %v1530_v46  ;;  %4936 = vmatpush3.bf16.msra.mxu1 %v1875_v50 }
 0x3c5   : > { %4937 = vmatprep.subr.bf16.mxu1 %v1877_v24 }
 0x3c6   : > { %v6331_v47 = vpop.permute.xlu1 %2005 }
 0x3c8   : > { %4938 = vmatpush3.bf16.msra.mxu1 %v1877_v24 }
 0x3c9   : > { %4939 = vmatprep.subr.bf16.mxu1 %v1879_v18 }
 0x3cb   : > { %4920 = vmatmul.mubr.msk.bf16.gmra.mrb[56].mxu0 %vm1118_vm0, %v1532_v29 }
 0x3cc   : > { %4923 = vmatprep.mubr.msk.bf16.mxu0 %vm1118_vm0, %v1534_v62  ;;  %4940 = vmatpush3.bf16.msra.mxu1 %v1879_v18 }
 0x3cd   : > { %4941 = vmatprep.subr.bf16.mxu1 %v1881_v16 }
 0x3d0   : > { %4942 = vmatpush3.bf16.msra.mxu1 %v1881_v16 }
 0x3d1   : > { %5135 = vmatprep.subr.msk.bf16.mxu1 %vm1118_vm0, %v6257_v15 }
 0x3d3   : > { %4924 = vmatmul.mubr.msk.bf16.gmra.mrb[60].mxu0 %vm1118_vm0, %v1536_v37 }
 0x435   : > { %v6262_v9 = vpop.f32.mrb[32].mxu0 }
 0x436   : > { %7715 = vst [vmem:[#allocation2_spill] sm:$0xff] %v6262_v9  ;;  %v6264_v6 = vpop.f32.mrb[33].mxu0 }
 0x437   : > { %7716 = vst [vmem:[#allocation3_spill] sm:$0xff] %v6264_v6  ;;  %v6266_v14 = vpop.f32.mrb[34].mxu0 }
 0x438   : > { %7717 = vst [vmem:[#allocation4_spill] sm:$0xff] %v6266_v14  ;;  %v6268_v23 = vpop.f32.mrb[35].mxu0 }
 0x439   : > { %7718 = vst [vmem:[#allocation5_spill] sm:$0xff] %v6268_v23 }
 0x46e   : > { %v6270_v5 = vpop.f32.mrb[36].mxu0 }
 0x46f   : > { %7719 = vst [vmem:[#allocation6_spill] sm:$0xff] %v6270_v5  ;;  %v6272_v22 = vpop.f32.mrb[37].mxu0 }
 0x470   : > { %7720 = vst [vmem:[#allocation7_spill] sm:$0xff] %v6272_v22  ;;  %v6274_v13 = vpop.f32.mrb[38].mxu0 }
 0x471   : > { %7721 = vst [vmem:[#allocation8_spill] sm:$0xff] %v6274_v13  ;;  %v6276_v19 = vpop.f32.mrb[39].mxu0 }
 0x472   : > { %7722 = vst [vmem:[#allocation9_spill] sm:$0xff] %v6276_v19 }
 0x47e   : > { %v6278_v46 = vpop.f32.mrb[40].mxu0 }
 0x47f   : > { %7723 = vst [vmem:[#allocation10_spill] sm:$0xff] %v6278_v46  ;;  %v6280_v38 = vpop.f32.mrb[41].mxu0 }
 0x480   : > { %7724 = vst [vmem:[#allocation11_spill] sm:$0xff] %v6280_v38  ;;  %v6282_v44 = vpop.f32.mrb[42].mxu0 }
 0x481   : > { %7725 = vst [vmem:[#allocation12_spill] sm:$0xff] %v6282_v44  ;;  %v6284_v39 = vpop.f32.mrb[43].mxu0 }
 0x482   : > { %7726 = vst [vmem:[#allocation13_spill] sm:$0xff] %v6284_v39 }
 0x486   : > { %v6286_v4 = vpop.f32.mrb[44].mxu0 }
 0x487   : > { %7727 = vst [vmem:[#allocation14_spill] sm:$0xff] %v6286_v4  ;;  %v6288_v59 = vpop.f32.mrb[45].mxu0 }
 0x488   : > { %7728 = vst [vmem:[#allocation15_spill] sm:$0xff] %v6288_v59  ;;  %v6290_v60 = vpop.f32.mrb[46].mxu0 }
 0x489   : > { %7729 = vst [vmem:[#allocation16_spill] sm:$0xff] %v6290_v60  ;;  %v6292_v26 = vpop.f32.mrb[47].mxu0 }
 0x48a   : > { %7730 = vst [vmem:[#allocation17_spill] sm:$0xff] %v6292_v26 }
 0x48e   : > { %v4913_v62 = vpop.f32.mrb[48].mxu0 }
 0x48f   : > { %1710 = vmax.xlane.f32.xlu0 %v4913_v62  ;;  %v1643_v0 = vpop.f32.mrb[49].mxu0 }
 0x490   : > { %v4914_v2 = vpop.f32.mrb[50].mxu0 }
 0x491   : > { %v1646_v31 = vpop.f32.mrb[51].mxu0 }
 0x492   : > { %1708 = vmax.xlane.f32.xlu1 %v1646_v31 }
 0x493   : > { %1706 = vmax.xlane.f32.xlu0 %v1643_v0 }
 0x496   : > { %v4917_v32 = vpop.f32.mrb[52].mxu0 }
 0x497   : > { %1712 = vmax.xlane.f32.xlu0 %v4914_v2  ;;  %v6294_v3 = vpop.f32.mrb[53].mxu0 }
 0x498   : > { %v6296_v34 = vpop.f32.mrb[54].mxu0 }
 0x499   : > { %1720 = vmax.xlane.f32.xlu1 %v6296_v34  ;;  %v6299_v63 = vpop.f32.mrb[55].mxu0 }
 0x49b   : > { %1718 = vmax.xlane.f32.xlu0 %v4917_v32 }
 0x49d   : > { %1716 = vmax.xlane.f32.xlu1 %v6299_v63 }
 0x49e   : > { %v6302_v45 = vpop.f32.mrb[56].mxu0 }
 0x49f   : > { %1714 = vmax.xlane.f32.xlu0 %v6294_v3  ;;  %v6305_v35 = vpop.f32.mrb[57].mxu0 }
 0x4a0   : > { %v6307_v48 = vpop.f32.mrb[58].mxu0 }
 0x4a1   : > { %1728 = vmax.xlane.f32.xlu1 %v6307_v48  ;;  %v6310_v52 = vpop.f32.mrb[59].mxu0 }
 0x4a3   : > { %1726 = vmax.xlane.f32.xlu0 %v6302_v45 }
 0x4a5   : > { %1724 = vmax.xlane.f32.xlu1 %v6310_v52 }
 0x4a6   : > { %v6314_v29 = vpop.f32.mrb[60].mxu0 }
 0x4a7   : > { %1722 = vmax.xlane.f32.xlu0 %v6305_v35  ;;  %v6317_v40 = vpop.f32.mrb[61].mxu0 }
 0x4a8   : > { %v6319_v43 = vpop.f32.mrb[62].mxu0 }
 0x4a9   : > { %v6321_v37 = vpop.f32.mrb[63].mxu0 }
 0x4ab   : > { %1734 = vmax.xlane.f32.xlu0 %v6314_v29 }
 0x4af   : > { %1730 = vmax.xlane.f32.xlu0 %v6317_v40 }
 0x4b6   : > { %2009 = vrot.lane.b32.xlu1 %v5942_v8, %s5700_s20 }
 0x4c5   : > { %2007 = vrot.lane.b32.xlu0 %v5945_v11, %s5700_s20 }
 0x4da   : > { %1736 = vmax.xlane.f32.xlu1 %v6319_v43 }
 0x4de   : > { %1732 = vmax.xlane.f32.xlu1 %v6321_v37 }
 0x51c   : > { %v1711_v53 = vpop.xlane.xlu0 %1710 }
 0x51d   : > { %v1740_v17 = vsub.f32 %v4913_v62, %v1711_v53 }
 0x51f   : > { %v1758_v50 = vmul.f32 1.442695, %v1740_v17  ;;  %v1709_v24 = vpop.xlane.xlu1 %1708 }
 0x520   : > { %v1739_v18 = vsub.f32 %v1646_v31, %v1709_v24  ;;  %v1707_v16 = vpop.xlane.xlu0 %1706 }
 0x521   : > { %5419 = vpow2.f32 %v1758_v50  ;;  %v1738_v59 = vsub.f32 %v1643_v0, %v1707_v16 }
 0x522   : > { %v1756_v26 = vmul.f32 1.442695, %v1739_v18 }
 0x523   : > { %v1754_v4 = vmul.f32 1.442695, %v1738_v59 }
 0x524   : > { %5421 = vpow2.f32 %v1756_v26  ;;  %v1713_v60 = vpop.xlane.xlu0 %1712 }
 0x525   : > { %5423 = vpow2.f32 %v1754_v4  ;;  %v1741_v38 = vsub.f32 %v4914_v2, %v1713_v60 }
 0x527   : > { %v1760_v39 = vmul.f32 1.442695, %v1741_v38 }
 0x528   : > { %v1719_v4 = vpop.xlane.xlu0 %1718 }
 0x529   : > { %5425 = vpow2.f32 %v1760_v39  ;;  %v1721_v39 = vpop.xlane.xlu1 %1720  ;;  %v1744_v60 = vsub.f32 %v4917_v32, %v1719_v4 }
 0x52a   : > { %v1745_v18 = vsub.f32 %v6296_v34, %v1721_v39 }
 0x52b   : > { %v6333_v46 = vpop.eup %5419  ;;  %v1766_v31 = vmul.f32 1.442695, %v1744_v60 }
 0x52c   : > { %1790 = vadd.xlane.f32.xlu1 %v6333_v46  ;;  %v1715_v38 = vpop.xlane.xlu0 %1714  ;;  %v1768_v5 = vmul.f32 1.442695, %v1745_v18 }
 0x52d   : > { %v1717_v26 = vpop.xlane.xlu1 %1716  ;;  %v1742_v53 = vsub.f32 %v6294_v3, %v1715_v38  ;;  %5427 = vpow2.f32 %v1766_v31 }
 0x52e   : > { %v6336_v44 = vpop.eup %5421  ;;  %v1743_v17 = vsub.f32 %v6299_v63, %v1717_v26 }
 0x52f   : > { %v6338_v62 = vpop.eup %5423  ;;  %1788 = vadd.xlane.f32.xlu0 %v6336_v44  ;;  %v1762_v16 = vmul.f32 1.442695, %v1742_v53 }
 0x530   : > { %1786 = vadd.xlane.f32.xlu1 %v6338_v62  ;;  %v1727_v59 = vpop.xlane.xlu0 %1726  ;;  %v1764_v22 = vmul.f32 1.442695, %v1743_v17 }
 0x531   : > { %v1729_v50 = vpop.xlane.xlu1 %1728  ;;  %v1748_v19 = vsub.f32 %v6302_v45, %v1727_v59  ;;  %5429 = vpow2.f32 %v1762_v16 }
 0x532   : > { %5431 = vpow2.f32 %v1764_v22  ;;  %v1749_v34 = vsub.f32 %v6307_v48, %v1729_v50 }
 0x533   : > { %v6342_v0 = vpop.eup %5425  ;;  %v1774_v4 = vmul.f32 1.442695, %v1748_v19  ;;  %5433 = vpow2.f32 %v1768_v5 }
 0x534   : > { %1792 = vadd.xlane.f32.xlu1 %v6342_v0  ;;  %v1723_v2 = vpop.xlane.xlu0 %1722  ;;  %v1776_v19 = vmul.f32 1.442695, %v1749_v34 }
 0x535   : > { %v1725_v13 = vpop.xlane.xlu1 %1724  ;;  %v1746_v3 = vsub.f32 %v6305_v35, %v1723_v2  ;;  %5435 = vpow2.f32 %v1774_v4 }
 0x536   : > { %v1747_v35 = vsub.f32 %v6310_v52, %v1725_v13 }
 0x537   : > { %v1770_v39 = vmul.f32 1.442695, %v1746_v3  ;;  %v6357_v26 = vpop.eup %5427 }
 0x538   : > { %v1735_v24 = vpop.xlane.xlu0 %1734  ;;  %v1772_v59 = vmul.f32 1.442695, %v1747_v35 }
 0x539   : > { %v1752_v32 = vsub.f32 %v6314_v29, %v1735_v24  ;;  %v6359_v45 = vpop.permute.xlu1 %2009 }
 0x53b   : > { %v1782_v63 = vmul.f32 1.442695, %v1752_v32  ;;  %v6363_v5 = vpop.eup %5429 }
 0x53c   : > { %v1731_v38 = vpop.xlane.xlu0 %1730 }
 0x53d   : > { %v1750_v60 = vsub.f32 %v6317_v40, %v1731_v38  ;;  %5437 = vpow2.f32 %v1782_v63  ;;  %v6365_v40 = vpop.eup %5431 }
 0x53e   : > { %5439 = vpow2.f32 %v1770_v39  ;;  %v6370_v31 = vpop.eup %5433 }
 0x53f   : > { %v1778_v22 = vmul.f32 1.442695, %v1750_v60  ;;  %v6372_v13 = vpop.eup %5435 }
 0x540   : > { %v2008_v4 = vpop.permute.xlu0 %2007 }
 0x541   : > { %5441 = vpow2.f32 %v1778_v22 }
 0x542   : > { %5443 = vpow2.f32 %v1776_v19 }
 0x545   : > { %2013 = vrot.lane.b32.xlu1 %v5962_v33, %s5700_s20  ;;  %2011 = vrot.lane.b32.xlu0 %v5967_v36, %s5700_s20 }
 0x547   : > { %v6377_v17 = vpop.eup %5437 }
 0x548   : > { %v6379_v50 = vpop.eup %5439 }
 0x54b   : > { %v6383_v24 = vpop.eup %5441 }
 0x54c   : > { %v6385_v18 = vpop.eup %5443 }
 0x564   : > { %1798 = vadd.xlane.f32.xlu0 %v6357_v26 }
 0x567   : > { %v1737_v29 = vpop.xlane.xlu1 %1736 }
 0x568   : > { %v1753_v48 = vsub.f32 %v6319_v43, %v1737_v29  ;;  %1794 = vadd.xlane.f32.xlu0 %v6363_v5 }
 0x569   : > { %1796 = vadd.xlane.f32.xlu1 %v6365_v40 }
 0x56a   : > { %v1784_v2 = vmul.f32 1.442695, %v1753_v48 }
 0x56b   : > { %v1733_v53 = vpop.xlane.xlu1 %1732 }
 0x56c   : > { %5445 = vpow2.f32 %v1784_v2  ;;  %v1751_v52 = vsub.f32 %v6321_v37, %v1733_v53  ;;  %1800 = vadd.xlane.f32.xlu0 %v6370_v31  ;;  %v2044_v2 = vsel %vm1118_vm0, %v6257_v15, 0 }
 0x56d   : > { %1806 = vadd.xlane.f32.xlu1 %v6372_v13  ;;  %5447 = vpow2.f32 %v1772_v59 }
 0x56e   : > { %v1780_v43 = vmul.f32 1.442695, %v1751_v52 }
 0x570   : > { %1814 = vadd.xlane.f32.xlu0 %v6377_v17  ;;  %5449 = vpow2.f32 %v1780_v43 }
 0x571   : > { %1802 = vadd.xlane.f32.xlu1 %v6379_v50 }
 0x574   : > { %1810 = vadd.xlane.f32.xlu0 %v6383_v24 }
 0x575   : > { %1808 = vadd.xlane.f32.xlu1 %v6385_v18 }
 0x576   : > { %v6389_v37 = vpop.eup %5445 }
 0x577   : > { %v6391_v16 = vpop.eup %5447 }
 0x578   : > { %1816 = vadd.xlane.f32.xlu0 %v6389_v37 }
 0x579   : > { %1804 = vadd.xlane.f32.xlu1 %v6391_v16 }
 0x57a   : > { %v6395_v32 = vpop.eup %5449 }
 0x57d   : > { %1812 = vadd.xlane.f32.xlu1 %v6395_v32 }
 0x58e   : > { %2015 = vrot.lane.b32.xlu0 %v5987_v1, %s5700_s20  ;;  %2017 = vrot.lane.b32.xlu1 %v5984_v61, %s5700_s20 }
 0x592   : > { %1987 = vrot.lane.b32.xlu0 %v5958_v28, %s5700_s20  ;;  %1989 = vrot.lane.b32.xlu1 %v5955_v25, %s5700_s20 }
 0x596   : > { %1991 = vrot.lane.b32.xlu0 %v5980_v54, %s5700_s20  ;;  %1993 = vrot.lane.b32.xlu1 %v5977_v51, %s5700_s20 }
 0x59a   : > { %1995 = vrot.lane.b32.xlu0 %v5997_v12, %s5700_s20  ;;  %1997 = vrot.lane.b32.xlu1 %v5995_v10, %s5700_s20 }
 0x59e   : > { %1999 = vrot.lane.b32.xlu0 %v6012_v30, %s5700_s20  ;;  %2001 = vrot.lane.b32.xlu1 %v6007_v27, %s5700_s20 }
 0x5a2   : > { %2316 = vrot.lane.b32.xlu0 %v6018_v42, %s5700_s20  ;;  %2318 = vrot.lane.b32.xlu1 %v6016_v41, %s5700_s20 }
 0x5a6   : > { %2320 = vrot.lane.b32.xlu0 %v6030_v56, %s5700_s20  ;;  %2322 = vrot.lane.b32.xlu1 %v6027_v55, %s5700_s20 }
 0x5aa   : > { %2324 = vrot.lane.b32.xlu0 %v6042_v7, %s5700_s20  ;;  %2326 = vrot.lane.b32.xlu1 %v6039_v49, %s5700_s20 }
 0x5ae   : > { %2328 = vrot.lane.b32.xlu0 %v6054_v21, %s5700_s20  ;;  %2330 = vrot.lane.b32.xlu1 %v6049_v20, %s5700_s20 }
 0x5b2   : > { %2453 = vrot.lane.b32.xlu0 %v5920_v58, %s5701_s22  ;;  %2455 = vrot.lane.b32.xlu1 %v5918_v57, %s5701_s22 }
 0x5b9   : > { %v1791_v3 = vpop.xlane.xlu1 %1790 }
 0x5bc   : > { %v1789_v38 = vpop.xlane.xlu0 %1788 }
 0x5bd   : > { %5451 = vrcp.f32 %v1789_v38  ;;  %v1787_v63 = vpop.xlane.xlu1 %1786 }
 0x5be   : > { %5453 = vrcp.f32 %v1787_v63 }
 0x5bf   : > { %5455 = vrcp.f32 %v1791_v3 }
 0x5c0   : > { %v2012_v15 = vpop.permute.xlu0 %2011 }
 0x5c1   : > { %v1793_v60 = vpop.xlane.xlu1 %1792  ;;  %v2056_v53 = vsel %vm1118_vm0, %v2012_v15, 0 }
 0x5c2   : > { %5457 = vrcp.f32 %v1793_v60 }
 0x5c7   : > { %v5452_v34 = vpop.eup %5451 }
 0x5c8   : > { %v5454_v39 = vpop.eup %5453  ;;  %v1835_v22 = vmul.f32 %v5452_v34, %v6336_v44  ;;  %v2047_v44 = vsel %vm1118_vm0, %v6331_v47, 0 }
 0x5c9   : > { %v1834_v19 = vmul.f32 %v5454_v39, %v6338_v62  ;;  %v5456_v35 = vpop.eup %5455  ;;  %v2053_v62 = vsel %vm1118_vm0, %v6359_v45, 0 }
 0x5ca   : > { %v1836_v57 = vmul.f32 %v5456_v35, %v6333_v46  ;;  %v2050_v46 = vsel %vm1118_vm0, %v2008_v4, 0 }
 0x5cb   : > { %v1850_v58 = vpack.c.bf16 %v1835_v22, %v1834_v19 }
 0x5cc   : > { %v5458_v29 = vpop.eup %5457 }
 0x5cd   : > { %v1837_v48 = vmul.f32 %v5458_v29, %v6342_v0  ;;  %4943 = vmatprep.mubr.bf16.mxu1 %v1850_v58 }
 0x5cf   : > { %v1851_v59 = vpack.c.bf16 %v1837_v48, %v1836_v57 }
 0x5d1   : > { %4944 = vmatmul.mubr.bf16.vlgmr.msra.gmra.mrb[32].mxu1 %v1851_v59 }
 0x5d2   : > { %4960 = vmatpush3.bf16.xpose.msra.mxu1 %v2044_v2 }
 0x5d3   : > { %5136 = vmatprep.subr.msk.bf16.mxu1 %vm1118_vm0, %v6331_v47  ;;  %v2014_v47 = vpop.permute.xlu1 %2013 }
 0x5d4   : > { %v2059_v3 = vsel %vm1118_vm0, %v2014_v47, 0 }
 0x5da   : > { %4962 = vmatpush3.bf16.xpose.msra.mxu1 %v2047_v44 }
 0x5db   : > { %5137 = vmatprep.subr.msk.bf16.mxu1 %vm1118_vm0, %v2008_v4 }
 0x5e2   : > { %4964 = vmatpush3.bf16.xpose.msra.mxu1 %v2050_v46 }
 0x5e3   : > { %5138 = vmatprep.subr.msk.bf16.mxu1 %vm1118_vm0, %v6359_v45 }
 0x5ea   : > { %4966 = vmatpush3.bf16.xpose.msra.mxu1 %v2053_v62 }
 0x5eb   : > { %5139 = vmatprep.subr.msk.bf16.mxu1 %vm1118_vm0, %v2012_v15 }
 0x5f1   : > { %v1799_v0 = vpop.xlane.xlu0 %1798 }
 0x5f2   : > { %4968 = vmatpush3.bf16.xpose.msra.mxu1 %v2056_v53 }
 0x5f3   : > { %5140 = vmatprep.subr.msk.bf16.mxu1 %vm1118_vm0, %v2014_v47 }
 0x5f5   : > { %v1795_v52 = vpop.xlane.xlu0 %1794 }
 0x5f6   : > { %5459 = vrcp.f32 %v1795_v52  ;;  %v1797_v43 = vpop.xlane.xlu1 %1796 }
 0x5f7   : > { %5461 = vrcp.f32 %v1797_v43 }
 0x5f8   : > { %5463 = vrcp.f32 %v1799_v0 }
 0x5f9   : > { %v1801_v4 = vpop.xlane.xlu0 %1800 }
 0x5fa   : > { %5465 = vrcp.f32 %v1801_v4  ;;  %4970 = vmatpush3.bf16.xpose.msra.mxu1 %v2059_v3  ;;  %v1807_v45 = vpop.xlane.xlu1 %1806 }
 0x5fd   : > { %v1815_v38 = vpop.xlane.xlu0 %1814 }
 0x5fe   : > { %v1803_v63 = vpop.xlane.xlu1 %1802 }
 0x600   : > { %v5460_v60 = vpop.eup %5459 }
 0x601   : > { %v5462_v34 = vpop.eup %5461  ;;  %v1811_v39 = vpop.xlane.xlu0 %1810  ;;  %v1838_v22 = vmul.f32 %v5460_v60, %v6363_v5 }
 0x602   : > { %v5464_v19 = vpop.eup %5463  ;;  %v1809_v35 = vpop.xlane.xlu1 %1808  ;;  %v1839_v58 = vmul.f32 %v5462_v34, %v6365_v40 }
 0x603   : > { %5467 = vrcp.f32 %v1809_v35  ;;  %v1840_v59 = vmul.f32 %v5464_v19, %v6357_v26 }
 0x604   : > { %v5466_v29 = vpop.eup %5465  ;;  %v1852_v57 = vpack.c.bf16 %v1839_v58, %v1838_v22  ;;  %5469 = vrcp.f32 %v1803_v63 }
 0x605   : > { %v1817_v48 = vpop.xlane.xlu0 %1816  ;;  %v1841_v2 = vmul.f32 %v5466_v29, %v6370_v31  ;;  %5471 = vrcp.f32 %v1807_v45 }
 0x606   : > { %4947 = vmatprep.mubr.bf16.mxu1 %v1852_v57  ;;  %v1805_v44 = vpop.xlane.xlu1 %1804 }
 0x607   : > { %5473 = vrcp.f32 %v1805_v44  ;;  %v1853_v46 = vpack.c.bf16 %v1841_v2, %v1840_v59 }
 0x608   : > { %5475 = vrcp.f32 %v1811_v39 }
 0x609   : > { %v2016_v5 = vpop.permute.xlu0 %2015  ;;  %4948 = vmatmul.mubr.bf16.gmra.mrb[36].mxu1 %v1853_v46 }
 0x60a   : > { %5141 = vmatprep.subr.msk.bf16.mxu1 %vm1118_vm0, %v2016_v5  ;;  %v1813_v40 = vpop.xlane.xlu1 %1812  ;;  %v2062_v62 = vsel %vm1118_vm0, %v2016_v5, 0 }
 0x60b   : > { %5477 = vrcp.f32 %v1813_v40  ;;  %4972 = vmatpush3.bf16.xpose.msra.mxu1 %v2062_v62 }
 0x60c   : > { %5479 = vrcp.f32 %v1817_v48 }
 0x60d   : > { %v1988_v15 = vpop.permute.xlu0 %1987  ;;  %v5468_v26 = vpop.eup %5467  ;;  %5481 = vrcp.f32 %v1815_v38 }
 0x60e   : > { %v2018_v31 = vpop.permute.xlu1 %2017  ;;  %v5470_v0 = vpop.eup %5469  ;;  %v1845_v43 = vmul.f32 %v5468_v26, %v6385_v18 }
 0x60f   : > { %5142 = vmatprep.subr.msk.bf16.mxu1 %vm1118_vm0, %v2018_v31  ;;  %v5472_v53 = vpop.eup %5471  ;;  %v2065_v3 = vsel %vm1118_vm0, %v2018_v31, 0  ;;  %v1842_v45 = vmul.f32 %v5470_v0, %v6379_v50 }
 0x610   : > { %v1844_v38 = vmul.f32 %v5472_v53, %v6372_v13 }
 0x611   : > { %v5474_v47 = vpop.eup %5473  ;;  %v1992_v52 = vpop.permute.xlu0 %1991 }
 0x612   : > { %v1990_v4 = vpop.permute.xlu1 %1989  ;;  %v1843_v63 = vmul.f32 %v5474_v47, %v6391_v16  ;;  %v5476_v60 = vpop.eup %5475  ;;  %v1855_v19 = vpack.c.bf16 %v1845_v43, %v1844_v38 }
 0x613   : > { %4974 = vmatpush3.bf16.xpose.msra.mxu1 %v2065_v3  ;;  %v1846_v18 = vmul.f32 %v5476_v60, %v6383_v24 }
 0x614   : > { %v1854_v34 = vpack.c.bf16 %v1843_v63, %v1842_v45 }
 0x615   : > { %v5478_v39 = vpop.eup %5477  ;;  %v1996_v22 = vpop.permute.xlu0 %1995 }
 0x616   : > { %v5480_v35 = vpop.eup %5479  ;;  %4951 = vmatprep.mubr.bf16.mxu1 %v1854_v34  ;;  %v1994_v58 = vpop.permute.xlu1 %1993  ;;  %v1847_v29 = vmul.f32 %v5478_v39, %v6395_v32 }
 0x617   : > { %4952 = vmatmul.mubr.bf16.gmra.mrb[40].mxu1 %v1855_v19  ;;  %v5482_v57 = vpop.eup %5481  ;;  %v1849_v16 = vmul.f32 %v5480_v35, %v6389_v37 }
 0x618   : > { %v1856_v50 = vpack.c.bf16 %v1847_v29, %v1846_v18  ;;  %v1848_v13 = vmul.f32 %v5482_v57, %v6377_v17 }
 0x619   : > { %v2000_v48 = vpop.permute.xlu0 %1999 }
 0x61a   : > { %4955 = vmatprep.mubr.bf16.mxu1 %v1856_v50  ;;  %v1998_v59 = vpop.permute.xlu1 %1997  ;;  %v1857_v44 = vpack.c.bf16 %v1849_v16, %v1848_v13 }
 0x61d   : > { %v2317_v2 = vpop.permute.xlu0 %2316 }
 0x61e   : > { %4991 = vmatprep.subr.bf16.mxu0 %v2317_v2  ;;  %v2002_v46 = vpop.permute.xlu1 %2001 }
 0x61f   : > { %4956 = vmatmul.mubr.bf16.gmra.mrb[44].mxu1 %v1857_v44  ;;  %4992 = vmatpush3.bf16.msra.mxu0 %v2317_v2 }
 0x620   : > { %4975 = vmatprep.mubr.msk.bf16.mxu1 %vm1118_vm0, %v1988_v15 }
 0x621   : > { %v2321_v32 = vpop.permute.xlu0 %2320 }
 0x622   : > { %v2319_v24 = vpop.permute.xlu1 %2318 }
 0x623   : > { %4993 = vmatprep.subr.bf16.mxu0 %v2319_v24 }
 0x624   : > { %4994 = vmatpush3.bf16.msra.mxu0 %v2319_v24 }
 0x625   : > { %4995 = vmatprep.subr.bf16.mxu0 %v2321_v32  ;;  %v2325_v17 = vpop.permute.xlu0 %2324 }
 0x626   : > { %v2323_v37 = vpop.permute.xlu1 %2322 }
 0x627   : > { %4976 = vmatmul.mubr.msk.bf16.vlgmr.msra.gmra.mrb[48].mxu1 %vm1118_vm0, %v1990_v4 }
 0x628   : > { %4979 = vmatprep.mubr.msk.bf16.mxu1 %vm1118_vm0, %v1992_v52  ;;  %4996 = vmatpush3.bf16.msra.mxu0 %v2321_v32 }
 0x629   : > { %4997 = vmatprep.subr.bf16.mxu0 %v2323_v37  ;;  %v2329_v40 = vpop.permute.xlu0 %2328 }
 0x62a   : > { %v2327_v5 = vpop.permute.xlu1 %2326 }
 0x62c   : > { %4998 = vmatpush3.bf16.msra.mxu0 %v2323_v37 }
 0x62d   : > { %4999 = vmatprep.subr.bf16.mxu0 %v2325_v17  ;;  %v6481_v15 = vpop.permute.xlu0 %2453 }
 0x62e   : > { %v2331_v62 = vpop.permute.xlu1 %2330 }
 0x62f   : > { %4980 = vmatmul.mubr.msk.bf16.gmra.mrb[52].mxu1 %vm1118_vm0, %v1994_v58 }
 0x630   : > { %4983 = vmatprep.mubr.msk.bf16.mxu1 %vm1118_vm0, %v1996_v22  ;;  %5000 = vmatpush3.bf16.msra.mxu0 %v2325_v17 }
 0x631   : > { %5001 = vmatprep.subr.bf16.mxu0 %v2327_v5 }
 0x632   : > { %v6571_v22 = vpop.permute.xlu1 %2455 }
 0x634   : > { %5002 = vmatpush3.bf16.msra.mxu0 %v2327_v5 }
 0x635   : > { %5003 = vmatprep.subr.bf16.mxu0 %v2329_v40 }
 0x637   : > { %4984 = vmatmul.mubr.msk.bf16.gmra.mrb[56].mxu1 %vm1118_vm0, %v1998_v59 }
 0x638   : > { %4987 = vmatprep.mubr.msk.bf16.mxu1 %vm1118_vm0, %v2000_v48  ;;  %5004 = vmatpush3.bf16.msra.mxu0 %v2329_v40 }
 0x639   : > { %5005 = vmatprep.subr.bf16.mxu0 %v2331_v62 }
 0x63c   : > { %5006 = vmatpush3.bf16.msra.mxu0 %v2331_v62 }
 0x63d   : > { %5143 = vmatprep.subr.msk.bf16.mxu0 %vm1118_vm0, %v6481_v15 }
 0x63f   : > { %4988 = vmatmul.mubr.msk.bf16.gmra.mrb[60].mxu1 %vm1118_vm0, %v2002_v46 }
 0x6a4   : > { %v6486_v26 = vpop.f32.mrb[32].mxu1 }
 0x6a5   : > { %v6488_v31 = vpop.f32.mrb[33].mxu1 }
 0x6a6   : > { %v6490_v0 = vpop.f32.mrb[34].mxu1 }
 0x6a7   : > { %v6494_v47 = vpop.f32.mrb[35].mxu1 }
 0x6dc   : > { %v6498_v43 = vpop.f32.mrb[36].mxu1 }
 0x6dd   : > { %v6500_v4 = vpop.f32.mrb[37].mxu1 }
 0x6de   : > { %v6502_v3 = vpop.f32.mrb[38].mxu1 }
 0x6df   : > { %v6506_v63 = vpop.f32.mrb[39].mxu1 }
 0x6ea   : > { %v6510_v38 = vpop.f32.mrb[40].mxu1 }
 0x6eb   : > { %v6512_v34 = vpop.f32.mrb[41].mxu1 }
 0x6ec   : > { %7731 = vst [vmem:[#allocation18_spill] sm:$0xff] %v6512_v34  ;;  %v6514_v39 = vpop.f32.mrb[42].mxu1 }
 0x6ed   : > { %v6518_v19 = vpop.f32.mrb[43].mxu1 }
 0x6ee   : > { %7732 = vst [vmem:[#allocation19_spill] sm:$0xff] %v6518_v19 }
 0x6f2   : > { %v6522_v58 = vpop.f32.mrb[44].mxu1 }
 0x6f3   : > { %7733 = vst [vmem:[#allocation20_spill] sm:$0xff] %v6522_v58  ;;  %v6524_v18 = vpop.f32.mrb[45].mxu1 }
 0x6f4   : > { %7734 = vst [vmem:[#allocation21_spill] sm:$0xff] %v6524_v18  ;;  %v6526_v29 = vpop.f32.mrb[46].mxu1 }
 0x6f5   : > { %7735 = vst [vmem:[#allocation22_spill] sm:$0xff] %v6526_v29  ;;  %v6530_v50 = vpop.f32.mrb[47].mxu1 }
 0x6f6   : > { %7736 = vst [vmem:[#allocation23_spill] sm:$0xff] %v6530_v50 }
 0x6fa   : > { %v4977_v16 = vpop.f32.mrb[48].mxu1 }
 0x6fb   : > { %2168 = vmax.xlane.f32.xlu0 %v4977_v16  ;;  %v2101_v59 = vpop.f32.mrb[49].mxu1 }
 0x6fc   : > { %v4978_v13 = vpop.f32.mrb[50].mxu1 }
 0x6fd   : > { %v2104_v2 = vpop.f32.mrb[51].mxu1 }
 0x6fe   : > { %2166 = vmax.xlane.f32.xlu1 %v2104_v2 }
 0x6ff   : > { %2164 = vmax.xlane.f32.xlu0 %v2101_v59 }
 0x702   : > { %v4981_v44 = vpop.f32.mrb[52].mxu1 }
 0x703   : > { %2170 = vmax.xlane.f32.xlu0 %v4978_v13  ;;  %v6534_v46 = vpop.f32.mrb[53].mxu1 }
 0x704   : > { %v6536_v24 = vpop.f32.mrb[54].mxu1 }
 0x705   : > { %2178 = vmax.xlane.f32.xlu1 %v6536_v24  ;;  %v6539_v32 = vpop.f32.mrb[55].mxu1 }
 0x707   : > { %2176 = vmax.xlane.f32.xlu0 %v4981_v44 }
 0x709   : > { %2174 = vmax.xlane.f32.xlu1 %v6539_v32 }
 0x70a   : > { %v6542_v37 = vpop.f32.mrb[56].mxu1 }
 0x70b   : > { %2172 = vmax.xlane.f32.xlu0 %v6534_v46  ;;  %v6545_v17 = vpop.f32.mrb[57].mxu1 }
 0x70c   : > { %v6547_v5 = vpop.f32.mrb[58].mxu1 }
 0x70d   : > { %2186 = vmax.xlane.f32.xlu1 %v6547_v5  ;;  %v6550_v40 = vpop.f32.mrb[59].mxu1 }
 0x70f   : > { %2184 = vmax.xlane.f32.xlu0 %v6542_v37 }
 0x711   : > { %2182 = vmax.xlane.f32.xlu1 %v6550_v40 }
 0x712   : > { %v6554_v62 = vpop.f32.mrb[60].mxu1 }
 0x713   : > { %2180 = vmax.xlane.f32.xlu0 %v6545_v17  ;;  %v6557_v48 = vpop.f32.mrb[61].mxu1 }
 0x714   : > { %v6559_v57 = vpop.f32.mrb[62].mxu1 }
 0x715   : > { %v6561_v35 = vpop.f32.mrb[63].mxu1 }
 0x717   : > { %2192 = vmax.xlane.f32.xlu0 %v6554_v62 }
 0x71b   : > { %2188 = vmax.xlane.f32.xlu0 %v6557_v48 }
 0x722   : > { %2459 = vrot.lane.b32.xlu1 %v5942_v8, %s5701_s22 }
 0x731   : > { %2457 = vrot.lane.b32.xlu0 %v5945_v11, %s5701_s22 }
 0x746   : > { %2194 = vmax.xlane.f32.xlu1 %v6559_v57 }
 0x74a   : > { %2190 = vmax.xlane.f32.xlu1 %v6561_v35 }
 0x788   : > { %v2169_v60 = vpop.xlane.xlu0 %2168 }
 0x789   : > { %v2198_v45 = vsub.f32 %v4977_v16, %v2169_v60 }
 0x78b   : > { %v2216_v52 = vmul.f32 1.442695, %v2198_v45  ;;  %v2167_v53 = vpop.xlane.xlu1 %2166 }
 0x78c   : > { %v2197_v9 = vsub.f32 %v2104_v2, %v2167_v53  ;;  %v2165_v14 = vpop.xlane.xlu0 %2164 }
 0x78d   : > { %5483 = vpow2.f32 %v2216_v52  ;;  %v2196_v6 = vsub.f32 %v2101_v59, %v2165_v14 }
 0x78e   : > { %v2214_v23 = vmul.f32 1.442695, %v2197_v9 }
 0x78f   : > { %v2212_v18 = vmul.f32 1.442695, %v2196_v6 }
 0x790   : > { %5485 = vpow2.f32 %v2214_v23  ;;  %v2171_v8 = vpop.xlane.xlu0 %2170 }
 0x791   : > { %5487 = vpow2.f32 %v2212_v18  ;;  %v2199_v11 = vsub.f32 %v4978_v13, %v2171_v8 }
 0x792   : > { %v2179_v23 = vpop.xlane.xlu1 %2178 }
 0x793   : > { %v2218_v50 = vmul.f32 1.442695, %v2199_v11  ;;  %v2203_v8 = vsub.f32 %v6536_v24, %v2179_v23 }
 0x794   : > { %v2177_v6 = vpop.xlane.xlu0 %2176 }
 0x795   : > { %5489 = vpow2.f32 %v2218_v50  ;;  %v2202_v52 = vsub.f32 %v4981_v44, %v2177_v6  ;;  %v2226_v34 = vmul.f32 1.442695, %v2203_v8 }
 0x796   : > { %v2175_v60 = vpop.xlane.xlu1 %2174 }
 0x797   : > { %v6573_v58 = vpop.eup %5483  ;;  %v2224_v50 = vmul.f32 1.442695, %v2202_v52  ;;  %v2201_v59 = vsub.f32 %v6539_v32, %v2175_v60 }
 0x798   : > { %2248 = vadd.xlane.f32.xlu1 %v6573_v58  ;;  %v2173_v14 = vpop.xlane.xlu0 %2172 }
 0x799   : > { %v2200_v16 = vsub.f32 %v6534_v46, %v2173_v14  ;;  %5491 = vpow2.f32 %v2224_v50  ;;  %v2222_v11 = vmul.f32 1.442695, %v2201_v59 }
 0x79a   : > { %v6576_v29 = vpop.eup %5485  ;;  %v2187_v13 = vpop.xlane.xlu1 %2186 }
 0x79b   : > { %v6578_v45 = vpop.eup %5487  ;;  %2246 = vadd.xlane.f32.xlu0 %v6576_v29  ;;  %v2207_v24 = vsub.f32 %v6547_v5, %v2187_v13 }
 0x79c   : > { %2244 = vadd.xlane.f32.xlu1 %v6578_v45  ;;  %v2185_v53 = vpop.xlane.xlu0 %2184 }
 0x79e   : > { %v2183_v19 = vpop.xlane.xlu1 %2182 }
 0x79f   : > { %v6582_v9 = vpop.eup %5489 }
 0x7a0   : > { %2250 = vadd.xlane.f32.xlu1 %v6582_v9  ;;  %v2181_v18 = vpop.xlane.xlu0 %2180 }
 0x7a1   : > { %v2204_v46 = vsub.f32 %v6545_v17, %v2181_v18  ;;  %v2205_v17 = vsub.f32 %v6550_v40, %v2183_v19 }
 0x7a3   : > { %v2228_v23 = vmul.f32 1.442695, %v2204_v46  ;;  %v6597_v60 = vpop.eup %5491  ;;  %v2230_v50 = vmul.f32 1.442695, %v2205_v17  ;;  %v2494_v46 = vsel %vm1118_vm0, %v6481_v15, 0 }
 0x7a4   : > { %v2193_v2 = vpop.xlane.xlu0 %2192 }
 0x7a5   : > { %v2210_v44 = vsub.f32 %v6554_v62, %v2193_v2 }
 0x7a7   : > { %v2240_v32 = vmul.f32 1.442695, %v2210_v44 }
 0x7a8   : > { %v2189_v14 = vpop.xlane.xlu0 %2188 }
 0x7a9   : > { %v2208_v52 = vsub.f32 %v6557_v48, %v2189_v14 }
 0x7ab   : > { %v2236_v62 = vmul.f32 1.442695, %v2208_v52 }
 0x7b1   : > { %2463 = vrot.lane.b32.xlu1 %v5962_v33, %s5701_s22  ;;  %2461 = vrot.lane.b32.xlu0 %v5967_v36, %s5701_s22  ;;  %v2220_v33 = vmul.f32 1.442695, %v2200_v16  ;;  %v2206_v36 = vsub.f32 %v6542_v37, %v2185_v53  ;;  %v6599_v37 = vpop.permute.xlu1 %2459  ;;  %v2234_v53 = vmul.f32 1.442695, %v2207_v24 }
 0x7b3   : > { %5493 = vpow2.f32 %v2220_v33  ;;  %v2232_v6 = vmul.f32 1.442695, %v2206_v36 }
 0x7b4   : > { %5495 = vpow2.f32 %v2222_v11 }
 0x7b5   : > { %5497 = vpow2.f32 %v2226_v34 }
 0x7b6   : > { %5499 = vpow2.f32 %v2232_v6 }
 0x7b7   : > { %5501 = vpow2.f32 %v2240_v32 }
 0x7b8   : > { %5503 = vpow2.f32 %v2228_v23 }
 0x7b9   : > { %5505 = vpow2.f32 %v2236_v62 }
 0x7ba   : > { %5507 = vpow2.f32 %v2234_v53 }
 0x7bd   : > { %v6603_v34 = vpop.eup %5493 }
 0x7be   : > { %v6605_v48 = vpop.eup %5495 }
 0x7bf   : > { %v6610_v59 = vpop.eup %5497 }
 0x7c0   : > { %v6612_v19 = vpop.eup %5499 }
 0x7c1   : > { %v6617_v2 = vpop.eup %5501 }
 0x7c2   : > { %v6619_v8 = vpop.eup %5503 }
 0x7c3   : > { %v6623_v33 = vpop.eup %5505 }
 0x7c4   : > { %v6625_v11 = vpop.eup %5507 }
 0x7d0   : > { %2256 = vadd.xlane.f32.xlu0 %v6597_v60 }
 0x7d3   : > { %v2195_v18 = vpop.xlane.xlu1 %2194 }
 0x7d4   : > { %v2211_v5 = vsub.f32 %v6559_v57, %v2195_v18  ;;  %2252 = vadd.xlane.f32.xlu0 %v6603_v34 }
 0x7d5   : > { %2254 = vadd.xlane.f32.xlu1 %v6605_v48 }
 0x7d6   : > { %v2242_v16 = vmul.f32 1.442695, %v2211_v5 }
 0x7d7   : > { %v2191_v13 = vpop.xlane.xlu1 %2190 }
 0x7d8   : > { %5509 = vpow2.f32 %v2242_v16  ;;  %v2209_v40 = vsub.f32 %v6561_v35, %v2191_v13  ;;  %2258 = vadd.xlane.f32.xlu0 %v6610_v59 }
 0x7d9   : > { %2264 = vadd.xlane.f32.xlu1 %v6612_v19  ;;  %5511 = vpow2.f32 %v2230_v50 }
 0x7da   : > { %v2238_v57 = vmul.f32 1.442695, %v2209_v40 }
 0x7dc   : > { %2272 = vadd.xlane.f32.xlu0 %v6617_v2  ;;  %5513 = vpow2.f32 %v2238_v57 }
 0x7dd   : > { %2260 = vadd.xlane.f32.xlu1 %v6619_v8 }
 0x7e0   : > { %2268 = vadd.xlane.f32.xlu0 %v6623_v33 }
 0x7e1   : > { %2266 = vadd.xlane.f32.xlu1 %v6625_v11 }
 0x7e2   : > { %v6629_v35 = vpop.eup %5509 }
 0x7e3   : > { %v6631_v36 = vpop.eup %5511 }
 0x7e4   : > { %2274 = vadd.xlane.f32.xlu0 %v6629_v35 }
 0x7e5   : > { %2262 = vadd.xlane.f32.xlu1 %v6631_v36 }
 0x7e6   : > { %v6635_v44 = vpop.eup %5513 }
 0x7e9   : > { %2270 = vadd.xlane.f32.xlu1 %v6635_v44 }
 0x7fa   : > { %2465 = vrot.lane.b32.xlu0 %v5987_v1, %s5701_s22  ;;  %2467 = vrot.lane.b32.xlu1 %v5984_v61, %s5701_s22 }
 0x7fe   : > { %2437 = vrot.lane.b32.xlu0 %v5958_v28, %s5701_s22  ;;  %2439 = vrot.lane.b32.xlu1 %v5955_v25, %s5701_s22  ;;  %v2458_v25 = vpop.permute.xlu0 %2457 }
 0x802   : > { %2441 = vrot.lane.b32.xlu0 %v5980_v54, %s5701_s22  ;;  %2443 = vrot.lane.b32.xlu1 %v5977_v51, %s5701_s22 }
 0x806   : > { %2445 = vrot.lane.b32.xlu0 %v5997_v12, %s5701_s22  ;;  %2447 = vrot.lane.b32.xlu1 %v5995_v10, %s5701_s22 }
 0x80a   : > { %2449 = vrot.lane.b32.xlu0 %v6012_v30, %s5701_s22  ;;  %2451 = vrot.lane.b32.xlu1 %v6007_v27, %s5701_s22 }
 0x80e   : > { %2766 = vrot.lane.b32.xlu0 %v6018_v42, %s5701_s22  ;;  %2768 = vrot.lane.b32.xlu1 %v6016_v41, %s5701_s22 }
 0x812   : > { %2770 = vrot.lane.b32.xlu0 %v6030_v56, %s5701_s22 }
 0x816   : > { %2772 = vrot.lane.b32.xlu0 %v6027_v55, %s5701_s22 }
 0x825   : > { %v2249_v28 = vpop.xlane.xlu1 %2248 }
 0x828   : > { %v2247_v51 = vpop.xlane.xlu0 %2246 }
 0x829   : > { %5515 = vrcp.f32 %v2247_v51  ;;  %v2245_v54 = vpop.xlane.xlu1 %2244 }
 0x82a   : > { %5517 = vrcp.f32 %v2245_v54 }
 0x82b   : > { %5519 = vrcp.f32 %v2249_v28 }
 0x82c   : > { %v2462_v15 = vpop.permute.xlu0 %2461 }
 0x82d   : > { %v2251_v61 = vpop.xlane.xlu1 %2250  ;;  %v2506_v14 = vsel %vm1118_vm0, %v2462_v15, 0 }
 0x82e   : > { %5521 = vrcp.f32 %v2251_v61 }
 0x833   : > { %v5516_v1 = vpop.eup %5515 }
 0x834   : > { %v5518_v10 = vpop.eup %5517  ;;  %v2293_v12 = vmul.f32 %v5516_v1, %v6576_v29  ;;  %v2497_v29 = vsel %vm1118_vm0, %v6571_v22, 0 }
 0x835   : > { %v2292_v27 = vmul.f32 %v5518_v10, %v6578_v45  ;;  %v5520_v30 = vpop.eup %5519  ;;  %v2503_v45 = vsel %vm1118_vm0, %v6599_v37, 0 }
 0x836   : > { %v2294_v55 = vmul.f32 %v5520_v30, %v6573_v58  ;;  %v2500_v58 = vsel %vm1118_vm0, %v2458_v25, 0 }
 0x837   : > { %v2308_v41 = vpack.c.bf16 %v2293_v12, %v2292_v27 }
 0x838   : > { %v5522_v42 = vpop.eup %5521 }
 0x839   : > { %v2295_v56 = vmul.f32 %v5522_v42, %v6582_v9  ;;  %5007 = vmatprep.mubr.bf16.mxu0 %v2308_v41 }
 0x83b   : > { %v2309_v6 = vpack.c.bf16 %v2295_v56, %v2294_v55 }
 0x83d   : > { %5008 = vmatmul.mubr.bf16.vlgmr.msra.gmra.mrb[64].mxu0 %v2309_v6 }
 0x83e   : > { %5024 = vmatpush3.bf16.xpose.msra.mxu0 %v2494_v46 }
 0x83f   : > { %5144 = vmatprep.subr.msk.bf16.mxu0 %vm1118_vm0, %v6571_v22  ;;  %v2464_v22 = vpop.permute.xlu1 %2463 }
 0x840   : > { %v2509_v23 = vsel %vm1118_vm0, %v2464_v22, 0 }
 0x846   : > { %5026 = vmatpush3.bf16.xpose.msra.mxu0 %v2497_v29 }
 0x847   : > { %5145 = vmatprep.subr.msk.bf16.mxu0 %vm1118_vm0, %v2458_v25 }
 0x84e   : > { %5028 = vmatpush3.bf16.xpose.msra.mxu0 %v2500_v58 }
 0x84f   : > { %5146 = vmatprep.subr.msk.bf16.mxu0 %vm1118_vm0, %v6599_v37 }
 0x856   : > { %5030 = vmatpush3.bf16.xpose.msra.mxu0 %v2503_v45 }
 0x857   : > { %5147 = vmatprep.subr.msk.bf16.mxu0 %vm1118_vm0, %v2462_v15 }
 0x85d   : > { %v2257_v9 = vpop.xlane.xlu0 %2256 }
 0x85e   : > { %5032 = vmatpush3.bf16.xpose.msra.mxu0 %v2506_v14 }
 0x85f   : > { %5148 = vmatprep.subr.msk.bf16.mxu0 %vm1118_vm0, %v2464_v22 }
 0x861   : > { %v2253_v32 = vpop.xlane.xlu0 %2252 }
 0x862   : > { %5523 = vrcp.f32 %v2253_v32  ;;  %v2255_v52 = vpop.xlane.xlu1 %2254 }
 0x863   : > { %5525 = vrcp.f32 %v2255_v52 }
 0x864   : > { %5527 = vrcp.f32 %v2257_v9 }
 0x865   : > { %v2259_v24 = vpop.xlane.xlu0 %2258 }
 0x866   : > { %5529 = vrcp.f32 %v2259_v24  ;;  %5034 = vmatpush3.bf16.xpose.msra.mxu0 %v2509_v23  ;;  %v2265_v37 = vpop.xlane.xlu1 %2264 }
 0x869   : > { %v2273_v62 = vpop.xlane.xlu0 %2272 }
 0x86a   : > { %v2261_v53 = vpop.xlane.xlu1 %2260 }
 0x86c   : > { %v5524_v17 = vpop.eup %5523 }
 0x86d   : > { %v5526_v18 = vpop.eup %5525  ;;  %v2269_v5 = vpop.xlane.xlu0 %2268  ;;  %v2296_v50 = vmul.f32 %v5524_v17, %v6603_v34 }
 0x86e   : > { %v5528_v16 = vpop.eup %5527  ;;  %v2267_v13 = vpop.xlane.xlu1 %2266  ;;  %v2297_v40 = vmul.f32 %v5526_v18, %v6605_v48 }
 0x86f   : > { %5531 = vrcp.f32 %v2267_v13  ;;  %v2298_v51 = vmul.f32 %v5528_v16, %v6597_v60 }
 0x870   : > { %v5530_v57 = vpop.eup %5529  ;;  %v2310_v25 = vpack.c.bf16 %v2297_v40, %v2296_v50  ;;  %5533 = vrcp.f32 %v2261_v53 }
 0x871   : > { %v2275_v28 = vpop.xlane.xlu0 %2274  ;;  %v2299_v54 = vmul.f32 %v5530_v57, %v6610_v59  ;;  %5535 = vrcp.f32 %v2265_v37 }
 0x872   : > { %5011 = vmatprep.mubr.bf16.mxu0 %v2310_v25  ;;  %v2263_v61 = vpop.xlane.xlu1 %2262 }
 0x873   : > { %5537 = vrcp.f32 %v2263_v61  ;;  %v2311_v1 = vpack.c.bf16 %v2299_v54, %v2298_v51 }
 0x874   : > { %5539 = vrcp.f32 %v2269_v5 }
 0x875   : > { %v2466_v34 = vpop.permute.xlu0 %2465  ;;  %5012 = vmatmul.mubr.bf16.gmra.mrb[68].mxu0 %v2311_v1 }
 0x876   : > { %5149 = vmatprep.subr.msk.bf16.mxu0 %vm1118_vm0, %v2466_v34  ;;  %v2271_v48 = vpop.xlane.xlu1 %2270  ;;  %v2512_v10 = vsel %vm1118_vm0, %v2466_v34, 0 }
 0x877   : > { %5541 = vrcp.f32 %v2271_v48  ;;  %5036 = vmatpush3.bf16.xpose.msra.mxu0 %v2512_v10 }
 0x878   : > { %5543 = vrcp.f32 %v2275_v28 }
 0x879   : > { %v2438_v12 = vpop.permute.xlu0 %2437  ;;  %v5532_v60 = vpop.eup %5531  ;;  %5545 = vrcp.f32 %v2273_v62 }
 0x87a   : > { %v2468_v59 = vpop.permute.xlu1 %2467  ;;  %v5534_v27 = vpop.eup %5533  ;;  %v2303_v55 = vmul.f32 %v5532_v60, %v6625_v11 }
 0x87b   : > { %5150 = vmatprep.subr.msk.bf16.mxu0 %vm1118_vm0, %v2468_v59  ;;  %v5536_v30 = vpop.eup %5535  ;;  %v2515_v6 = vsel %vm1118_vm0, %v2468_v59, 0  ;;  %v2300_v46 = vmul.f32 %v5534_v27, %v6619_v8 }
 0x87c   : > { %v2302_v45 = vmul.f32 %v5536_v30, %v6612_v19 }
 0x87d   : > { %v5538_v41 = vpop.eup %5537  ;;  %v2442_v42 = vpop.permute.xlu0 %2441 }
 0x87e   : > { %v2440_v56 = vpop.permute.xlu1 %2439  ;;  %v2301_v29 = vmul.f32 %v5538_v41, %v6631_v36  ;;  %v5540_v58 = vpop.eup %5539  ;;  %v2313_v22 = vpack.c.bf16 %v2303_v55, %v2302_v45 }
 0x87f   : > { %5038 = vmatpush3.bf16.xpose.msra.mxu0 %v2515_v6  ;;  %v2304_v11 = vmul.f32 %v5540_v58, %v6623_v33 }
 0x880   : > { %v2312_v15 = vpack.c.bf16 %v2301_v29, %v2300_v46 }
 0x881   : > { %v5542_v9 = vpop.eup %5541  ;;  %v2446_v14 = vpop.permute.xlu0 %2445 }
 0x882   : > { %v5544_v32 = vpop.eup %5543  ;;  %5015 = vmatprep.mubr.bf16.mxu0 %v2312_v15  ;;  %v2444_v52 = vpop.permute.xlu1 %2443  ;;  %v2305_v24 = vmul.f32 %v5542_v9, %v6635_v44 }
 0x883   : > { %5016 = vmatmul.mubr.bf16.gmra.mrb[72].mxu0 %v2313_v22  ;;  %v5546_v23 = vpop.eup %5545  ;;  %v2307_v36 = vmul.f32 %v5544_v32, %v6629_v35 }
 0x884   : > { %v2314_v8 = vpack.c.bf16 %v2305_v24, %v2304_v11  ;;  %v2306_v19 = vmul.f32 %v5546_v23, %v6617_v2 }
 0x885   : > { %v2450_v37 = vpop.permute.xlu0 %2449 }
 0x886   : > { %5019 = vmatprep.mubr.bf16.mxu0 %v2314_v8  ;;  %v2448_v62 = vpop.permute.xlu1 %2447  ;;  %v2315_v17 = vpack.c.bf16 %v2307_v36, %v2306_v19 }
 0x889   : > { %v2767_v53 = vpop.permute.xlu0 %2766 }
 0x88a   : > { %5055 = vmatprep.subr.bf16.mxu1 %v2767_v53  ;;  %v2452_v18 = vpop.permute.xlu1 %2451 }
 0x88b   : > { %5020 = vmatmul.mubr.bf16.gmra.mrb[76].mxu0 %v2315_v17  ;;  %5056 = vmatpush3.bf16.msra.mxu1 %v2767_v53 }
 0x88c   : > { %5039 = vmatprep.mubr.msk.bf16.mxu0 %vm1118_vm0, %v2438_v12 }
 0x88d   : > { %v2771_v33 = vpop.permute.xlu0 %2770 }
 0x88e   : > { %v2769_v44 = vpop.permute.xlu1 %2768 }
 0x88f   : > { %5057 = vmatprep.subr.bf16.mxu1 %v2769_v44 }
 0x890   : > { %5058 = vmatpush3.bf16.msra.mxu1 %v2769_v44 }
 0x891   : > { %5059 = vmatprep.subr.bf16.mxu1 %v2771_v33  ;;  %v2773_v35 = vpop.permute.xlu0 %2772 }
 0x893   : > { %5040 = vmatmul.mubr.msk.bf16.vlgmr.msra.gmra.mrb[80].mxu0 %vm1118_vm0, %v2440_v56 }
 0x894   : > { %5043 = vmatprep.mubr.msk.bf16.mxu0 %vm1118_vm0, %v2442_v42  ;;  %5060 = vmatpush3.bf16.msra.mxu1 %v2771_v33 }
 0x895   : > { %5061 = vmatprep.subr.bf16.mxu1 %v2773_v35 }
 0x898   : > { %5062 = vmatpush3.bf16.msra.mxu1 %v2773_v35 }
 0x89b   : > { %5044 = vmatmul.mubr.msk.bf16.gmra.mrb[84].mxu0 %vm1118_vm0, %v2444_v52 }
 0x89c   : > { %5047 = vmatprep.mubr.msk.bf16.mxu0 %vm1118_vm0, %v2446_v14 }
 0x8a3   : > { %5048 = vmatmul.mubr.msk.bf16.gmra.mrb[88].mxu0 %vm1118_vm0, %v2448_v62 }
 0x8a4   : > { %5051 = vmatprep.mubr.msk.bf16.mxu0 %vm1118_vm0, %v2450_v37 }
 0x8ab   : > { %5052 = vmatmul.mubr.msk.bf16.gmra.mrb[92].mxu0 %vm1118_vm0, %v2452_v18 }
 0x910   : > { %v6710_v2 = vpop.f32.mrb[64].mxu0 }
 0x911   : > { %v6712_v5 = vpop.f32.mrb[65].mxu0 }
 0x912   : > { %v6714_v50 = vpop.f32.mrb[66].mxu0 }
 0x913   : > { %v5178_v16 = vpack.i.bf16 %v6714_v50, %v6710_v2  ;;  %v6718_v13 = vpop.f32.mrb[67].mxu0 }
 0x914   : > { %v5173_v40 = vpack.i.bf16 %v6718_v13, %v6712_v5 }
 0x948   : > { %v6722_v57 = vpop.f32.mrb[68].mxu0 }
 0x949   : > { %v6724_v25 = vpop.f32.mrb[69].mxu0 }
 0x94a   : > { %v6726_v28 = vpop.f32.mrb[70].mxu0 }
 0x94b   : > { %v6730_v54 = vpop.f32.mrb[71].mxu0 }
 0x956   : > { %v6734_v1 = vpop.f32.mrb[72].mxu0 }
 0x957   : > { %v6736_v34 = vpop.f32.mrb[73].mxu0 }
 0x958   : > { %v6738_v48 = vpop.f32.mrb[74].mxu0 }
 0x959   : > { %v6742_v12 = vpop.f32.mrb[75].mxu0 }
 0x95e   : > { %v6746_v59 = vpop.f32.mrb[76].mxu0 }
 0x95f   : > { %v6748_v27 = vpop.f32.mrb[77].mxu0 }
 0x960   : > { %v6750_v30 = vpop.f32.mrb[78].mxu0 }
 0x961   : > { %v6754_v42 = vpop.f32.mrb[79].mxu0 }
 0x966   : > { %v5041_v56 = vpop.f32.mrb[80].mxu0 }
 0x967   : > { %2618 = vmax.xlane.f32.xlu0 %v5041_v56  ;;  %v2551_v6 = vpop.f32.mrb[81].mxu0 }
 0x968   : > { %v5042_v46 = vpop.f32.mrb[82].mxu0 }
 0x969   : > { %v2554_v29 = vpop.f32.mrb[83].mxu0 }
 0x96a   : > { %2616 = vmax.xlane.f32.xlu1 %v2554_v29 }
 0x96b   : > { %2614 = vmax.xlane.f32.xlu0 %v2551_v6 }
 0x96e   : > { %v5045_v58 = vpop.f32.mrb[84].mxu0 }
 0x96f   : > { %2620 = vmax.xlane.f32.xlu0 %v5042_v46  ;;  %v2567_v45 = vpop.f32.mrb[85].mxu0 }
 0x970   : > { %v5046_v15 = vpop.f32.mrb[86].mxu0 }
 0x971   : > { %2628 = vmax.xlane.f32.xlu1 %v5046_v15  ;;  %v2570_v9 = vpop.f32.mrb[87].mxu0 }
 0x973   : > { %2626 = vmax.xlane.f32.xlu0 %v5045_v58 }
 0x975   : > { %2624 = vmax.xlane.f32.xlu1 %v2570_v9 }
 0x976   : > { %v6758_v14 = vpop.f32.mrb[88].mxu0 }
 0x977   : > { %2622 = vmax.xlane.f32.xlu0 %v2567_v45  ;;  %v6760_v22 = vpop.f32.mrb[89].mxu0 }
 0x978   : > { %v6762_v32 = vpop.f32.mrb[90].mxu0 }
 0x979   : > { %2636 = vmax.xlane.f32.xlu1 %v6762_v32  ;;  %v6765_v52 = vpop.f32.mrb[91].mxu0 }
 0x97b   : > { %2634 = vmax.xlane.f32.xlu0 %v6758_v14 }
 0x97d   : > { %2632 = vmax.xlane.f32.xlu1 %v6765_v52 }
 0x97e   : > { %v6769_v11 = vpop.f32.mrb[92].mxu0 }
 0x97f   : > { %2630 = vmax.xlane.f32.xlu0 %v6760_v22  ;;  %v6772_v24 = vpop.f32.mrb[93].mxu0 }
 0x980   : > { %v6774_v23 = vpop.f32.mrb[94].mxu0 }
 0x981   : > { %v6776_v8 = vpop.f32.mrb[95].mxu0 }
 0x983   : > { %2642 = vmax.xlane.f32.xlu0 %v6769_v11 }
 0x987   : > { %2638 = vmax.xlane.f32.xlu0 %v6772_v24 }
 0x98e   : > { %2776 = vrot.lane.b32.xlu1 %v6039_v49, %s5701_s22 }
 0x99d   : > { %2774 = vrot.lane.b32.xlu0 %v6042_v7, %s5701_s22 }
 0x9b2   : > { %2644 = vmax.xlane.f32.xlu1 %v6774_v23 }
 0x9b6   : > { %2640 = vmax.xlane.f32.xlu1 %v6776_v8 }
 0x9f4   : > { %v2619_v37 = vpop.xlane.xlu0 %2618 }
 0x9f5   : > { %v2648_v36 = vsub.f32 %v5041_v56, %v2619_v37 }
 0x9f7   : > { %v2666_v62 = vmul.f32 1.442695, %v2648_v36  ;;  %v2617_v53 = vpop.xlane.xlu1 %2616 }
 0x9f8   : > { %v2615_v19 = vpop.xlane.xlu0 %2614  ;;  %v2647_v33 = vsub.f32 %v2554_v29, %v2617_v53 }
 0x9f9   : > { %5547 = vpow2.f32 %v2666_v62  ;;  %v2646_v17 = vsub.f32 %v2551_v6, %v2615_v19 }
 0x9fa   : > { %v2664_v41 = vmul.f32 1.442695, %v2647_v33 }
 0x9fb   : > { %v2662_v18 = vmul.f32 1.442695, %v2646_v17 }
 0x9fc   : > { %v2621_v44 = vpop.xlane.xlu0 %2620 }
 0x9fd   : > { %5549 = vpow2.f32 %v2662_v18  ;;  %v2649_v35 = vsub.f32 %v5042_v46, %v2621_v44 }
 0x9fe   : > { %v2629_v49 = vpop.xlane.xlu1 %2628 }
 0x9ff   : > { %v2668_v55 = vmul.f32 1.442695, %v2649_v35  ;;  %v2653_v7 = vsub.f32 %v5046_v15, %v2629_v49 }
 0xa00   : > { %v2627_v60 = vpop.xlane.xlu0 %2626 }
 0xa01   : > { %5551 = vpow2.f32 %v2668_v55  ;;  %v2652_v10 = vsub.f32 %v5045_v58, %v2627_v60  ;;  %v2676_v37 = vmul.f32 1.442695, %v2653_v7 }
 0xa02   : > { %v2625_v61 = vpop.xlane.xlu1 %2624  ;;  %5553 = vpow2.f32 %v2664_v41 }
 0xa03   : > { %v6786_v51 = vpop.eup %5547  ;;  %v2674_v56 = vmul.f32 1.442695, %v2652_v10  ;;  %v2651_v6 = vsub.f32 %v2570_v9, %v2625_v61 }
 0xa04   : > { %v2623_v36 = vpop.xlane.xlu0 %2622  ;;  %2698 = vadd.xlane.f32.xlu1 %v6786_v51 }
 0xa05   : > { %5555 = vpow2.f32 %v2674_v56  ;;  %v2650_v29 = vsub.f32 %v2567_v45, %v2623_v36  ;;  %v2672_v60 = vmul.f32 1.442695, %v2651_v6 }
 0xa06   : > { %5557 = vpow2.f32 %v2676_v37  ;;  %v2637_v58 = vpop.xlane.xlu1 %2636 }
 0xa07   : > { %v6789_v46 = vpop.eup %5549  ;;  %v2670_v62 = vmul.f32 1.442695, %v2650_v29  ;;  %v2657_v49 = vsub.f32 %v6762_v32, %v2637_v58 }
 0xa08   : > { %v2635_v15 = vpop.xlane.xlu0 %2634  ;;  %2694 = vadd.xlane.f32.xlu1 %v6789_v46 }
 0xa09   : > { %5559 = vpow2.f32 %v2670_v62  ;;  %v2684_v37 = vmul.f32 1.442695, %v2657_v49  ;;  %v2656_v36 = vsub.f32 %v6758_v14, %v2635_v15 }
 0xa0a   : > { %5561 = vpow2.f32 %v2672_v60  ;;  %v2633_v53 = vpop.xlane.xlu1 %2632 }
 0xa0b   : > { %v6792_v55 = vpop.eup %5551  ;;  %v2655_v7 = vsub.f32 %v6765_v52, %v2633_v53  ;;  %v2682_v62 = vmul.f32 1.442695, %v2656_v36 }
 0xa0c   : > { %v2631_v10 = vpop.xlane.xlu0 %2630  ;;  %2700 = vadd.xlane.f32.xlu1 %v6792_v55  ;;  %v6795_v41 = vpop.eup %5553 }
 0xa0d   : > { %v2654_v35 = vsub.f32 %v6760_v22, %v2631_v10  ;;  %v2680_v6 = vmul.f32 1.442695, %v2655_v7 }
 0xa0e   : > { %v2777_v44 = vpop.permute.xlu1 %2776 }
 0xa0f   : > { %v6797_v61 = vpop.eup %5555  ;;  %v2678_v56 = vmul.f32 1.442695, %v2654_v35 }
 0xa10   : > { %v2643_v45 = vpop.xlane.xlu0 %2642  ;;  %2706 = vadd.xlane.f32.xlu0 %v6797_v61  ;;  %2696 = vadd.xlane.f32.xlu1 %v6795_v41  ;;  %v6801_v9 = vpop.eup %5557 }
 0xa11   : > { %5563 = vpow2.f32 %v2678_v56  ;;  %v2660_v32 = vsub.f32 %v6769_v11, %v2643_v45 }
 0xa12   : > { %5565 = vpow2.f32 %v2684_v37 }
 0xa13   : > { %v6803_v19 = vpop.eup %5559  ;;  %5567 = vpow2.f32 %v2680_v6  ;;  %v2690_v15 = vmul.f32 1.442695, %v2660_v32 }
 0xa14   : > { %v2639_v17 = vpop.xlane.xlu0 %2638  ;;  %2702 = vadd.xlane.f32.xlu1 %v6803_v19  ;;  %2708 = vadd.xlane.f32.xlu0 %v6801_v9  ;;  %v6807_v18 = vpop.eup %5561  ;;  %5569 = vpow2.f32 %v2682_v62 }
 0xa18   : > { %v2775_v33 = vpop.permute.xlu0 %2774  ;;  %2704 = vadd.xlane.f32.xlu0 %v6807_v18 }
 0xa19   : > { %5063 = vmatprep.subr.bf16.mxu1 %v2775_v33 }
 0xa1a   : > { %5064 = vmatpush3.bf16.msra.mxu1 %v2775_v33  ;;  %v7737_v33 = vpack.i.bf16 %v6490_v0, %v6486_v26 }
 0xa1b   : > { %5065 = vmatprep.subr.bf16.mxu1 %v2777_v44  ;;  %v6822_v58 = vpop.eup %5563 }
 0xa1c   : > { %v6825_v53 = vpop.eup %5565 }
 0xa1e   : > { %5066 = vmatpush3.bf16.msra.mxu1 %v2777_v44  ;;  %v7738_v44 = vpack.i.bf16 %v6494_v47, %v6488_v31 }
 0xa25   : > { %2780 = vrot.lane.b32.xlu1 %v6049_v20, %s5701_s22  ;;  %v2658_v20 = vsub.f32 %v6772_v24, %v2639_v17  ;;  %v6827_v24 = vpop.eup %5567 }
 0xa26   : > { %v6831_v11 = vpop.eup %5569 }
 0xa27   : > { %v2686_v52 = vmul.f32 1.442695, %v2658_v20 }
 0xa2e   : > { %2778 = vrot.lane.b32.xlu0 %v6054_v21, %s5701_s22 }
 0xa3f   : > { %v2645_v29 = vpop.xlane.xlu1 %2644 }
 0xa40   : > { %v2661_v21 = vsub.f32 %v6774_v23, %v2645_v29 }
 0xa42   : > { %v2692_v14 = vmul.f32 1.442695, %v2661_v21 }
 0xa43   : > { %v2641_v60 = vpop.xlane.xlu1 %2640 }
 0xa44   : > { %v2659_v22 = vsub.f32 %v6776_v8, %v2641_v60 }
 0xa46   : > { %v2688_v10 = vmul.f32 1.442695, %v2659_v22 }
 0xa48   : > { %5571 = vpow2.f32 %v2688_v10 }
 0xa49   : > { %2710 = vadd.xlane.f32.xlu1 %v6822_v58  ;;  %5573 = vpow2.f32 %v2686_v52 }
 0xa4a   : > { %5575 = vpow2.f32 %v2692_v14 }
 0xa4b   : > { %5577 = vpow2.f32 %v2690_v15 }
 0xa4d   : > { %2716 = vadd.xlane.f32.xlu1 %v6825_v53  ;;  %2712 = vadd.xlane.f32.xlu0 %v6827_v24 }
 0xa51   : > { %2714 = vadd.xlane.f32.xlu0 %v6831_v11 }
 0xa52   : > { %v6834_v23 = vpop.eup %5571 }
 0xa53   : > { %2720 = vadd.xlane.f32.xlu1 %v6834_v23  ;;  %v6837_v8 = vpop.eup %5573 }
 0xa54   : > { %v6840_v45 = vpop.eup %5575 }
 0xa55   : > { %2718 = vadd.xlane.f32.xlu0 %v6837_v8  ;;  %v6843_v17 = vpop.eup %5577 }
 0xa57   : > { %2724 = vadd.xlane.f32.xlu1 %v6840_v45 }
 0xa59   : > { %2722 = vadd.xlane.f32.xlu0 %v6843_v17 }
 0xa68   : > { %5169 = vrot.lane.b32.xlu1 %v7737_v33, %s5701_s22 }
 0xa6c   : > { %5174 = vrot.lane.b32.xlu1 %v5173_v40, %s5700_s20 }
 0xa6f   : > { %5164 = vrot.lane.b32.xlu0 %v7738_v44, %s5701_s22 }
 0xa70   : > { %5179 = vrot.lane.b32.xlu1 %v5178_v16, %s5700_s20 }
 0xa91   : > { %v2699_v35 = vpop.xlane.xlu1 %2698 }
 0xa95   : > { %v2695_v49 = vpop.xlane.xlu1 %2694 }
 0xa96   : > { %5579 = vrcp.f32 %v2695_v49 }
 0xa99   : > { %v2701_v7 = vpop.xlane.xlu1 %2700 }
 0xa9a   : > { %5581 = vrcp.f32 %v2701_v7 }
 0xa9d   : > { %v2707_v26 = vpop.xlane.xlu0 %2706  ;;  %v2697_v0 = vpop.xlane.xlu1 %2696 }
 0xa9e   : > { %5583 = vrcp.f32 %v2697_v0 }
 0xa9f   : > { %5585 = vrcp.f32 %v2699_v35 }
 0xaa0   : > { %v5580_v31 = vpop.eup %5579 }
 0xaa1   : > { %v2709_v5 = vpop.xlane.xlu0 %2708  ;;  %v2703_v13 = vpop.xlane.xlu1 %2702  ;;  %v2742_v50 = vmul.f32 %v5580_v31, %v6789_v46 }
 0xaa2   : > { %5587 = vrcp.f32 %v2703_v13 }
 0xaa4   : > { %v5582_v47 = vpop.eup %5581 }
 0xaa5   : > { %v2705_v40 = vpop.xlane.xlu0 %2704  ;;  %v2781_v36 = vpop.permute.xlu1 %2780  ;;  %v2745_v6 = vmul.f32 %v5582_v47, %v6792_v55 }
 0xaa6   : > { %5589 = vrcp.f32 %v2705_v40 }
 0xaa7   : > { %5591 = vrcp.f32 %v2709_v5 }
 0xaa8   : > { %v5584_v56 = vpop.eup %5583  ;;  %5593 = vrcp.f32 %v2707_v26 }
 0xaa9   : > { %v2779_v2 = vpop.permute.xlu0 %2778  ;;  %v2743_v16 = vmul.f32 %v5584_v56, %v6795_v41  ;;  %v5586_v37 = vpop.eup %5585 }
 0xaaa   : > { %5067 = vmatprep.subr.bf16.mxu1 %v2779_v2  ;;  %v2744_v20 = vmul.f32 %v5586_v37, %v6786_v51 }
 0xaab   : > { %5068 = vmatpush3.bf16.msra.mxu1 %v2779_v2  ;;  %v2758_v29 = vpack.c.bf16 %v2743_v16, %v2742_v50 }
 0xaac   : > { %5069 = vmatprep.subr.bf16.mxu1 %v2781_v36  ;;  %v5588_v62 = vpop.eup %5587  ;;  %v2759_v21 = vpack.c.bf16 %v2745_v6, %v2744_v20  ;;  %v5314_v20 = vld [vmem:[%s7692_s7 + $0x38] sm:$0xff]  }
 0xaad   : > { %5071 = vmatprep.mubr.bf16.mxu1 %v2758_v29  ;;  %v2746_v32 = vmul.f32 %v5588_v62, %v6803_v19  ;;  %v5313_v62 = vld [vmem:[%s7692_s7 + $0x30] sm:$0xff]  }
 0xaaf   : > { %5070 = vmatpush3.bf16.msra.mxu1 %v2781_v36 }
 0xab0   : > { %v5590_v60 = vpop.eup %5589 }
 0xab1   : > { %v5592_v22 = vpop.eup %5591  ;;  %v2747_v46 = vmul.f32 %v5590_v60, %v6807_v18 }
 0xab2   : > { %5072 = vmatmul.mubr.bf16.vlgmr.msra.gmra.mrb[64].mxu1 %v2759_v21  ;;  %v5594_v41 = vpop.eup %5593  ;;  %v2749_v10 = vmul.f32 %v5592_v22, %v6801_v9 }
 0xab3   : > { %v2760_v52 = vpack.c.bf16 %v2747_v46, %v2746_v32  ;;  %v2748_v55 = vmul.f32 %v5594_v41, %v6797_v61 }
 0xab5   : > { %5075 = vmatprep.mubr.bf16.mxu1 %v2760_v52  ;;  %v2761_v14 = vpack.c.bf16 %v2749_v10, %v2748_v55  ;;  %v7739_v10 = vpack.i.bf16 %v6502_v3, %v6498_v43  ;;  %v7742_v43 = vpack.i.bf16 %v6730_v54, %v6724_v25  ;;  %v7744_v3 = vld [vmem:[#allocation19_spill] sm:$0xff]  ;;  %v7748_v25 = vpack.i.bf16 %v6742_v12, %v6736_v34  ;;  %v7753_v12 = vld [vmem:[#allocation21_spill] sm:$0xff] }
 0xab6   : > { %v7752_v34 = vld [vmem:[#allocation23_spill] sm:$0xff] }
 0xaba   : > { %5076 = vmatmul.mubr.bf16.gmra.mrb[68].mxu1 %v2761_v14  ;;  %v7740_v14 = vpack.i.bf16 %v6506_v63, %v6500_v4  ;;  %v7743_v4 = vpack.i.bf16 %v6514_v39, %v6510_v38  ;;  %v7745_v63 = vld [vmem:[#allocation18_spill] sm:$0xff] }
 0xad6   : > { %v2711_v51 = vpop.xlane.xlu1 %2710 }
 0xad7   : > { %5595 = vrcp.f32 %v2711_v51 }
 0xada   : > { %v2713_v15 = vpop.xlane.xlu0 %2712  ;;  %v2717_v33 = vpop.xlane.xlu1 %2716 }
 0xadb   : > { %5597 = vrcp.f32 %v2713_v15 }
 0xadc   : > { %5599 = vrcp.f32 %v2717_v33 }
 0xade   : > { %v2715_v44 = vpop.xlane.xlu0 %2714 }
 0xadf   : > { %5601 = vrcp.f32 %v2715_v44 }
 0xae0   : > { %v2721_v19 = vpop.xlane.xlu1 %2720 }
 0xae1   : > { %5603 = vrcp.f32 %v2721_v19  ;;  %v5596_v35 = vpop.eup %5595  ;;  %v7741_v19 = vpack.i.bf16 %v6726_v28, %v6722_v57  ;;  %v7747_v57 = vpack.i.bf16 %v6738_v48, %v6734_v1  ;;  %v7750_v1 = vld [vmem:[#allocation20_spill] sm:$0xff] }
 0xae2   : > { %v2719_v18 = vpop.xlane.xlu0 %2718  ;;  %v2750_v61 = vmul.f32 %v5596_v35, %v6822_v58 }
 0xae3   : > { %5605 = vrcp.f32 %v2719_v18  ;;  %v7746_v18 = vpack.i.bf16 %v7744_v3, %v7745_v63 }
 0xae4   : > { %v2725_v49 = vpop.xlane.xlu1 %2724 }
 0xae5   : > { %v5598_v9 = vpop.eup %5597  ;;  %5607 = vrcp.f32 %v2725_v49 }
 0xae6   : > { %v2723_v7 = vpop.xlane.xlu0 %2722  ;;  %v2751_v26 = vmul.f32 %v5598_v9, %v6827_v24  ;;  %v5600_v0 = vpop.eup %5599 }
 0xae7   : > { %5609 = vrcp.f32 %v2723_v7  ;;  %v2753_v31 = vmul.f32 %v5600_v0, %v6825_v53  ;;  %v5307_v53 = vld [vmem:[%s7692_s7] sm:$0xff]  }
 0xae8   : > { %v2762_v5 = vpack.c.bf16 %v2751_v26, %v2750_v61  ;;  %5087 = vmatprep.subr.bf16.mxu1 %v5307_v53  ;;  %v7749_v7 = vld [vmem:[#allocation22_spill] sm:$0xff]  ;;  %v7754_v26 = vpack.i.bf16 %v7752_v34, %v7753_v12  ;;  %v7764_v34 = vld [vmem:[#allocation7_spill] sm:$0xff] }
 0xae9   : > { %v5602_v13 = vpop.eup %5601  ;;  %5088 = vmatpush3.bf16.msra.mxu1 %v5307_v53  ;;  %v7751_v48 = vpack.i.bf16 %v7749_v7, %v7750_v1  ;;  %v7757_v53 = vld [vmem:[#allocation5_spill] sm:$0xff] }
 0xaea   : > { %5079 = vmatprep.mubr.bf16.mxu1 %v2762_v5  ;;  %v2752_v40 = vmul.f32 %v5602_v13, %v6831_v11  ;;  %v5308_v11 = vld [vmem:[%s7692_s7 + $0x8] sm:$0xff]  }
 0xaeb   : > { %v5604_v47 = vpop.eup %5603  ;;  %5089 = vmatprep.subr.bf16.mxu1 %v5308_v11 }
 0xaec   : > { %v2763_v56 = vpack.c.bf16 %v2753_v31, %v2752_v40  ;;  %v2755_v16 = vmul.f32 %v5604_v47, %v6834_v23  ;;  %v5309_v23 = vld [vmem:[%s7692_s7 + $0x10] sm:$0xff]   ;;  %v7755_v31 = vpack.i.bf16 %v6750_v30, %v6746_v59  ;;  %v7756_v47 = vpack.i.bf16 %v6754_v42, %v6748_v27  ;;  %v7758_v42 = vld [vmem:[#allocation3_spill] sm:$0xff] }
 0xaed   : > { %v5606_v2 = vpop.eup %5605  ;;  %5090 = vmatpush3.bf16.msra.mxu1 %v5308_v11 }
 0xaee   : > { %5080 = vmatmul.mubr.bf16.gmra.mrb[72].mxu1 %v2763_v56  ;;  %v2754_v50 = vmul.f32 %v5606_v2, %v6837_v8  ;;  %5091 = vmatprep.subr.bf16.mxu1 %v5309_v23  ;;  %v5310_v8 = vld [vmem:[%s7692_s7 + $0x18] sm:$0xff]   ;;  %v5170_v56 = vpop.permute.xlu1 %5169 }
 0xaef   : > { %v5608_v58 = vpop.eup %5607 }
 0xaf0   : > { %v2764_v37 = vpack.c.bf16 %v2755_v16, %v2754_v50  ;;  %v2757_v6 = vmul.f32 %v5608_v58, %v6840_v45  ;;  %v5311_v45 = vld [vmem:[%s7692_s7 + $0x20] sm:$0xff]   ;;  %v5165_v50 = vpop.permute.xlu0 %5164 }
 0xaf1   : > { %v5610_v24 = vpop.eup %5609  ;;  %5092 = vmatpush3.bf16.msra.mxu1 %v5309_v23  ;;  %v5167_v58 = vunpack.i.h.bf16 %v5165_v50 }
 0xaf2   : > { %5083 = vmatprep.mubr.bf16.mxu1 %v2764_v37  ;;  %v2756_v36 = vmul.f32 %v5610_v24, %v6843_v17  ;;  %5093 = vmatprep.subr.bf16.mxu1 %v5310_v8  ;;  %v5312_v17 = vld [vmem:[%s7692_s7 + $0x28] sm:$0xff]   ;;  %v5175_v2 = vpop.permute.xlu1 %5174  ;;  %v5166_v37 = vunpack.i.l.bf16 %v5165_v50  ;;  %v5172_v24 = vunpack.i.h.bf16 %v5170_v56 }
 0xaf3   : > { %v5177_v30 = vunpack.i.h.bf16 %v5175_v2  ;;  %v3080_v27 = vsel %vm1118_vm0, %v7757_v53, %v5167_v58 }
 0xaf4   : > { %v2765_v29 = vpack.c.bf16 %v2757_v6, %v2756_v36  ;;  %v5171_v36 = vunpack.i.l.bf16 %v5170_v56  ;;  %v3079_v11 = vsel %vm1118_vm0, %v7758_v42, %v5166_v37 }
 0xaf5   : > { %5094 = vmatpush3.bf16.msra.mxu1 %v5310_v8  ;;  %v7759_v8 = vld [vmem:[#allocation4_spill] sm:$0xff] }
 0xaf6   : > { %5084 = vmatmul.mubr.bf16.gmra.mrb[76].mxu1 %v2765_v29  ;;  %5095 = vmatprep.subr.bf16.mxu1 %v5311_v45  ;;  %v5180_v16 = vpop.permute.xlu1 %5179  ;;  %v5176_v29 = vunpack.i.l.bf16 %v5175_v2 }
 0xaf7   : > { %v5182_v6 = vunpack.i.h.bf16 %v5180_v16  ;;  %v5181_v59 = vunpack.i.l.bf16 %v5180_v16 }
 0xaf9   : > { %5096 = vmatpush3.bf16.msra.mxu1 %v5311_v45  ;;  %v3082_v45 = vsel %vm1118_vm0, %v7759_v8, %v5172_v24 }
 0xafa   : > { %5097 = vmatprep.subr.bf16.mxu1 %v5312_v17 }
 0xafd   : > { %5098 = vmatpush3.bf16.msra.mxu1 %v5312_v17  ;;  %v7760_v17 = vld [vmem:[#allocation2_spill] sm:$0xff] }
 0xafe   : > { %5099 = vmatprep.subr.bf16.mxu1 %v5313_v62 }
 0xb01   : > { %5100 = vmatpush3.bf16.msra.mxu1 %v5313_v62  ;;  %v3081_v62 = vsel %vm1118_vm0, %v7760_v17, %v5171_v36 }
 0xb02   : > { %5101 = vmatprep.subr.bf16.mxu1 %v5314_v20 }
 0xb05   : > { %5102 = vmatpush3.bf16.msra.mxu1 %v5314_v20 }
 0xb85   : > { %v5073_v60 = vpop.f32.mrb[64].mxu1 }
 0xb86   : > { %v2824_v21 = vpop.f32.mrb[65].mxu1 }
 0xb87   : > { %v5074_v22 = vpop.f32.mrb[66].mxu1 }
 0xb88   : > { %v5188_v32 = vpack.i.bf16 %v5074_v22, %v5073_v60  ;;  %v2827_v46 = vpop.f32.mrb[67].mxu1  ;;  %v3098_v22 = vsel %vm3095_vm1, %v3081_v62, %v5181_v59  ;;  %v7765_v62 = vld [vmem:[#allocation12_spill] sm:$0xff] }
 0xb89   : > { %v5183_v41 = vpack.i.bf16 %v2827_v46, %v2824_v21 }
 0xb8a   : > { %5189 = vrot.lane.b32.xlu1 %v5188_v32, %s5699_s29  ;;  %v3099_v32 = vsel %vm3095_vm1, %v3082_v45, %v5182_v6 }
 0xb8b   : > { %5184 = vrot.lane.b32.xlu0 %v5183_v41, %s5699_s29 }
 0xb8d   : > { %v5077_v52 = vpop.f32.mrb[68].mxu1 }
 0xb8e   : > { %5199 = vrot.lane.b32.xlu1 %v7739_v10, %s5701_s22  ;;  %v2840_v55 = vpop.f32.mrb[69].mxu1  ;;  %v3096_v10 = vsel %vm3095_vm1, %v3079_v11, %v5176_v29 }
 0xb8f   : > { %5194 = vrot.lane.b32.xlu0 %v7740_v14, %s5701_s22  ;;  %v5078_v51 = vpop.f32.mrb[70].mxu1 }
 0xb90   : > { %v5218_v15 = vpack.i.bf16 %v5078_v51, %v5077_v52  ;;  %v2843_v33 = vpop.f32.mrb[71].mxu1  ;;  %v3097_v52 = vsel %vm3095_vm1, %v3080_v27, %v5177_v30 }
 0xb91   : > { %v5213_v44 = vpack.i.bf16 %v2843_v33, %v2840_v55 }
 0xb92   : > { %5209 = vrot.lane.b32.xlu1 %v7741_v19, %s5700_s20 }
 0xb93   : > { %5204 = vrot.lane.b32.xlu0 %v7742_v43, %s5700_s20 }
 0xb96   : > { %5219 = vrot.lane.b32.xlu1 %v5218_v15, %s5699_s29 }
 0xb97   : > { %5214 = vrot.lane.b32.xlu0 %v5213_v44, %s5699_s29 }
 0xb9a   : > { %5229 = vrot.lane.b32.xlu1 %v7743_v4, %s5701_s22 }
 0xb9b   : > { %5224 = vrot.lane.b32.xlu0 %v7746_v18, %s5701_s22 }
 0xb9e   : > { %5239 = vrot.lane.b32.xlu1 %v7747_v57, %s5700_s20 }
 0xb9f   : > { %5234 = vrot.lane.b32.xlu0 %v7748_v25, %s5700_s20 }
 0xbc1   : > { %v5081_v28 = vpop.f32.mrb[72].mxu1 }
 0xbc2   : > { %v2856_v54 = vpop.f32.mrb[73].mxu1 }
 0xbc3   : > { %v5082_v35 = vpop.f32.mrb[74].mxu1 }
 0xbc4   : > { %v5248_v38 = vpack.i.bf16 %v5082_v35, %v5081_v28  ;;  %v2859_v39 = vpop.f32.mrb[75].mxu1 }
 0xbc5   : > { %v5243_v49 = vpack.i.bf16 %v2859_v39, %v2856_v54  ;;  %v7761_v39 = vld [vmem:[#allocation8_spill] sm:$0xff] }
 0xbc6   : > { %5249 = vrot.lane.b32.xlu1 %v5248_v38, %s5699_s29 }
 0xbc7   : > { %5244 = vrot.lane.b32.xlu0 %v5243_v49, %s5699_s29 }
 0xbc9   : > { %v5085_v9 = vpop.f32.mrb[76].mxu1 }
 0xbca   : > { %5259 = vrot.lane.b32.xlu1 %v7751_v48, %s5701_s22  ;;  %v2872_v61 = vpop.f32.mrb[77].mxu1  ;;  %v7763_v48 = vld [vmem:[#allocation9_spill] sm:$0xff] }
 0xbcb   : > { %5254 = vrot.lane.b32.xlu0 %v7754_v26, %s5701_s22  ;;  %v5086_v0 = vpop.f32.mrb[78].mxu1 }
 0xbcc   : > { %v5278_v5 = vpack.i.bf16 %v5086_v0, %v5085_v9  ;;  %v2875_v13 = vpop.f32.mrb[79].mxu1  ;;  %v7762_v9 = vld [vmem:[#allocation6_spill] sm:$0xff] }
 0xbcd   : > { %v5273_v40 = vpack.i.bf16 %v2875_v13, %v2872_v61 }
 0xbce   : > { %5269 = vrot.lane.b32.xlu1 %v7755_v31, %s5700_s20 }
 0xbcf   : > { %5264 = vrot.lane.b32.xlu0 %v7756_v47, %s5700_s20 }
 0xbd2   : > { %5279 = vrot.lane.b32.xlu1 %v5278_v5, %s5699_s29 }
 0xbd3   : > { %5274 = vrot.lane.b32.xlu0 %v5273_v40, %s5699_s29 }
 0xbfc   : > { %v5190_v23 = vpop.permute.xlu1 %5189 }
 0xbfd   : > { %v5192_v20 = vunpack.i.h.bf16 %v5190_v23  ;;  %v5191_v60 = vunpack.i.l.bf16 %v5190_v23  ;;  %v5185_v21 = vpop.permute.xlu0 %5184 }
 0xbfe   : > { %v5187_v46 = vunpack.i.h.bf16 %v5185_v21  ;;  %v5186_v41 = vunpack.i.l.bf16 %v5185_v21 }
 0xbff   : > { %v3115_v55 = vsel %vm3112_vm2, %v3098_v22, %v5191_v60  ;;  %v3116_v14 = vsel %vm3112_vm2, %v3099_v32, %v5192_v20  ;;  %v7766_v60 = vld [vmem:[#allocation10_spill] sm:$0xff]  ;;  %v7767_v32 = vld [vmem:[#allocation13_spill] sm:$0xff] }
 0xc00   : > { %v3130_v51 = vpack.c.bf16 %v3116_v14, %v3115_v55  ;;  %v5200_v15 = vpop.permute.xlu1 %5199  ;;  %v3113_v33 = vsel %vm3112_vm2, %v3096_v10, %v5186_v41  ;;  %v3114_v44 = vsel %vm3112_vm2, %v3097_v52, %v5187_v46  ;;  %v7768_v41 = vld [vmem:[#allocation11_spill] sm:$0xff] }
 0xc01   : > { %v5195_v19 = vpop.permute.xlu0 %5194  ;;  %v3129_v43 = vpack.c.bf16 %v3114_v44, %v3113_v33  ;;  %v5202_v4 = vunpack.i.h.bf16 %v5200_v15  ;;  %v5201_v3 = vunpack.i.l.bf16 %v5200_v15 }
 0xc02   : > { %v5197_v18 = vunpack.i.h.bf16 %v5195_v19  ;;  %v5196_v57 = vunpack.i.l.bf16 %v5195_v19 }
 0xc03   : > { %5103 = vmatprep.mubr.bf16.mxu1 %v3129_v43  ;;  %v3086_v49 = vsel %vm1118_vm0, %v7761_v39, %v5202_v4  ;;  %v3085_v7 = vsel %vm1118_vm0, %v7762_v9, %v5201_v3 }
 0xc04   : > { %v5210_v63 = vpop.permute.xlu1 %5209  ;;  %5104 = vmatmul.mubr.bf16.vlgmr.msra.gmra.mrb[80].mxu1 %v3130_v51  ;;  %v3084_v61 = vsel %vm1118_vm0, %v7763_v48, %v5197_v18  ;;  %v3083_v12 = vsel %vm1118_vm0, %v7764_v34, %v5196_v57 }
 0xc05   : > { %v5205_v25 = vpop.permute.xlu0 %5204  ;;  %v5212_v28 = vunpack.i.h.bf16 %v5210_v63  ;;  %v5211_v54 = vunpack.i.l.bf16 %v5210_v63 }
 0xc06   : > { %v5207_v35 = vunpack.i.h.bf16 %v5205_v25  ;;  %v5206_v38 = vunpack.i.l.bf16 %v5205_v25 }
 0xc07   : > { %v3102_v13 = vsel %vm3095_vm1, %v3085_v7, %v5211_v54  ;;  %v3103_v40 = vsel %vm3095_vm1, %v3086_v49, %v5212_v28 }
 0xc08   : > { %v5220_v1 = vpop.permute.xlu1 %5219  ;;  %v3100_v56 = vsel %vm3095_vm1, %v3083_v12, %v5206_v38  ;;  %v3101_v2 = vsel %vm3095_vm1, %v3084_v61, %v5207_v35  ;;  %v7769_v12 = vld [vmem:[#allocation16_spill] sm:$0xff] }
 0xc09   : > { %v5222_v26 = vunpack.i.h.bf16 %v5220_v1  ;;  %v5221_v0 = vunpack.i.l.bf16 %v5220_v1  ;;  %v5215_v5 = vpop.permute.xlu0 %5214 }
 0xc0a   : > { %v5217_v31 = vunpack.i.h.bf16 %v5215_v5  ;;  %v5216_v47 = vunpack.i.l.bf16 %v5215_v5 }
 0xc0b   : > { %v3119_v50 = vsel %vm3112_vm2, %v3102_v13, %v5221_v0  ;;  %v3120_v16 = vsel %vm3112_vm2, %v3103_v40, %v5222_v26  ;;  %v7770_v0 = vld [vmem:[#allocation14_spill] sm:$0xff]  ;;  %v7771_v40 = vld [vmem:[#allocation17_spill] sm:$0xff] }
 0xc0c   : > { %v3117_v58 = vsel %vm3112_vm2, %v3100_v56, %v5216_v47  ;;  %v3118_v37 = vsel %vm3112_vm2, %v3101_v2, %v5217_v31  ;;  %v3132_v24 = vpack.c.bf16 %v3120_v16, %v3119_v50  ;;  %v5230_v6 = vpop.permute.xlu1 %5229  ;;  %v7772_v47 = vld [vmem:[#allocation15_spill] sm:$0xff] }
 0xc0d   : > { %v3131_v36 = vpack.c.bf16 %v3118_v37, %v3117_v58  ;;  %v5225_v59 = vpop.permute.xlu0 %5224  ;;  %v5232_v29 = vunpack.i.h.bf16 %v5230_v6  ;;  %v5231_v53 = vunpack.i.l.bf16 %v5230_v6 }
 0xc0e   : > { %v5227_v42 = vunpack.i.h.bf16 %v5225_v59  ;;  %v5226_v11 = vunpack.i.l.bf16 %v5225_v59 }
 0xc0f   : > { %5107 = vmatprep.mubr.bf16.mxu1 %v3131_v36  ;;  %v3090_v20 = vsel %vm1118_vm0, %v7765_v62, %v5232_v29  ;;  %v3089_v21 = vsel %vm1118_vm0, %v7766_v60, %v5231_v53 }
 0xc10   : > { %5108 = vmatmul.mubr.bf16.gmra.mrb[84].mxu1 %v3132_v24  ;;  %v5240_v30 = vpop.permute.xlu1 %5239  ;;  %v3088_v46 = vsel %vm1118_vm0, %v7767_v32, %v5227_v42  ;;  %v3087_v52 = vsel %vm1118_vm0, %v7768_v41, %v5226_v11 }
 0xc11   : > { %v5235_v27 = vpop.permute.xlu0 %5234  ;;  %v5242_v23 = vunpack.i.h.bf16 %v5240_v30  ;;  %v5241_v8 = vunpack.i.l.bf16 %v5240_v30 }
 0xc12   : > { %v5237_v45 = vunpack.i.h.bf16 %v5235_v27  ;;  %v5236_v17 = vunpack.i.l.bf16 %v5235_v27 }
 0xc13   : > { %v3106_v51 = vsel %vm3095_vm1, %v3089_v21, %v5241_v8  ;;  %v3107_v15 = vsel %vm3095_vm1, %v3090_v20, %v5242_v23  ;;  %v7025_v23 = vld [vmem:[%s7693_s8] ss:$0 sm:$0xff] }
 0xc14   : > { %v3104_v19 = vsel %vm3095_vm1, %v3087_v52, %v5236_v17  ;;  %v3105_v43 = vsel %vm3095_vm1, %v3088_v46, %v5237_v45  ;;  %v5675_v21 = vld [vmem:[%s5818_s21] sm:$0xff]  ;;  %v5676_v46 = vld [vmem:[%s5818_s21 + $0x8] sm:$0xff]  ;;  %v5677_v52 = vld [vmem:[%s5818_s21 + $0x10] sm:$0xff] }
 0xc38   : > { %v5250_v22 = vpop.permute.xlu1 %5249 }
 0xc39   : > { %v5252_v10 = vunpack.i.h.bf16 %v5250_v22  ;;  %v5251_v55 = vunpack.i.l.bf16 %v5250_v22  ;;  %v5245_v14 = vpop.permute.xlu0 %5244 }
 0xc3a   : > { %v5247_v33 = vunpack.i.h.bf16 %v5245_v14  ;;  %v5246_v44 = vunpack.i.l.bf16 %v5245_v14  ;;  %v5678_v14 = vld [vmem:[%s5818_s21 + $0x18] sm:$0xff] }
 0xc3b   : > { %v3123_v4 = vsel %vm3112_vm2, %v3106_v51, %v5251_v55  ;;  %v3124_v3 = vsel %vm3112_vm2, %v3107_v15, %v5252_v10 }
 0xc3c   : > { %v5260_v63 = vpop.permute.xlu1 %5259  ;;  %v3121_v18 = vsel %vm3112_vm2, %v3104_v19, %v5246_v44  ;;  %v3122_v57 = vsel %vm3112_vm2, %v3105_v43, %v5247_v33  ;;  %v3134_v25 = vpack.c.bf16 %v3124_v3, %v3123_v4  ;;  %v5679_v3 = vld [vmem:[%s5818_s21 + $0x20] sm:$0xff] }
 0xc3d   : > { %v5255_v28 = vpop.permute.xlu0 %5254  ;;  %v3133_v54 = vpack.c.bf16 %v3122_v57, %v3121_v18  ;;  %v5262_v35 = vunpack.i.h.bf16 %v5260_v63  ;;  %v5261_v38 = vunpack.i.l.bf16 %v5260_v63 }
 0xc3e   : > { %v5257_v49 = vunpack.i.h.bf16 %v5255_v28  ;;  %v5256_v9 = vunpack.i.l.bf16 %v5255_v28 }
 0xc3f   : > { %5111 = vmatprep.mubr.bf16.mxu1 %v3133_v54  ;;  %v3094_v26 = vsel %vm1118_vm0, %v7769_v12, %v5262_v35  ;;  %v3093_v5 = vsel %vm1118_vm0, %v7770_v0, %v5261_v38  ;;  %v5681_v54 = vld [vmem:[%s5818_s21 + $0x30] sm:$0xff]  ;;  %v5682_v38 = vld [vmem:[%s5818_s21 + $0x38] sm:$0xff] }
 0xc40   : > { %v5270_v39 = vpop.permute.xlu1 %5269  ;;  %5112 = vmatmul.mubr.bf16.gmra.mrb[88].mxu1 %v3134_v25  ;;  %v3092_v31 = vsel %vm1118_vm0, %v7771_v40, %v5257_v49  ;;  %v3091_v56 = vsel %vm1118_vm0, %v7772_v47, %v5256_v9  ;;  %v5680_v25 = vld [vmem:[%s5818_s21 + $0x28] sm:$0xff]  ;;  %v5685_v40 = vld [vmem:[%s5818_s21 + $0x50] sm:$0xff]  ;;  %v5686_v47 = vld [vmem:[%s5818_s21 + $0x58] sm:$0xff] }
 0xc41   : > { %v5265_v7 = vpop.permute.xlu0 %5264  ;;  %v5272_v1 = vunpack.i.h.bf16 %v5270_v39  ;;  %v5271_v48 = vunpack.i.l.bf16 %v5270_v39 }
 0xc42   : > { %v5267_v61 = vunpack.i.h.bf16 %v5265_v7  ;;  %v5266_v34 = vunpack.i.l.bf16 %v5265_v7 }
 0xc43   : > { %v3110_v58 = vsel %vm3095_vm1, %v3093_v5, %v5271_v48  ;;  %v3111_v37 = vsel %vm3095_vm1, %v3094_v26, %v5272_v1  ;;  %v5684_v5 = vld [vmem:[%s5818_s21 + $0x48] sm:$0xff] }
 0xc44   : > { %v5280_v13 = vpop.permute.xlu1 %5279  ;;  %v3108_v6 = vsel %vm3095_vm1, %v3091_v56, %v5266_v34  ;;  %v3109_v59 = vsel %vm3095_vm1, %v3092_v31, %v5267_v61  ;;  %v5683_v34 = vld [vmem:[%s5818_s21 + $0x40] sm:$0xff] }
 0xc45   : > { %v5282_v2 = vunpack.i.h.bf16 %v5280_v13  ;;  %v5281_v50 = vunpack.i.l.bf16 %v5280_v13  ;;  %v5275_v16 = vpop.permute.xlu0 %5274 }
 0xc46   : > { %v5277_v24 = vunpack.i.h.bf16 %v5275_v16  ;;  %v5276_v36 = vunpack.i.l.bf16 %v5275_v16 }
 0xc47   : > { %v3127_v30 = vsel %vm3112_vm2, %v3110_v58, %v5281_v50  ;;  %v3128_v29 = vsel %vm3112_vm2, %v3111_v37, %v5282_v2 }
 0xc48   : > { %v3125_v53 = vsel %vm3112_vm2, %v3108_v6, %v5276_v36  ;;  %v3126_v27 = vsel %vm3112_vm2, %v3109_v59, %v5277_v24  ;;  %v3136_v42 = vpack.c.bf16 %v3128_v29, %v3127_v30  ;;  %v5687_v36 = vld [vmem:[%s5818_s21 + $0x60] sm:$0xff]  ;;  %v5688_v29 = vld [vmem:[%s5818_s21 + $0x68] sm:$0xff] }
 0xc49   : > { %v3135_v11 = vpack.c.bf16 %v3126_v27, %v3125_v53  ;;  %v5689_v27 = vld [vmem:[%s5818_s21 + $0x70] sm:$0xff] }
 0xc4b   : > { %5115 = vmatprep.mubr.bf16.mxu1 %v3135_v11  ;;  %v5690_v11 = vld [vmem:[%s5818_s21 + $0x78] sm:$0xff] }
 0xc4c   : > { %5116 = vmatmul.mubr.bf16.gmra.mrb[92].mxu1 %v3136_v42 }
 0xcd7   : > { %v5105_v8 = vpop.f32.mrb[80].mxu1 }
 0xcd8   : > { %v3242_v45 = vpop.f32.mrb[81].mxu1  ;;  %v3251_v60 = vadd.f32 %v5105_v8, %v7025_v23 }
 0xcd9   : > { %v3243_v17 = vadd.f32 %v7025_v23, %v3242_v45  ;;  %v5106_v62 = vpop.f32.mrb[82].mxu1  ;;  %v5317_v45 = vld [vmem:[%s7696_s11 + $0x4] ss:$8 sps:$4 sm:$0xff]  }
 0xcda   : > { %v3245_v20 = vpop.f32.mrb[83].mxu1  ;;  %v7038_v10 = vadd.f32 %v5677_v52, %v3251_v60  ;;  %v3254_v55 = vadd.f32 %v5106_v62, %v7025_v23  ;;  %3659 = vmatprep.subr.bf16.mxu0 %v5317_v45  ;;  %v5318_v62 = vld [vmem:[%s7696_s11 + $0x10] ss:$8 sps:$4 sm:$0xff]  }
 0xcdb   : > { %v7030_v22 = vadd.f32 %v5675_v21, %v3243_v17  ;;  %v3246_v32 = vadd.f32 %v7025_v23, %v3245_v20  ;;  %v5320_v17 = vld [vmem:[%s7696_s11 + $0x14] ss:$8 sps:$4 sm:$0xff]  }
 0xcdc   : > { %v7044_v51 = vadd.f32 %v5678_v14, %v3254_v55 }
 0xcdd   : > { %v7034_v41 = vadd.f32 %v5676_v46, %v3246_v32  ;;  %3321 = vadd.xlane.f32.xlu0 %v7030_v22 }
 0xcdf   : > { %3323 = vadd.xlane.f32.xlu1 %v7034_v41 }
 0xce1   : > { %3325 = vadd.xlane.f32.xlu0 %v7038_v10 }
 0xce3   : > { %v5109_v15 = vpop.f32.mrb[84].mxu1 }
 0xce4   : > { %v3258_v33 = vpop.f32.mrb[85].mxu1  ;;  %v3267_v4 = vadd.f32 %v5109_v15, %v7025_v23 }
 0xce5   : > { %v3259_v44 = vadd.f32 %v7025_v23, %v3258_v33  ;;  %v5110_v19 = vpop.f32.mrb[86].mxu1  ;;  %3327 = vadd.xlane.f32.xlu0 %v7044_v51 }
 0xce6   : > { %v3261_v43 = vpop.f32.mrb[87].mxu1  ;;  %v3270_v57 = vadd.f32 %v5110_v19, %v7025_v23  ;;  %v7059_v35 = vadd.f32 %v5681_v54, %v3267_v4 }
 0xce7   : > { %v7050_v63 = vadd.f32 %v5679_v3, %v3259_v44  ;;  %v3262_v18 = vadd.f32 %v7025_v23, %v3261_v43 }
 0xce8   : > { %v7063_v39 = vadd.f32 %v5682_v38, %v3270_v57 }
 0xce9   : > { %v7055_v28 = vadd.f32 %v5680_v25, %v3262_v18  ;;  %3329 = vadd.xlane.f32.xlu0 %v7050_v63 }
 0xceb   : > { %3331 = vadd.xlane.f32.xlu1 %v7055_v28 }
 0xced   : > { %3333 = vadd.xlane.f32.xlu0 %v7059_v35 }
 0xcef   : > { %3335 = vadd.xlane.f32.xlu1 %v7063_v39 }
 0xd13   : > { %v5113_v49 = vpop.f32.mrb[88].mxu1 }
 0xd14   : > { %v3274_v9 = vpop.f32.mrb[89].mxu1  ;;  %v3283_v61 = vadd.f32 %v5113_v49, %v7025_v23 }
 0xd15   : > { %v3275_v7 = vadd.f32 %v7025_v23, %v3274_v9  ;;  %v5114_v1 = vpop.f32.mrb[90].mxu1 }
 0xd16   : > { %v3277_v48 = vpop.f32.mrb[91].mxu1  ;;  %v3286_v0 = vadd.f32 %v5114_v1, %v7025_v23  ;;  %v7079_v31 = vadd.f32 %v5685_v40, %v3283_v61  ;;  %v5323_v61 = vld [vmem:[%s7696_s11 + $0x24] ss:$8 sps:$4 sm:$0xff]   ;;  %v5332_v40 = vld [vmem:[%s7696_s11 + $0x54] ss:$8 sps:$4 sm:$0xff]  }
 0xd17   : > { %v7070_v12 = vadd.f32 %v5683_v34, %v3275_v7  ;;  %v3278_v26 = vadd.f32 %v7025_v23, %v3277_v48 }
 0xd18   : > { %v7083_v56 = vadd.f32 %v5686_v47, %v3286_v0  ;;  %v5329_v0 = vld [vmem:[%s7696_s11 + $0x44] ss:$8 sps:$4 sm:$0xff]   ;;  %v5330_v47 = vld [vmem:[%s7696_s11 + $0x50] ss:$8 sps:$4 sm:$0xff]  }
 0xd19   : > { %v7075_v13 = vadd.f32 %v5684_v5, %v3278_v26  ;;  %3337 = vadd.xlane.f32.xlu0 %v7070_v12  ;;  %v5324_v26 = vld [vmem:[%s7696_s11 + $0x30] ss:$8 sps:$4 sm:$0xff]   ;;  %v5327_v5 = vld [vmem:[%s7696_s11 + $0x40] ss:$8 sps:$4 sm:$0xff]  }
 0xd1b   : > { %3339 = vadd.xlane.f32.xlu1 %v7075_v13 }
 0xd1d   : > { %3341 = vadd.xlane.f32.xlu0 %v7079_v31 }
 0xd1f   : > { %v5117_v2 = vpop.f32.mrb[92].mxu1  ;;  %3343 = vadd.xlane.f32.xlu1 %v7083_v56 }
 0xd20   : > { %v3290_v50 = vpop.f32.mrb[93].mxu1  ;;  %v3299_v24 = vadd.f32 %v5117_v2, %v7025_v23  ;;  %v5335_v2 = vld [vmem:[%s7696_s11 + $0x64] ss:$8 sps:$4 sm:$0xff]  }
 0xd21   : > { %v3291_v16 = vadd.f32 %v7025_v23, %v3290_v50  ;;  %v5118_v58 = vpop.f32.mrb[94].mxu1  ;;  %v5333_v50 = vld [vmem:[%s7696_s11 + $0x60] ss:$8 sps:$4 sm:$0xff]  }
 0xd22   : > { %v3293_v37 = vpop.f32.mrb[95].mxu1  ;;  %v3302_v30 = vadd.f32 %v5118_v58, %v7025_v23  ;;  %v7099_v42 = vadd.f32 %v5689_v27, %v3299_v24  ;;  %v5336_v58 = vld [vmem:[%s7696_s11 + $0x70] ss:$8 sps:$4 sm:$0xff]  }
 0xd23   : > { %v7090_v6 = vadd.f32 %v5687_v36, %v3291_v16  ;;  %v3294_v59 = vadd.f32 %v7025_v23, %v3293_v37  ;;  %v5315_v23 = vld [vmem:[%s7696_s11] ss:$8 sps:$4 sm:$0xff]   ;;  %v5338_v16 = vld [vmem:[%s7696_s11 + $0x74] ss:$8 sps:$4 sm:$0xff]   ;;  %v5702_v37 = vmov 0  }
 0xd24   : > { %v7103_v8 = vadd.f32 %v5690_v11, %v3302_v30  ;;  %3660 = vmatpush1.bf16.msra.mxu0 %v5315_v23  ;;  %3691 = vmatprep.mubr.bf16.mxu0 %v5702_v37 }
 0xd25   : > { %v7095_v53 = vadd.f32 %v5688_v29, %v3294_v59  ;;  %3345 = vadd.xlane.f32.xlu0 %v7090_v6  ;;  %3661 = vmatprep.subr.bf16.mxu0 %v5320_v17 }
 0xd27   : > { %3347 = vadd.xlane.f32.xlu1 %v7095_v53 }
 0xd28   : > { %3662 = vmatpush1.bf16.msra.mxu0 %v5318_v62 }
 0xd29   : > { %3349 = vadd.xlane.f32.xlu0 %v7099_v42  ;;  %3663 = vmatprep.subr.bf16.mxu0 %v5323_v61  ;;  %v5349_v61 = vld [vmem:[%s7698_s13 + $0x68] sm:$0xff]  }
 0xd2b   : > { %3351 = vadd.xlane.f32.xlu1 %v7103_v8 }
 0xd6a   : > { %v3322_v20 = vpop.xlane.xlu0 %3321 }
 0xd6b   : > { %v3353_v60 = vmul.f32 0.0078125, %v3322_v20 }
 0xd6c   : > { %v3324_v21 = vpop.xlane.xlu1 %3323 }
 0xd6d   : > { %v7120_v32 = vsub.f32 %v7030_v22, %v3353_v60  ;;  %v3354_v46 = vmul.f32 0.0078125, %v3324_v21 }
 0xd6e   : > { %v3326_v52 = vpop.xlane.xlu0 %3325 }
 0xd6f   : > { %v7123_v55 = vsub.f32 %v7034_v41, %v3354_v46  ;;  %v3355_v14 = vmul.f32 0.0078125, %v3326_v52  ;;  %v3385_v15 = vmul.f32 %v7120_v32, %v7120_v32 }
 0xd71   : > { %v7128_v33 = vsub.f32 %v7038_v10, %v3355_v14  ;;  %3401 = vadd.xlane.f32.xlu0 %v3385_v15  ;;  %v3386_v44 = vmul.f32 %v7123_v55, %v7123_v55 }
 0xd72   : > { %v3328_v19 = vpop.xlane.xlu0 %3327 }
 0xd73   : > { %v3356_v43 = vmul.f32 0.0078125, %v3328_v19  ;;  %3403 = vadd.xlane.f32.xlu1 %v3386_v44  ;;  %v3387_v22 = vmul.f32 %v7128_v33, %v7128_v33 }
 0xd75   : > { %v7135_v41 = vsub.f32 %v7044_v51, %v3356_v43  ;;  %3405 = vadd.xlane.f32.xlu0 %v3387_v22 }
 0xd76   : > { %v3330_v4 = vpop.xlane.xlu0 %3329 }
 0xd77   : > { %v3357_v3 = vmul.f32 0.0078125, %v3330_v4  ;;  %v3388_v10 = vmul.f32 %v7135_v41, %v7135_v41 }
 0xd78   : > { %v3332_v18 = vpop.xlane.xlu1 %3331 }
 0xd79   : > { %v7140_v57 = vsub.f32 %v7050_v63, %v3357_v3  ;;  %v3358_v25 = vmul.f32 0.0078125, %v3332_v18  ;;  %3407 = vadd.xlane.f32.xlu1 %v3388_v10 }
 0xd7a   : > { %v3334_v54 = vpop.xlane.xlu0 %3333 }
 0xd7b   : > { %v7143_v38 = vsub.f32 %v7055_v28, %v3358_v25  ;;  %v3359_v49 = vmul.f32 0.0078125, %v3334_v54  ;;  %v3389_v51 = vmul.f32 %v7140_v57, %v7140_v57  ;;  %v5340_v25 = vld [vmem:[%s7698_s13] sm:$0xff]   ;;  %v5342_v54 = vld [vmem:[%s7698_s13 + $0x8] sm:$0xff]  }
 0xd7c   : > { %v3336_v9 = vpop.xlane.xlu1 %3335 }
 0xd7d   : > { %v7148_v7 = vsub.f32 %v7059_v35, %v3359_v49  ;;  %v3360_v1 = vmul.f32 0.0078125, %v3336_v9  ;;  %3409 = vadd.xlane.f32.xlu0 %v3389_v51  ;;  %v3390_v63 = vmul.f32 %v7143_v38, %v7143_v38  ;;  %v5321_v35 = vld [vmem:[%s7696_s11 + $0x20] ss:$8 sps:$4 sm:$0xff]   ;;  %v5343_v49 = vld [vmem:[%s7698_s13 + $0x50] sm:$0xff]   ;;  %v5345_v9 = vld [vmem:[%s7698_s13 + $0x58] sm:$0xff]  }
 0xd7e   : > { %3664 = vmatpush1.bf16.msra.mxu0 %v5321_v35  ;;  %v5344_v51 = vld [vmem:[%s7698_s13 + $0x10] sm:$0xff]  }
 0xd7f   : > { %v7153_v48 = vsub.f32 %v7063_v39, %v3360_v1  ;;  %3411 = vadd.xlane.f32.xlu1 %v3390_v63  ;;  %v3391_v28 = vmul.f32 %v7148_v7, %v7148_v7  ;;  %v5326_v39 = vld [vmem:[%s7696_s11 + $0x34] ss:$8 sps:$4 sm:$0xff]   ;;  %v5347_v63 = vld [vmem:[%s7698_s13 + $0x60] sm:$0xff]  }
 0xd80   : > { %3665 = vmatprep.subr.bf16.mxu0 %v5326_v39  ;;  %v5346_v1 = vld [vmem:[%s7698_s13 + $0x18] sm:$0xff]  }
 0xd81   : > { %3413 = vadd.xlane.f32.xlu0 %v3391_v28  ;;  %v3392_v34 = vmul.f32 %v7153_v48, %v7153_v48  ;;  %v5348_v28 = vld [vmem:[%s7698_s13 + $0x20] sm:$0xff]  }
 0xd82   : > { %3666 = vmatpush1.bf16.msra.mxu0 %v5324_v26 }
 0xd83   : > { %3415 = vadd.xlane.f32.xlu1 %v3392_v34  ;;  %3667 = vmatprep.subr.bf16.mxu0 %v5329_v0 }
 0xd86   : > { %3668 = vmatpush1.bf16.msra.mxu0 %v5327_v5 }
 0xd87   : > { %3669 = vmatprep.subr.bf16.mxu0 %v5332_v40 }
 0xd8a   : > { %3670 = vmatpush1.bf16.msra.mxu0 %v5330_v47 }
 0xd8b   : > { %3671 = vmatprep.subr.bf16.mxu0 %v5335_v2 }
 0xd8e   : > { %3672 = vmatpush1.bf16.msra.mxu0 %v5333_v50 }
 0xd8f   : > { %3673 = vmatprep.subr.bf16.mxu0 %v5338_v16 }
 0xd92   : > { %3674 = vmatpush1.bf16.msra.mxu0 %v5336_v58 }
 0xda6   : > { %v3338_v24 = vpop.xlane.xlu0 %3337 }
 0xda7   : > { %v3361_v36 = vmul.f32 0.0078125, %v3338_v24 }
 0xda8   : > { %v3340_v59 = vpop.xlane.xlu1 %3339 }
 0xda9   : > { %v7197_v30 = vsub.f32 %v7070_v12, %v3361_v36  ;;  %v3362_v29 = vmul.f32 0.0078125, %v3340_v59 }
 0xdaa   : > { %v3342_v27 = vpop.xlane.xlu0 %3341 }
 0xdab   : > { %v7200_v11 = vsub.f32 %v7075_v13, %v3362_v29  ;;  %v3363_v23 = vmul.f32 0.0078125, %v3342_v27  ;;  %v3393_v45 = vmul.f32 %v7197_v30, %v7197_v30  ;;  %v7272_v27 = vld [vmem:[%s7694_s9] ss:$0 sm:$0xff] }
 0xdac   : > { %v3344_v17 = vpop.xlane.xlu1 %3343 }
 0xdad   : > { %v7205_v62 = vsub.f32 %v7079_v31, %v3363_v23  ;;  %v3364_v20 = vmul.f32 0.0078125, %v3344_v17  ;;  %3417 = vadd.xlane.f32.xlu0 %v3393_v45  ;;  %v3394_v60 = vmul.f32 %v7200_v11, %v7200_v11 }
 0xdaf   : > { %v7210_v12 = vsub.f32 %v7083_v56, %v3364_v20  ;;  %3419 = vadd.xlane.f32.xlu1 %v3394_v60  ;;  %v3395_v13 = vmul.f32 %v7205_v62, %v7205_v62 }
 0xdb1   : > { %3421 = vadd.xlane.f32.xlu0 %v3395_v13  ;;  %v3396_v21 = vmul.f32 %v7210_v12, %v7210_v12 }
 0xdb2   : > { %v3346_v46 = vpop.xlane.xlu0 %3345 }
 0xdb3   : > { %v3365_v52 = vmul.f32 0.0078125, %v3346_v46  ;;  %3423 = vadd.xlane.f32.xlu1 %v3396_v21 }
 0xdb4   : > { %v3348_v31 = vpop.xlane.xlu1 %3347 }
 0xdb5   : > { %v7217_v14 = vsub.f32 %v7090_v6, %v3365_v52  ;;  %v3366_v15 = vmul.f32 0.0078125, %v3348_v31 }
 0xdb6   : > { %v3350_v44 = vpop.xlane.xlu0 %3349 }
 0xdb7   : > { %v7220_v56 = vsub.f32 %v7095_v53, %v3366_v15  ;;  %v3367_v19 = vmul.f32 0.0078125, %v3350_v44  ;;  %v3397_v43 = vmul.f32 %v7217_v14, %v7217_v14 }
 0xdb8   : > { %v3352_v22 = vpop.xlane.xlu1 %3351 }
 0xdb9   : > { %v7225_v4 = vsub.f32 %v7099_v42, %v3367_v19  ;;  %v3368_v3 = vmul.f32 0.0078125, %v3352_v22  ;;  %3425 = vadd.xlane.f32.xlu0 %v3397_v43  ;;  %v3398_v10 = vmul.f32 %v7220_v56, %v7220_v56  ;;  %v5339_v42 = vld [vmem:[%s7698_s13 + $0x40] sm:$0xff]  }
 0xdba   : > { %4671 = vmatprep.subr.bf16.mxu1 %v5339_v42  ;;  %v7280_v19 = vld [vmem:[%s7695_s10] ss:$0 sm:$0xff] }
 0xdbb   : > { %v7230_v6 = vsub.f32 %v7103_v8, %v3368_v3  ;;  %3427 = vadd.xlane.f32.xlu1 %v3398_v10  ;;  %v3399_v53 = vmul.f32 %v7225_v4, %v7225_v4  ;;  %v5341_v8 = vld [vmem:[%s7698_s13 + $0x48] sm:$0xff]   ;;  %4672 = vmatpush3.bf16.msra.mxu1 %v5340_v25 }
 0xdbc   : > { %4673 = vmatprep.subr.bf16.mxu1 %v5341_v8 }
 0xdbd   : > { %3429 = vadd.xlane.f32.xlu0 %v3399_v53  ;;  %v3400_v18 = vmul.f32 %v7230_v6, %v7230_v6 }
 0xdbf   : > { %3431 = vadd.xlane.f32.xlu1 %v3400_v18  ;;  %4674 = vmatpush3.bf16.msra.mxu1 %v5342_v54 }
 0xdc0   : > { %4675 = vmatprep.subr.bf16.mxu1 %v5343_v49 }
 0xdc3   : > { %4676 = vmatpush3.bf16.msra.mxu1 %v5344_v51 }
 0xdc4   : > { %4677 = vmatprep.subr.bf16.mxu1 %v5345_v9 }
 0xdc7   : > { %4678 = vmatpush3.bf16.msra.mxu1 %v5346_v1 }
 0xdc8   : > { %4679 = vmatprep.subr.bf16.mxu1 %v5347_v63 }
 0xdcb   : > { %4680 = vmatpush3.bf16.msra.mxu1 %v5348_v28 }
 0xdcc   : > { %4681 = vmatprep.subr.bf16.mxu1 %v5349_v61 }
 0xdfe   : > { %v3402_v35 = vpop.xlane.xlu0 %3401 }
 0xdff   : > { %v3433_v34 = vmul.f32 0.0078125, %v3402_v35 }
 0xe00   : > { %v3404_v39 = vpop.xlane.xlu1 %3403 }
 0xe01   : > { %v3449_v26 = vadd.f32 1e-05, %v3433_v34  ;;  %v3434_v0 = vmul.f32 0.0078125, %v3404_v39 }
 0xe02   : > { %v3406_v5 = vpop.xlane.xlu0 %3405 }
 0xe03   : > { %5611 = vrsqrt.f32 %v3449_v26  ;;  %v3450_v40 = vadd.f32 1e-05, %v3434_v0  ;;  %v3435_v47 = vmul.f32 0.0078125, %v3406_v5 }
 0xe05   : > { %5613 = vrsqrt.f32 %v3450_v40  ;;  %v3451_v2 = vadd.f32 1e-05, %v3435_v47 }
 0xe06   : > { %v3408_v50 = vpop.xlane.xlu1 %3407 }
 0xe07   : > { %5615 = vrsqrt.f32 %v3451_v2  ;;  %v3436_v16 = vmul.f32 0.0078125, %v3408_v50 }
 0xe09   : > { %v3452_v58 = vadd.f32 1e-05, %v3436_v16 }
 0xe0a   : > { %v3410_v24 = vpop.xlane.xlu0 %3409 }
 0xe0b   : > { %5617 = vrsqrt.f32 %v3452_v58  ;;  %v3437_v36 = vmul.f32 0.0078125, %v3410_v24 }
 0xe0c   : > { %v3412_v59 = vpop.xlane.xlu1 %3411 }
 0xe0d   : > { %v5612_v29 = vpop.eup %5611  ;;  %v3453_v23 = vadd.f32 1e-05, %v3437_v36  ;;  %v3438_v45 = vmul.f32 0.0078125, %v3412_v59 }
 0xe0e   : > { %v3481_v17 = vmul.f32 %v5612_v29, %v7120_v32  ;;  %v3414_v20 = vpop.xlane.xlu0 %3413 }
 0xe0f   : > { %v5614_v60 = vpop.eup %5613  ;;  %5619 = vrsqrt.f32 %v3453_v23  ;;  %v3454_v13 = vadd.f32 1e-05, %v3438_v45  ;;  %v3439_v21 = vmul.f32 0.0078125, %v3414_v20 }
 0xe10   : > { %v3504_v46 = vmul.f32 %v7272_v27, %v3481_v17  ;;  %v3482_v52 = vmul.f32 %v5614_v60, %v7123_v55  ;;  %v3416_v31 = vpop.xlane.xlu1 %3415 }
 0xe11   : > { %v5616_v15 = vpop.eup %5615  ;;  %5621 = vrsqrt.f32 %v3454_v13  ;;  %v3440_v44 = vmul.f32 0.0078125, %v3416_v31  ;;  %v3455_v43 = vadd.f32 1e-05, %v3439_v21 }
 0xe12   : > { %v3505_v32 = vmul.f32 %v7272_v27, %v3482_v52  ;;  %v7284_v3 = vadd.f32 %v7280_v19, %v3504_v46  ;;  %v3483_v55 = vmul.f32 %v5616_v15, %v7128_v33 }
 0xe13   : > { %v3456_v22 = vadd.f32 1e-05, %v3440_v44 }
 0xe14   : > { %v7287_v10 = vadd.f32 %v7280_v19, %v3505_v32  ;;  %v3506_v25 = vmul.f32 %v7272_v27, %v3483_v55 }
 0xe15   : > { %v5618_v53 = vpop.eup %5617  ;;  %5623 = vrsqrt.f32 %v3456_v22 }
 0xe16   : > { %v3543_v18 = vpack.c.bf16 %v7287_v10, %v7284_v3  ;;  %v3484_v42 = vmul.f32 %v5618_v53, %v7135_v41  ;;  %5625 = vrsqrt.f32 %v3455_v43  ;;  %v7300_v51 = vadd.f32 %v7280_v19, %v3506_v25 }
 0xe18   : > { %3692 = vmatmul.mubr.bf16.vlgmr.msra.gmra.mrb[96].mxu0 %v3543_v18  ;;  %v3507_v8 = vmul.f32 %v7272_v27, %v3484_v42 }
 0xe19   : > { %v5620_v54 = vpop.eup %5619  ;;  %3701 = vmatprep.mubr.bf16.mxu0 %v5702_v37 }
 0xe1a   : > { %v7297_v49 = vadd.f32 %v7280_v19, %v3507_v8  ;;  %v3485_v9 = vmul.f32 %v5620_v54, %v7140_v57 }
 0xe1b   : > { %v5622_v33 = vpop.eup %5621 }
 0xe1c   : > { %v3486_v41 = vmul.f32 %v5622_v33, %v7143_v38  ;;  %v3544_v1 = vpack.c.bf16 %v7297_v49, %v7300_v51  ;;  %v3508_v61 = vmul.f32 %v7272_v27, %v3485_v9 }
 0xe1e   : > { %v3509_v63 = vmul.f32 %v7272_v27, %v3486_v41  ;;  %v7314_v57 = vadd.f32 %v7280_v19, %v3508_v61 }
 0xe1f   : > { %v5624_v28 = vpop.eup %5623 }
 0xe20   : > { %3702 = vmatmul.mubr.bf16.gmra.mrb[100].mxu0 %v3544_v1  ;;  %v5626_v35 = vpop.eup %5625  ;;  %v7310_v34 = vadd.f32 %v7280_v19, %v3509_v63  ;;  %v3488_v39 = vmul.f32 %v5624_v28, %v7153_v48 }
 0xe21   : > { %3711 = vmatprep.mubr.bf16.mxu0 %v5702_v37  ;;  %v3487_v38 = vmul.f32 %v5626_v35, %v7148_v7 }
 0xe22   : > { %v3545_v26 = vpack.c.bf16 %v7310_v34, %v7314_v57  ;;  %v3511_v0 = vmul.f32 %v7272_v27, %v3488_v39 }
 0xe23   : > { %v3510_v5 = vmul.f32 %v7272_v27, %v3487_v38 }
 0xe24   : > { %v7323_v40 = vadd.f32 %v7280_v19, %v3511_v0 }
 0xe25   : > { %v7326_v48 = vadd.f32 %v7280_v19, %v3510_v5 }
 0xe27   : > { %v3546_v47 = vpack.c.bf16 %v7323_v40, %v7326_v48 }
 0xe28   : > { %3712 = vmatmul.mubr.bf16.gmra.mrb[104].mxu0 %v3545_v26 }
 0xe29   : > { %3721 = vmatprep.mubr.bf16.mxu0 %v5702_v37 }
 0xe30   : > { %3722 = vmatmul.mubr.bf16.gmra.mrb[108].mxu0 %v3546_v47 }
 0xe31   : > { %3731 = vmatprep.mubr.bf16.mxu0 %v5702_v37 }
 0xe3a   : > { %v3418_v7 = vpop.xlane.xlu0 %3417 }
 0xe3b   : > { %v3441_v2 = vmul.f32 0.0078125, %v3418_v7 }
 0xe3c   : > { %v3420_v50 = vpop.xlane.xlu1 %3419 }
 0xe3d   : > { %v3457_v16 = vadd.f32 1e-05, %v3441_v2  ;;  %v3442_v58 = vmul.f32 0.0078125, %v3420_v50 }
 0xe3e   : > { %v3422_v24 = vpop.xlane.xlu0 %3421 }
 0xe3f   : > { %5627 = vrsqrt.f32 %v3457_v16  ;;  %v3458_v36 = vadd.f32 1e-05, %v3442_v58  ;;  %v3443_v59 = vmul.f32 0.0078125, %v3422_v24 }
 0xe40   : > { %v3424_v29 = vpop.xlane.xlu1 %3423 }
 0xe41   : > { %5629 = vrsqrt.f32 %v3458_v36  ;;  %v3459_v23 = vadd.f32 1e-05, %v3443_v59  ;;  %v3444_v45 = vmul.f32 0.0078125, %v3424_v29  ;;  %v5354_v29 = vld [vmem:[%s7698_s13 + $0x38] sm:$0xff]  }
 0xe43   : > { %5631 = vrsqrt.f32 %v3459_v23  ;;  %v3460_v17 = vadd.f32 1e-05, %v3444_v45  ;;  %v3569_v23 = vlaneseq }
 0xe45   : > { %5633 = vrsqrt.f32 %v3460_v17  ;;  %v3570_v45 = vshrl.u32 %v3569_v23, 7 }
 0xe46   : > { %v3426_v20 = vpop.xlane.xlu0 %3425 }
 0xe47   : > { %v3445_v60 = vmul.f32 0.0078125, %v3426_v20  ;;  %v3571_v17 = vsub.s32 0, %v3570_v45  ;;  %v3567_v20 = vld [vmem:[%s7697_s12] sm:$0x3] }
 0xe48   : > { %v3428_v13 = vpop.xlane.xlu1 %3427 }
 0xe49   : > { %v5628_v21 = vpop.eup %5627  ;;  %v3461_v46 = vadd.f32 1e-05, %v3445_v60  ;;  %v3446_v52 = vmul.f32 0.0078125, %v3428_v13  ;;  %v3575_v60 = vsub.s32 1, %v3570_v45  ;;  %v7400_v13 = vrot.slane %v3567_v20, %v3571_v17 }
 0xe4a   : > { %v3430_v31 = vpop.xlane.xlu0 %3429  ;;  %v3489_v15 = vmul.f32 %v5628_v21, %v7197_v30 }
 0xe4b   : > { %v5630_v44 = vpop.eup %5629  ;;  %5635 = vrsqrt.f32 %v3461_v46  ;;  %v3462_v32 = vadd.f32 1e-05, %v3446_v52  ;;  %v3447_v43 = vmul.f32 0.0078125, %v3430_v31  ;;  %v7402_v21 = vrot.slane %v3567_v20, %v3575_v60 }
 0xe4c   : > { %v3432_v22 = vpop.xlane.xlu1 %3431  ;;  %v3490_v55 = vmul.f32 %v5630_v44, %v7200_v11  ;;  %v3512_v53 = vmul.f32 %v7272_v27, %v3489_v15 }
 0xe4d   : > { %v5632_v18 = vpop.eup %5631  ;;  %5637 = vrsqrt.f32 %v3462_v32  ;;  %v3448_v42 = vmul.f32 0.0078125, %v3432_v22  ;;  %v3463_v54 = vadd.f32 1e-05, %v3447_v43 }
 0xe4e   : > { %v3513_v25 = vmul.f32 %v7272_v27, %v3490_v55  ;;  %v7336_v9 = vadd.f32 %v7280_v19, %v3512_v53  ;;  %v3491_v41 = vmul.f32 %v5632_v18, %v7205_v62 }
 0xe4f   : > { %v5634_v8 = vpop.eup %5633  ;;  %v3464_v33 = vadd.f32 1e-05, %v3448_v42 }
 0xe50   : > { %v7339_v30 = vadd.f32 %v7280_v19, %v3513_v25  ;;  %v3492_v11 = vmul.f32 %v5634_v8, %v7210_v12  ;;  %v3514_v28 = vmul.f32 %v7272_v27, %v3491_v41 }
 0xe51   : > { %5639 = vrsqrt.f32 %v3464_v33 }
 0xe52   : > { %v3547_v1 = vpack.c.bf16 %v7339_v30, %v7336_v9  ;;  %v3515_v63 = vmul.f32 %v7272_v27, %v3492_v11  ;;  %5641 = vrsqrt.f32 %v3463_v54  ;;  %v7352_v62 = vadd.f32 %v7280_v19, %v3514_v28 }
 0xe54   : > { %3732 = vmatmul.mubr.bf16.gmra.mrb[112].mxu0 %v3547_v1  ;;  %v7349_v35 = vadd.f32 %v7280_v19, %v3515_v63 }
 0xe55   : > { %v5636_v61 = vpop.eup %5635  ;;  %3741 = vmatprep.mubr.bf16.mxu0 %v5702_v37 }
 0xe56   : > { %v3493_v12 = vmul.f32 %v5636_v61, %v7217_v14  ;;  %v3548_v26 = vpack.c.bf16 %v7349_v35, %v7352_v62 }
 0xe57   : > { %v5638_v39 = vpop.eup %5637 }
 0xe58   : > { %v3494_v38 = vmul.f32 %v5638_v39, %v7220_v56  ;;  %v3516_v47 = vmul.f32 %v7272_v27, %v3493_v12 }
 0xe5a   : > { %v3517_v0 = vmul.f32 %v7272_v27, %v3494_v38  ;;  %v7366_v14 = vadd.f32 %v7280_v19, %v3516_v47 }
 0xe5b   : > { %v5640_v5 = vpop.eup %5639 }
 0xe5c   : > { %3742 = vmatmul.mubr.bf16.gmra.mrb[116].mxu0 %v3548_v26  ;;  %v5642_v7 = vpop.eup %5641  ;;  %v7362_v2 = vadd.f32 %v7280_v19, %v3517_v0  ;;  %v3496_v50 = vmul.f32 %v5640_v5, %v7230_v6 }
 0xe5d   : > { %3751 = vmatprep.mubr.bf16.mxu0 %v5702_v37  ;;  %v3495_v56 = vmul.f32 %v5642_v7, %v7225_v4  ;;  %v5350_v4 = vld [vmem:[%s7698_s13 + $0x28] sm:$0xff]  }
 0xe5e   : > { %v3549_v16 = vpack.c.bf16 %v7362_v2, %v7366_v14  ;;  %v3519_v58 = vmul.f32 %v7272_v27, %v3496_v50  ;;  %4682 = vmatpush3.bf16.msra.mxu1 %v5350_v4 }
 0xe5f   : > { %v3518_v24 = vmul.f32 %v7272_v27, %v3495_v56  ;;  %v5351_v27 = vld [vmem:[%s7698_s13 + $0x70] sm:$0xff]  }
 0xe60   : > { %v7375_v36 = vadd.f32 %v7280_v19, %v3519_v58  ;;  %4683 = vmatprep.subr.bf16.mxu1 %v5351_v27 }
 0xe61   : > { %v7378_v6 = vadd.f32 %v7280_v19, %v3518_v24  ;;  %v5353_v19 = vld [vmem:[%s7698_s13 + $0x78] sm:$0xff]  }
 0xe63   : > { %v3550_v59 = vpack.c.bf16 %v7375_v36, %v7378_v6 }
 0xe64   : > { %3752 = vmatmul.mubr.bf16.gmra.mrb[120].mxu0 %v3549_v16 }
 0xe65   : > { %3761 = vmatprep.mubr.bf16.mxu0 %v5702_v37  ;;  %v5352_v37 = vld [vmem:[%s7698_s13 + $0x30] sm:$0xff]  }
 0xe66   : > { %4684 = vmatpush3.bf16.msra.mxu1 %v5352_v37 }
 0xe67   : > { %4685 = vmatprep.subr.bf16.mxu1 %v5353_v19 }
 0xe6a   : > { %4686 = vmatpush3.bf16.msra.mxu1 %v5354_v29 }
 0xe6c   : > { %3762 = vmatmul.mubr.bf16.gmra.mrb[124].mxu0 %v3550_v59 }
 0xeeb   : > { %v3693_v46 = vpop.f32.mrb[96].mxu0 }
 0xeec   : > { %v3694_v52 = vadd.f32 %v3693_v46, %v7400_v13  ;;  %v3695_v31 = vpop.f32.mrb[97].mxu0 }
 0xeed   : > { %v3696_v15 = vadd.f32 %v3695_v31, %v7402_v21  ;;  %v3697_v44 = vpop.f32.mrb[98].mxu0 }
 0xeee   : > { %v3698_v32 = vadd.f32 %v3697_v44, %v7400_v13  ;;  %v3699_v43 = vpop.f32.mrb[99].mxu0  ;;  %v3772_v55 = vmax.f32 %v3694_v52, 0.0 }
 0xeef   : > { %v3700_v22 = vadd.f32 %v3699_v43, %v7402_v21  ;;  %v3773_v18 = vmax.f32 %v3696_v15, 0.0 }
 0xef0   : > { %v3774_v53 = vmax.f32 %v3698_v32, 0.0 }
 0xef1   : > { %v3775_v42 = vmax.f32 %v3700_v22, 0.0 }
 0xef2   : > { %v3804_v25 = vpack.c.bf16 %v3774_v53, %v3772_v55 }
 0xef3   : > { %v3805_v8 = vpack.c.bf16 %v3775_v42, %v3773_v18  ;;  %v3703_v54 = vpop.f32.mrb[100].mxu0 }
 0xef4   : > { %v3704_v33 = vadd.f32 %v3703_v54, %v7400_v13  ;;  %v3705_v41 = vpop.f32.mrb[101].mxu0 }
 0xef5   : > { %v3706_v11 = vadd.f32 %v3705_v41, %v7402_v21  ;;  %v3707_v1 = vpop.f32.mrb[102].mxu0  ;;  %3987 = vmatprep.mubr.bf16.mxu1 %v3805_v8 }
 0xef6   : > { %v3708_v63 = vadd.f32 %v3707_v1, %v7400_v13  ;;  %v3709_v28 = vpop.f32.mrb[103].mxu0  ;;  %3988 = vmatmul.mubr.bf16.vlgmr.msra.gmra.mrb[96].mxu1 %v3804_v25  ;;  %v3776_v39 = vmax.f32 %v3704_v33, 0.0 }
 0xef7   : > { %v3710_v61 = vadd.f32 %v3709_v28, %v7402_v21  ;;  %v3777_v38 = vmax.f32 %v3706_v11, 0.0 }
 0xef8   : > { %v3778_v12 = vmax.f32 %v3708_v63, 0.0 }
 0xef9   : > { %v3779_v26 = vmax.f32 %v3710_v61, 0.0 }
 0xefa   : > { %v3806_v0 = vpack.c.bf16 %v3778_v12, %v3776_v39 }
 0xefb   : > { %v3807_v5 = vpack.c.bf16 %v3779_v26, %v3777_v38  ;;  %v3713_v47 = vpop.f32.mrb[104].mxu0 }
 0xefc   : > { %v3714_v7 = vadd.f32 %v3713_v47, %v7400_v13  ;;  %v3715_v50 = vpop.f32.mrb[105].mxu0 }
 0xefd   : > { %v3716_v56 = vadd.f32 %v3715_v50, %v7402_v21  ;;  %v3717_v16 = vpop.f32.mrb[106].mxu0  ;;  %3995 = vmatprep.mubr.bf16.mxu1 %v3807_v5 }
 0xefe   : > { %v3718_v58 = vadd.f32 %v3717_v16, %v7400_v13  ;;  %v3719_v24 = vpop.f32.mrb[107].mxu0  ;;  %3996 = vmatmul.mubr.bf16.gmra.mrb[100].mxu1 %v3806_v0  ;;  %v3780_v4 = vmax.f32 %v3714_v7, 0.0 }
 0xeff   : > { %v3720_v59 = vadd.f32 %v3719_v24, %v7402_v21  ;;  %v3781_v37 = vmax.f32 %v3716_v56, 0.0 }
 0xf00   : > { %v3782_v27 = vmax.f32 %v3718_v58, 0.0 }
 0xf01   : > { %v3783_v19 = vmax.f32 %v3720_v59, 0.0 }
 0xf02   : > { %v3808_v29 = vpack.c.bf16 %v3782_v27, %v3780_v4 }
 0xf03   : > { %v3809_v23 = vpack.c.bf16 %v3783_v19, %v3781_v37  ;;  %v3723_v45 = vpop.f32.mrb[108].mxu0 }
 0xf04   : > { %v3724_v17 = vadd.f32 %v3723_v45, %v7400_v13  ;;  %v3725_v20 = vpop.f32.mrb[109].mxu0 }
 0xf05   : > { %v3726_v60 = vadd.f32 %v3725_v20, %v7402_v21  ;;  %v3727_v46 = vpop.f32.mrb[110].mxu0  ;;  %4003 = vmatprep.mubr.bf16.mxu1 %v3809_v23 }
 0xf06   : > { %v3728_v52 = vadd.f32 %v3727_v46, %v7400_v13  ;;  %v3729_v31 = vpop.f32.mrb[111].mxu0  ;;  %4004 = vmatmul.mubr.bf16.gmra.mrb[104].mxu1 %v3808_v29  ;;  %v3784_v44 = vmax.f32 %v3724_v17, 0.0 }
 0xf07   : > { %v3730_v15 = vadd.f32 %v3729_v31, %v7402_v21  ;;  %v3785_v43 = vmax.f32 %v3726_v60, 0.0 }
 0xf08   : > { %v3786_v32 = vmax.f32 %v3728_v52, 0.0 }
 0xf09   : > { %v3787_v22 = vmax.f32 %v3730_v15, 0.0 }
 0xf0a   : > { %v3810_v55 = vpack.c.bf16 %v3786_v32, %v3784_v44 }
 0xf0b   : > { %v3811_v53 = vpack.c.bf16 %v3787_v22, %v3785_v43 }
 0xf0d   : > { %4011 = vmatprep.mubr.bf16.mxu1 %v3811_v53 }
 0xf0e   : > { %4012 = vmatmul.mubr.bf16.gmra.mrb[108].mxu1 %v3810_v55 }
 0xf27   : > { %v3733_v18 = vpop.f32.mrb[112].mxu0 }
 0xf28   : > { %v3734_v42 = vadd.f32 %v3733_v18, %v7400_v13  ;;  %v3735_v25 = vpop.f32.mrb[113].mxu0 }
 0xf29   : > { %v3736_v8 = vadd.f32 %v3735_v25, %v7402_v21  ;;  %v3737_v54 = vpop.f32.mrb[114].mxu0 }
 0xf2a   : > { %v3738_v33 = vadd.f32 %v3737_v54, %v7400_v13  ;;  %v3739_v41 = vpop.f32.mrb[115].mxu0  ;;  %v3788_v1 = vmax.f32 %v3734_v42, 0.0 }
 0xf2b   : > { %v3740_v11 = vadd.f32 %v3739_v41, %v7402_v21  ;;  %v3789_v28 = vmax.f32 %v3736_v8, 0.0 }
 0xf2c   : > { %v3790_v63 = vmax.f32 %v3738_v33, 0.0 }
 0xf2d   : > { %v3791_v61 = vmax.f32 %v3740_v11, 0.0 }
 0xf2e   : > { %v3812_v39 = vpack.c.bf16 %v3790_v63, %v3788_v1 }
 0xf2f   : > { %v3813_v12 = vpack.c.bf16 %v3791_v61, %v3789_v28  ;;  %v3743_v38 = vpop.f32.mrb[116].mxu0  ;;  %v7439_v61 = vld [vmem:[%s7699_s14] ss:$0 sm:$0xff] }
 0xf30   : > { %v3744_v26 = vadd.f32 %v3743_v38, %v7400_v13  ;;  %v3745_v0 = vpop.f32.mrb[117].mxu0 }
 0xf31   : > { %v3746_v5 = vadd.f32 %v3745_v0, %v7402_v21  ;;  %v3747_v47 = vpop.f32.mrb[118].mxu0  ;;  %4019 = vmatprep.mubr.bf16.mxu1 %v3813_v12 }
 0xf32   : > { %v3748_v7 = vadd.f32 %v3747_v47, %v7400_v13  ;;  %v3749_v50 = vpop.f32.mrb[119].mxu0  ;;  %4020 = vmatmul.mubr.bf16.gmra.mrb[112].mxu1 %v3812_v39  ;;  %v3792_v16 = vmax.f32 %v3744_v26, 0.0 }
 0xf33   : > { %v3750_v56 = vadd.f32 %v3749_v50, %v7402_v21  ;;  %v3793_v24 = vmax.f32 %v3746_v5, 0.0 }
 0xf34   : > { %v3794_v58 = vmax.f32 %v3748_v7, 0.0 }
 0xf35   : > { %v3795_v59 = vmax.f32 %v3750_v56, 0.0 }
 0xf36   : > { %v3814_v4 = vpack.c.bf16 %v3794_v58, %v3792_v16 }
 0xf37   : > { %v3815_v27 = vpack.c.bf16 %v3795_v59, %v3793_v24  ;;  %v3753_v37 = vpop.f32.mrb[120].mxu0 }
 0xf38   : > { %v3754_v19 = vadd.f32 %v3753_v37, %v7400_v13  ;;  %v3755_v29 = vpop.f32.mrb[121].mxu0 }
 0xf39   : > { %v3756_v23 = vadd.f32 %v3755_v29, %v7402_v21  ;;  %v3757_v45 = vpop.f32.mrb[122].mxu0  ;;  %4027 = vmatprep.mubr.bf16.mxu1 %v3815_v27 }
 0xf3a   : > { %v3758_v17 = vadd.f32 %v3757_v45, %v7400_v13  ;;  %v3759_v20 = vpop.f32.mrb[123].mxu0  ;;  %4028 = vmatmul.mubr.bf16.gmra.mrb[116].mxu1 %v3814_v4  ;;  %v3796_v46 = vmax.f32 %v3754_v19, 0.0 }
 0xf3b   : > { %v3760_v60 = vadd.f32 %v3759_v20, %v7402_v21  ;;  %v3797_v31 = vmax.f32 %v3756_v23, 0.0 }
 0xf3c   : > { %v3798_v52 = vmax.f32 %v3758_v17, 0.0 }
 0xf3d   : > { %v3799_v15 = vmax.f32 %v3760_v60, 0.0 }
 0xf3e   : > { %v3816_v44 = vpack.c.bf16 %v3798_v52, %v3796_v46 }
 0xf3f   : > { %v3817_v32 = vpack.c.bf16 %v3799_v15, %v3797_v31  ;;  %v3763_v43 = vpop.f32.mrb[124].mxu0 }
 0xf40   : > { %v3764_v22 = vadd.f32 %v3763_v43, %v7400_v13  ;;  %v3765_v55 = vpop.f32.mrb[125].mxu0 }
 0xf41   : > { %v3766_v53 = vadd.f32 %v3765_v55, %v7402_v21  ;;  %v3767_v18 = vpop.f32.mrb[126].mxu0  ;;  %4035 = vmatprep.mubr.bf16.mxu1 %v3817_v32 }
 0xf42   : > { %v3768_v42 = vadd.f32 %v3767_v18, %v7400_v13  ;;  %v3769_v25 = vpop.f32.mrb[127].mxu0  ;;  %4036 = vmatmul.mubr.bf16.gmra.mrb[120].mxu1 %v3816_v44  ;;  %v3800_v54 = vmax.f32 %v3764_v22, 0.0 }
 0xf43   : > { %v3770_v8 = vadd.f32 %v3769_v25, %v7402_v21  ;;  %v3801_v41 = vmax.f32 %v3766_v53, 0.0 }
 0xf44   : > { %v3802_v33 = vmax.f32 %v3768_v42, 0.0 }
 0xf45   : > { %v3803_v11 = vmax.f32 %v3770_v8, 0.0 }
 0xf46   : > { %v3818_v1 = vpack.c.bf16 %v3802_v33, %v3800_v54 }
 0xf47   : > { %v3819_v63 = vpack.c.bf16 %v3803_v11, %v3801_v41 }
 0xf49   : > { %4043 = vmatprep.mubr.bf16.mxu1 %v3819_v63 }
 0xf4a   : > { %4044 = vmatmul.mubr.bf16.gmra.mrb[124].mxu1 %v3818_v1 }
 0xfc9   : > { %v4687_v28 = vpop.f32.mrb[96].mxu1 }
 0xfca   : > { %v4688_v39 = vpop.f32.mrb[97].mxu1 }
 0xfcb   : > { %v4689_v13 = vadd.f32 %v4688_v39, %v4687_v28  ;;  %v4690_v12 = vpop.f32.mrb[98].mxu1 }
 0xfcc   : > { %v4691_v38 = vpop.f32.mrb[99].mxu1 }
 0xfcd   : > { %v3990_v21 = vadd.f32 %v4689_v13, %v7439_v61  ;;  %v4692_v26 = vadd.f32 %v4691_v38, %v4690_v12 }
 0xfcf   : > { %v3993_v0 = vadd.f32 %v4692_v26, %v7439_v61  ;;  %v7444_v5 = vadd.f32 %v3990_v21, %v7284_v3 }
 0xfd1   : > { %4068 = vadd.xlane.f32.xlu0 %v7444_v5  ;;  %v4693_v47 = vpop.f32.mrb[100].mxu1  ;;  %v7448_v7 = vadd.f32 %v3993_v0, %v7287_v10 }
 0xfd2   : > { %v4694_v50 = vpop.f32.mrb[101].mxu1 }
 0xfd3   : > { %v4695_v56 = vadd.f32 %v4694_v50, %v4693_v47  ;;  %4070 = vadd.xlane.f32.xlu1 %v7448_v7  ;;  %v4696_v16 = vpop.f32.mrb[102].mxu1 }
 0xfd4   : > { %v4697_v58 = vpop.f32.mrb[103].mxu1 }
 0xfd5   : > { %v3998_v24 = vadd.f32 %v4695_v56, %v7439_v61  ;;  %v4698_v59 = vadd.f32 %v4697_v58, %v4696_v16 }
 0xfd7   : > { %v4001_v4 = vadd.f32 %v4698_v59, %v7439_v61  ;;  %v7454_v3 = vadd.f32 %v3998_v24, %v7300_v51 }
 0xfd9   : > { %4072 = vadd.xlane.f32.xlu0 %v7454_v3  ;;  %v4699_v27 = vpop.f32.mrb[104].mxu1  ;;  %v7458_v10 = vadd.f32 %v4001_v4, %v7297_v49 }
 0xfda   : > { %v4700_v37 = vpop.f32.mrb[105].mxu1 }
 0xfdb   : > { %v4701_v19 = vadd.f32 %v4700_v37, %v4699_v27  ;;  %4074 = vadd.xlane.f32.xlu1 %v7458_v10  ;;  %v4702_v29 = vpop.f32.mrb[106].mxu1 }
 0xfdc   : > { %v4703_v23 = vpop.f32.mrb[107].mxu1 }
 0xfdd   : > { %v4006_v45 = vadd.f32 %v4701_v19, %v7439_v61  ;;  %v4704_v17 = vadd.f32 %v4703_v23, %v4702_v29 }
 0xfdf   : > { %v4009_v20 = vadd.f32 %v4704_v17, %v7439_v61  ;;  %v7464_v51 = vadd.f32 %v4006_v45, %v7314_v57 }
 0xfe1   : > { %4076 = vadd.xlane.f32.xlu0 %v7464_v51  ;;  %v4705_v60 = vpop.f32.mrb[108].mxu1  ;;  %v7468_v49 = vadd.f32 %v4009_v20, %v7310_v34 }
 0xfe2   : > { %v4706_v46 = vpop.f32.mrb[109].mxu1 }
 0xfe3   : > { %v4707_v52 = vadd.f32 %v4706_v46, %v4705_v60  ;;  %4078 = vadd.xlane.f32.xlu1 %v7468_v49  ;;  %v4708_v31 = vpop.f32.mrb[110].mxu1 }
 0xfe4   : > { %v4709_v15 = vpop.f32.mrb[111].mxu1 }
 0xfe5   : > { %v4014_v44 = vadd.f32 %v4707_v52, %v7439_v61  ;;  %v4710_v32 = vadd.f32 %v4709_v15, %v4708_v31 }
 0xfe7   : > { %v4017_v43 = vadd.f32 %v4710_v32, %v7439_v61  ;;  %v7474_v57 = vadd.f32 %v4014_v44, %v7326_v48 }
 0xfe9   : > { %4080 = vadd.xlane.f32.xlu0 %v7474_v57  ;;  %v7478_v22 = vadd.f32 %v4017_v43, %v7323_v40 }
 0xfeb   : > { %4082 = vadd.xlane.f32.xlu1 %v7478_v22 }
0x1005   : > { %v4711_v34 = vpop.f32.mrb[112].mxu1 }
0x1006   : > { %v4712_v55 = vpop.f32.mrb[113].mxu1 }
0x1007   : > { %v4713_v53 = vadd.f32 %v4712_v55, %v4711_v34  ;;  %v4714_v18 = vpop.f32.mrb[114].mxu1 }
0x1008   : > { %v4715_v42 = vpop.f32.mrb[115].mxu1 }
0x1009   : > { %v4022_v25 = vadd.f32 %v4713_v53, %v7439_v61  ;;  %v4716_v8 = vadd.f32 %v4715_v42, %v4714_v18 }
0x100b   : > { %v4025_v54 = vadd.f32 %v4716_v8, %v7439_v61  ;;  %v7484_v48 = vadd.f32 %v4022_v25, %v7336_v9 }
0x100d   : > { %4084 = vadd.xlane.f32.xlu0 %v7484_v48  ;;  %v4717_v33 = vpop.f32.mrb[116].mxu1  ;;  %v7488_v40 = vadd.f32 %v4025_v54, %v7339_v30 }
0x100e   : > { %v4718_v41 = vpop.f32.mrb[117].mxu1 }
0x100f   : > { %v4719_v11 = vadd.f32 %v4718_v41, %v4717_v33  ;;  %4086 = vadd.xlane.f32.xlu1 %v7488_v40  ;;  %v4720_v1 = vpop.f32.mrb[118].mxu1 }
0x1010   : > { %v4721_v63 = vpop.f32.mrb[119].mxu1 }
0x1011   : > { %v4030_v28 = vadd.f32 %v4719_v11, %v7439_v61  ;;  %v4722_v39 = vadd.f32 %v4721_v63, %v4720_v1 }
0x1013   : > { %v4033_v13 = vadd.f32 %v4722_v39, %v7439_v61  ;;  %v7494_v9 = vadd.f32 %v4030_v28, %v7352_v62 }
0x1015   : > { %4088 = vadd.xlane.f32.xlu0 %v7494_v9  ;;  %v4723_v12 = vpop.f32.mrb[120].mxu1  ;;  %v7498_v30 = vadd.f32 %v4033_v13, %v7349_v35 }
0x1016   : > { %v4724_v38 = vpop.f32.mrb[121].mxu1 }
0x1017   : > { %v4725_v21 = vadd.f32 %v4724_v38, %v4723_v12  ;;  %4090 = vadd.xlane.f32.xlu1 %v7498_v30  ;;  %v4726_v26 = vpop.f32.mrb[122].mxu1 }
0x1018   : > { %v4727_v0 = vpop.f32.mrb[123].mxu1 }
0x1019   : > { %v4038_v47 = vadd.f32 %v4725_v21, %v7439_v61  ;;  %v4728_v50 = vadd.f32 %v4727_v0, %v4726_v26 }
0x101b   : > { %v4041_v56 = vadd.f32 %v4728_v50, %v7439_v61  ;;  %v7504_v62 = vadd.f32 %v4038_v47, %v7366_v14 }
0x101d   : > { %4092 = vadd.xlane.f32.xlu0 %v7504_v62  ;;  %v4729_v16 = vpop.f32.mrb[124].mxu1  ;;  %v7508_v35 = vadd.f32 %v4041_v56, %v7362_v2 }
0x101e   : > { %v4730_v58 = vpop.f32.mrb[125].mxu1 }
0x101f   : > { %v4731_v24 = vadd.f32 %v4730_v58, %v4729_v16  ;;  %4094 = vadd.xlane.f32.xlu1 %v7508_v35  ;;  %v4732_v59 = vpop.f32.mrb[126].mxu1 }
0x1020   : > { %v4733_v4 = vpop.f32.mrb[127].mxu1 }
0x1021   : > { %v4046_v27 = vadd.f32 %v4731_v24, %v7439_v61  ;;  %v4734_v37 = vadd.f32 %v4733_v4, %v4732_v59 }
0x1023   : > { %v4049_v19 = vadd.f32 %v4734_v37, %v7439_v61  ;;  %v7514_v14 = vadd.f32 %v4046_v27, %v7378_v6 }
0x1025   : > { %4096 = vadd.xlane.f32.xlu0 %v7514_v14  ;;  %v7518_v29 = vadd.f32 %v4049_v19, %v7375_v36 }
0x1027   : > { %4098 = vadd.xlane.f32.xlu1 %v7518_v29 }
0x105e   : > { %v4069_v2 = vpop.xlane.xlu0 %4068 }
0x105f   : > { %v4100_v23 = vmul.f32 0.0078125, %v4069_v2 }
0x1060   : > { %v4071_v45 = vpop.xlane.xlu1 %4070 }
0x1061   : > { %v7522_v17 = vsub.f32 %v7444_v5, %v4100_v23  ;;  %v4101_v20 = vmul.f32 0.0078125, %v4071_v45 }
0x1063   : > { %v7525_v60 = vsub.f32 %v7448_v7, %v4101_v20  ;;  %v4132_v6 = vmul.f32 %v7522_v17, %v7522_v17 }
0x1065   : > { %4148 = vadd.xlane.f32.xlu0 %v4132_v6  ;;  %v4133_v36 = vmul.f32 %v7525_v60, %v7525_v60 }
0x1066   : > { %v4073_v61 = vpop.xlane.xlu0 %4072 }
0x1067   : > { %v4102_v46 = vmul.f32 0.0078125, %v4073_v61  ;;  %4150 = vadd.xlane.f32.xlu1 %v4133_v36 }
0x1068   : > { %v4075_v52 = vpop.xlane.xlu1 %4074 }
0x1069   : > { %v7532_v31 = vsub.f32 %v7454_v3, %v4102_v46  ;;  %v4103_v5 = vmul.f32 0.0078125, %v4075_v52 }
0x106b   : > { %v7535_v15 = vsub.f32 %v7458_v10, %v4103_v5  ;;  %v4134_v7 = vmul.f32 %v7532_v31, %v7532_v31 }
0x106d   : > { %4152 = vadd.xlane.f32.xlu0 %v4134_v7  ;;  %v4135_v44 = vmul.f32 %v7535_v15, %v7535_v15 }
0x106e   : > { %v4077_v32 = vpop.xlane.xlu0 %4076 }
0x106f   : > { %v4104_v43 = vmul.f32 0.0078125, %v4077_v32  ;;  %4154 = vadd.xlane.f32.xlu1 %v4135_v44 }
0x1070   : > { %v4079_v34 = vpop.xlane.xlu1 %4078 }
0x1071   : > { %v7542_v55 = vsub.f32 %v7464_v51, %v4104_v43  ;;  %v4105_v3 = vmul.f32 0.0078125, %v4079_v34  ;;  %v7604_v43 = vld [vmem:[%s7700_s15] ss:$0 sm:$0xff] }
0x1073   : > { %v7545_v53 = vsub.f32 %v7468_v49, %v4105_v3  ;;  %v4136_v10 = vmul.f32 %v7542_v55, %v7542_v55 }
0x1075   : > { %4156 = vadd.xlane.f32.xlu0 %v4136_v10  ;;  %v4137_v18 = vmul.f32 %v7545_v53, %v7545_v53 }
0x1076   : > { %v4081_v42 = vpop.xlane.xlu0 %4080 }
0x1077   : > { %v4106_v25 = vmul.f32 0.0078125, %v4081_v42  ;;  %4158 = vadd.xlane.f32.xlu1 %v4137_v18  ;;  %v7610_v18 = vld [vmem:[%s7701_s16] ss:$0 sm:$0xff] }
0x1078   : > { %v4083_v8 = vpop.xlane.xlu1 %4082 }
0x1079   : > { %v7552_v54 = vsub.f32 %v7474_v57, %v4106_v25  ;;  %v4107_v51 = vmul.f32 0.0078125, %v4083_v8 }
0x107b   : > { %v7555_v33 = vsub.f32 %v7478_v22, %v4107_v51  ;;  %v4138_v49 = vmul.f32 %v7552_v54, %v7552_v54 }
0x107d   : > { %4160 = vadd.xlane.f32.xlu0 %v4138_v49  ;;  %v4139_v41 = vmul.f32 %v7555_v33, %v7555_v33 }
0x107f   : > { %4162 = vadd.xlane.f32.xlu1 %v4139_v41 }
0x109a   : > { %v4085_v11 = vpop.xlane.xlu0 %4084 }
0x109b   : > { %v4108_v1 = vmul.f32 0.0078125, %v4085_v11 }
0x109c   : > { %v4087_v63 = vpop.xlane.xlu1 %4086 }
0x109d   : > { %v7562_v28 = vsub.f32 %v7484_v48, %v4108_v1  ;;  %v4109_v57 = vmul.f32 0.0078125, %v4087_v63 }
0x109f   : > { %v7565_v39 = vsub.f32 %v7488_v40, %v4109_v57  ;;  %v4140_v22 = vmul.f32 %v7562_v28, %v7562_v28 }
0x10a1   : > { %4164 = vadd.xlane.f32.xlu0 %v4140_v22  ;;  %v4141_v13 = vmul.f32 %v7565_v39, %v7565_v39 }
0x10a2   : > { %v4089_v12 = vpop.xlane.xlu0 %4088 }
0x10a3   : > { %v4110_v38 = vmul.f32 0.0078125, %v4089_v12  ;;  %4166 = vadd.xlane.f32.xlu1 %v4141_v13 }
0x10a4   : > { %v4091_v21 = vpop.xlane.xlu1 %4090 }
0x10a5   : > { %v7572_v26 = vsub.f32 %v7494_v9, %v4110_v38  ;;  %v4111_v48 = vmul.f32 0.0078125, %v4091_v21 }
0x10a7   : > { %v7575_v0 = vsub.f32 %v7498_v30, %v4111_v48  ;;  %v4142_v40 = vmul.f32 %v7572_v26, %v7572_v26 }
0x10a9   : > { %4168 = vadd.xlane.f32.xlu0 %v4142_v40  ;;  %v4143_v47 = vmul.f32 %v7575_v0, %v7575_v0 }
0x10aa   : > { %v4093_v50 = vpop.xlane.xlu0 %4092 }
0x10ab   : > { %v4112_v56 = vmul.f32 0.0078125, %v4093_v50  ;;  %4170 = vadd.xlane.f32.xlu1 %v4143_v47 }
0x10ac   : > { %v4095_v16 = vpop.xlane.xlu1 %4094 }
0x10ad   : > { %v7582_v58 = vsub.f32 %v7504_v62, %v4112_v56  ;;  %v4113_v9 = vmul.f32 0.0078125, %v4095_v16 }
0x10af   : > { %v7585_v24 = vsub.f32 %v7508_v35, %v4113_v9  ;;  %v4144_v30 = vmul.f32 %v7582_v58, %v7582_v58 }
0x10b1   : > { %4172 = vadd.xlane.f32.xlu0 %v4144_v30  ;;  %v4145_v59 = vmul.f32 %v7585_v24, %v7585_v24 }
0x10b2   : > { %v4097_v4 = vpop.xlane.xlu0 %4096 }
0x10b3   : > { %v4114_v27 = vmul.f32 0.0078125, %v4097_v4  ;;  %4174 = vadd.xlane.f32.xlu1 %v4145_v59 }
0x10b4   : > { %v4099_v37 = vpop.xlane.xlu1 %4098 }
0x10b5   : > { %v7592_v19 = vsub.f32 %v7514_v14, %v4114_v27  ;;  %v4115_v62 = vmul.f32 0.0078125, %v4099_v37 }
0x10b7   : > { %v7595_v2 = vsub.f32 %v7518_v29, %v4115_v62  ;;  %v4146_v35 = vmul.f32 %v7592_v19, %v7592_v19 }
0x10b9   : > { %4176 = vadd.xlane.f32.xlu0 %v4146_v35  ;;  %v4147_v23 = vmul.f32 %v7595_v2, %v7595_v2 }
0x10bb   : > { %4178 = vadd.xlane.f32.xlu1 %v4147_v23 }
0x10f2   : > { %v4149_v45 = vpop.xlane.xlu0 %4148 }
0x10f3   : > { %v4180_v20 = vmul.f32 0.0078125, %v4149_v45 }
0x10f4   : > { %v4151_v6 = vpop.xlane.xlu1 %4150 }
0x10f5   : > { %v4196_v36 = vadd.f32 1e-05, %v4180_v20  ;;  %v4181_v61 = vmul.f32 0.0078125, %v4151_v6 }
0x10f7   : > { %5643 = vrsqrt.f32 %v4196_v36  ;;  %v4197_v14 = vadd.f32 1e-05, %v4181_v61 }
0x10f9   : > { %5645 = vrsqrt.f32 %v4197_v14 }
0x10fa   : > { %v4153_v46 = vpop.xlane.xlu0 %4152 }
0x10fb   : > { %v4182_v52 = vmul.f32 0.0078125, %v4153_v46 }
0x10fc   : > { %v4155_v29 = vpop.xlane.xlu1 %4154 }
0x10fd   : > { %v4198_v5 = vadd.f32 1e-05, %v4182_v52  ;;  %v4183_v7 = vmul.f32 0.0078125, %v4155_v29 }
0x10ff   : > { %5647 = vrsqrt.f32 %v4198_v5  ;;  %v4199_v44 = vadd.f32 1e-05, %v4183_v7 }
0x1101   : > { %v5644_v32 = vpop.eup %5643  ;;  %5649 = vrsqrt.f32 %v4199_v44 }
0x1102   : > { %v4228_v34 = vmul.f32 %v5644_v32, %v7522_v17  ;;  %v4157_v3 = vpop.xlane.xlu0 %4156 }
0x1103   : > { %v5646_v10 = vpop.eup %5645  ;;  %v4184_v42 = vmul.f32 0.0078125, %v4157_v3 }
0x1104   : > { %v4251_v25 = vmul.f32 %v7604_v43, %v4228_v34  ;;  %v4229_v8 = vmul.f32 %v5646_v10, %v7525_v60  ;;  %v4159_v51 = vpop.xlane.xlu1 %4158 }
0x1105   : > { %v4200_v17 = vadd.f32 1e-05, %v4184_v42  ;;  %v4185_v49 = vmul.f32 0.0078125, %v4159_v51 }
0x1106   : > { %v4274_v41 = vadd.f32 %v7610_v18, %v4251_v25  ;;  %v4252_v11 = vmul.f32 %v7604_v43, %v4229_v8 }
0x1107   : > { %5651 = vrsqrt.f32 %v4200_v17  ;;  %v4201_v1 = vadd.f32 1e-05, %v4185_v49 }
0x1108   : > { %4290 = vst [vmem:[%s7619_s19] sm:$0xff] %v4274_v41  ;;  %v4275_v60 = vadd.f32 %v7610_v18, %v4252_v11 }
0x1109   : > { %v5648_v63 = vpop.eup %5647  ;;  %5653 = vrsqrt.f32 %v4201_v1 }
0x110a   : > { %4291 = vst [vmem:[%s7619_s19 + $0x8] sm:$0xff] %v4275_v60  ;;  %v4230_v57 = vmul.f32 %v5648_v63, %v7532_v31  ;;  %v4161_v22 = vpop.xlane.xlu0 %4160 }
0x110b   : > { %v5650_v13 = vpop.eup %5649  ;;  %v4186_v12 = vmul.f32 0.0078125, %v4161_v22 }
0x110c   : > { %v4253_v38 = vmul.f32 %v7604_v43, %v4230_v57  ;;  %v4231_v21 = vmul.f32 %v5650_v13, %v7535_v15  ;;  %v4163_v48 = vpop.xlane.xlu1 %4162 }
0x110d   : > { %v4202_v40 = vadd.f32 1e-05, %v4186_v12  ;;  %v4187_v47 = vmul.f32 0.0078125, %v4163_v48 }
0x110e   : > { %v4276_v50 = vadd.f32 %v7610_v18, %v4253_v38  ;;  %v4254_v56 = vmul.f32 %v7604_v43, %v4231_v21 }
0x110f   : > { %5655 = vrsqrt.f32 %v4202_v40  ;;  %v4203_v16 = vadd.f32 1e-05, %v4187_v47 }
0x1110   : > { %4292 = vst [vmem:[%s7619_s19 + $0x10] sm:$0xff] %v4276_v50  ;;  %v4277_v31 = vadd.f32 %v7610_v18, %v4254_v56 }
0x1111   : > { %v5652_v9 = vpop.eup %5651  ;;  %5657 = vrsqrt.f32 %v4203_v16 }
0x1112   : > { %4293 = vst [vmem:[%s7619_s19 + $0x18] sm:$0xff] %v4277_v31  ;;  %v4232_v30 = vmul.f32 %v5652_v9, %v7542_v55 }
0x1113   : > { %v5654_v15 = vpop.eup %5653 }
0x1114   : > { %v4255_v59 = vmul.f32 %v7604_v43, %v4232_v30  ;;  %v4233_v4 = vmul.f32 %v5654_v15, %v7545_v53 }
0x1116   : > { %v4278_v27 = vadd.f32 %v7610_v18, %v4255_v59  ;;  %v4256_v37 = vmul.f32 %v7604_v43, %v4233_v4 }
0x1118   : > { %4294 = vst [vmem:[%s7619_s19 + $0x20] sm:$0xff] %v4278_v27  ;;  %v4279_v62 = vadd.f32 %v7610_v18, %v4256_v37 }
0x1119   : > { %v5656_v35 = vpop.eup %5655 }
0x111a   : > { %4295 = vst [vmem:[%s7619_s19 + $0x28] sm:$0xff] %v4279_v62  ;;  %v4234_v23 = vmul.f32 %v5656_v35, %v7552_v54 }
0x111b   : > { %v5658_v45 = vpop.eup %5657 }
0x111c   : > { %v4257_v55 = vmul.f32 %v7604_v43, %v4234_v23  ;;  %v4235_v20 = vmul.f32 %v5658_v45, %v7555_v33 }
0x111e   : > { %v4280_v6 = vadd.f32 %v7610_v18, %v4257_v55  ;;  %v4258_v53 = vmul.f32 %v7604_v43, %v4235_v20 }
0x1120   : > { %4296 = vst [vmem:[%s7619_s19 + $0x30] sm:$0xff] %v4280_v6  ;;  %v4281_v36 = vadd.f32 %v7610_v18, %v4258_v53 }
0x1122   : > { %4297 = vst [vmem:[%s7619_s19 + $0x38] sm:$0xff] %v4281_v36 }
0x112e   : > { %v4165_v61 = vpop.xlane.xlu0 %4164 }
0x112f   : > { %v4188_v14 = vmul.f32 0.0078125, %v4165_v61 }
0x1130   : > { %v4167_v46 = vpop.xlane.xlu1 %4166 }
0x1131   : > { %v4204_v52 = vadd.f32 1e-05, %v4188_v14  ;;  %v4189_v29 = vmul.f32 0.0078125, %v4167_v46 }
0x1133   : > { %5659 = vrsqrt.f32 %v4204_v52  ;;  %v4205_v54 = vadd.f32 1e-05, %v4189_v29 }
0x1135   : > { %5661 = vrsqrt.f32 %v4205_v54 }
0x1136   : > { %v4169_v5 = vpop.xlane.xlu0 %4168 }
0x1137   : > { %v4190_v7 = vmul.f32 0.0078125, %v4169_v5 }
0x1138   : > { %v4171_v44 = vpop.xlane.xlu1 %4170 }
0x1139   : > { %v4206_v33 = vadd.f32 1e-05, %v4190_v7  ;;  %v4191_v32 = vmul.f32 0.0078125, %v4171_v44 }
0x113b   : > { %5663 = vrsqrt.f32 %v4206_v33  ;;  %v4207_v34 = vadd.f32 1e-05, %v4191_v32 }
0x113d   : > { %v5660_v3 = vpop.eup %5659  ;;  %5665 = vrsqrt.f32 %v4207_v34 }
0x113e   : > { %v4236_v10 = vmul.f32 %v5660_v3, %v7562_v28  ;;  %v4173_v42 = vpop.xlane.xlu0 %4172 }
0x113f   : > { %v5662_v25 = vpop.eup %5661  ;;  %v4192_v8 = vmul.f32 0.0078125, %v4173_v42 }
0x1140   : > { %v4259_v51 = vmul.f32 %v7604_v43, %v4236_v10  ;;  %v4237_v17 = vmul.f32 %v5662_v25, %v7565_v39  ;;  %v4175_v49 = vpop.xlane.xlu1 %4174 }
0x1141   : > { %v4208_v41 = vadd.f32 1e-05, %v4192_v8  ;;  %v4193_v11 = vmul.f32 0.0078125, %v4175_v49 }
0x1142   : > { %v4282_v1 = vadd.f32 %v7610_v18, %v4259_v51  ;;  %v4260_v60 = vmul.f32 %v7604_v43, %v4237_v17 }
0x1143   : > { %5667 = vrsqrt.f32 %v4208_v41  ;;  %v4209_v63 = vadd.f32 1e-05, %v4193_v11 }
0x1144   : > { %4298 = vst [vmem:[%s7619_s19 + $0x40] sm:$0xff] %v4282_v1  ;;  %v4283_v28 = vadd.f32 %v7610_v18, %v4260_v60 }
0x1145   : > { %v5664_v57 = vpop.eup %5663  ;;  %5669 = vrsqrt.f32 %v4209_v63 }
0x1146   : > { %4299 = vst [vmem:[%s7619_s19 + $0x48] sm:$0xff] %v4283_v28  ;;  %v4238_v22 = vmul.f32 %v5664_v57, %v7572_v26  ;;  %v4177_v13 = vpop.xlane.xlu0 %4176 }
0x1147   : > { %v5666_v39 = vpop.eup %5665  ;;  %v4194_v12 = vmul.f32 0.0078125, %v4177_v13 }
0x1148   : > { %v4261_v38 = vmul.f32 %v7604_v43, %v4238_v22  ;;  %v4239_v21 = vmul.f32 %v5666_v39, %v7575_v0  ;;  %v4179_v48 = vpop.xlane.xlu1 %4178 }
0x1149   : > { %v4210_v40 = vadd.f32 1e-05, %v4194_v12  ;;  %v4195_v47 = vmul.f32 0.0078125, %v4179_v48 }
0x114a   : > { %v4284_v50 = vadd.f32 %v7610_v18, %v4261_v38  ;;  %v4262_v56 = vmul.f32 %v7604_v43, %v4239_v21 }
0x114b   : > { %5671 = vrsqrt.f32 %v4210_v40  ;;  %v4211_v16 = vadd.f32 1e-05, %v4195_v47 }
0x114c   : > { %4300 = vst [vmem:[%s7619_s19 + $0x50] sm:$0xff] %v4284_v50  ;;  %v4285_v26 = vadd.f32 %v7610_v18, %v4262_v56 }
0x114d   : > { %v5668_v31 = vpop.eup %5667  ;;  %5673 = vrsqrt.f32 %v4211_v16 }
0x114e   : > { %4301 = vst [vmem:[%s7619_s19 + $0x58] sm:$0xff] %v4285_v26  ;;  %v4240_v9 = vmul.f32 %v5668_v31, %v7582_v58 }
0x114f   : > { %v5670_v0 = vpop.eup %5669 }
0x1150   : > { %v4263_v30 = vmul.f32 %v7604_v43, %v4240_v9  ;;  %v4241_v15 = vmul.f32 %v5670_v0, %v7585_v24 }
0x1152   : > { %v4286_v59 = vadd.f32 %v7610_v18, %v4263_v30  ;;  %v4264_v4 = vmul.f32 %v7604_v43, %v4241_v15 }
0x1154   : > { %4302 = vst [vmem:[%s7619_s19 + $0x60] sm:$0xff] %v4286_v59  ;;  %v4287_v27 = vadd.f32 %v7610_v18, %v4264_v4 }
0x1155   : > { %v5672_v37 = vpop.eup %5671 }
0x1156   : > { %4303 = vst [vmem:[%s7619_s19 + $0x68] sm:$0xff] %v4287_v27  ;;  %v4242_v62 = vmul.f32 %v5672_v37, %v7592_v19 }
0x1157   : > { %v5674_v35 = vpop.eup %5673 }
0x1158   : > { %v4265_v58 = vmul.f32 %v7604_v43, %v4242_v62  ;;  %v4243_v23 = vmul.f32 %v5674_v35, %v7595_v2 }
0x115a   : > { %v4288_v45 = vadd.f32 %v7610_v18, %v4265_v58  ;;  %v4266_v24 = vmul.f32 %v7604_v43, %v4243_v23 }
0x115c   : > { %4304 = vst [vmem:[%s7619_s19 + $0x70] sm:$0xff] %v4288_v45  ;;  %v4289_v55 = vadd.f32 %v7610_v18, %v4266_v24 }
0x115e   : > { %4305 = vst [vmem:[%s7619_s19 + $0x78] sm:$0xff] %v4289_v55 }
0x115f PF: > { %s27_s24 = sadd.s32 1, %s5697_s24  }
0x1160   : > { %p24_p4 = scmp.ge.s32.totalorder %s27_s24, 6  }
0x1162   :  { %26 = sbr.rel (!%p24_p4) target bundleno = 3 (0x3), region = 118 }

</bundles_post_ra>
